<compile_context>
chip_gen: v6e
topology: v6e:2x2x1
jax: 0.10.0
libtpu: 0.0.40
codegen_flags: <defaults>
</compile_context>

<pallas_src>
import functools
import math

import jax
import jax.numpy as jnp
from jax.experimental import pallas as pl
from jax.experimental.pallas import tpu as pltpu


def _memory_kernel(mi_ref, qi_ref, mo_ref, qo_ref, *out_refs,
                   scale, d_o, d_q, matmul_dtype, return_p):
    if return_p:
        p_ref, out_ref = out_refs
    else:
        (out_ref,) = out_refs

    mi = mi_ref[0]                       # (D_e, THW)   keys, THW lane-dense
    qi = qi_ref[0] * scale               # (D_e, TILE)  fold 1/sqrt(D_e) into the small slab

    # logits = mi^T @ qi -> (THW, TILE). Tiny-K (D_e) contraction: keep f32
    # (FLOPs negligible; f32 logits preserve softmax accuracy). If lowering ever
    # shows an XLU vxpose of the THW slab here, pre-transpose mi in the wrapper.
    logits = jax.lax.dot_general(
        mi, qi,
        dimension_numbers=(((0,), (0,)), ((), ())),
        preferred_element_type=jnp.float32,
    )

    # Softmax over the THW (memory) axis == axis 0 (sublanes). No padded-row
    # mask needed: mi / mo are passed at their true THW extent.
    m = jnp.max(logits, axis=0, keepdims=True)
    e = jnp.exp(logits - m)
    s = jnp.sum(e, axis=0, keepdims=True)
    p = e * pl.reciprocal(s, approx=False)      # EUP reciprocal (keeps 1e-5 match)

    if return_p:
        p_ref[0] = p.astype(p_ref.dtype)

    # mem = mo @ p -> (D_o, TILE). Dominant FLOPs: cast both operands to bf16
    # (f32 accumulate) when the accuracy budget allows.
    mem = jnp.dot(mo_ref[0].astype(matmul_dtype), p.astype(matmul_dtype),
                  preferred_element_type=jnp.float32)

    # Fused channel concat: [mem ; q_out] into one lane-dense output block.
    # (D_o % 8 != 0 only costs a masked store on this small block.)
    out_ref[0, pl.ds(0, d_o), :] = mem.astype(out_ref.dtype)
    out_ref[0, pl.ds(d_o, d_q), :] = qo_ref[0].astype(out_ref.dtype)


def _round_up(x, m):
    return (x + m - 1) // m * m


def memory_forward(m_in, m_out, q_in, q_out, *,
                   use_bf16_matmul=True, return_p=True, p_dtype=jnp.float32):
    B, D_e, T, H, W = m_in.shape
    D_o = m_out.shape[1]
    D_q = q_out.shape[1]
    THW = T * H * W
    HW = H * W
    d_total = D_o + D_q
    out_dtype = q_out.dtype
    out_isize = jnp.dtype(out_dtype).itemsize
    p_isize = jnp.dtype(p_dtype).itemsize

    # --- generation-aware VMEM budget ---------------------------------------
    try:
        info = pltpu.get_tpu_info()
        vmem_cap = int(getattr(info, "vmem_capacity_bytes", 64 * 1024 * 1024))
    except Exception:  # CPU interpret / query unavailable: assume v7x-safe 64 MiB
        vmem_cap = 64 * 1024 * 1024
    budget = int(0.75 * vmem_cap)

    def vmem_need(tile):
        # mi + mo blocks (conservatively counted double-buffered, f32)
        resident = 2 * 4 * THW * (D_e + D_o)
        # streaming (double-buffered) qi / qo / fused-out blocks
        streaming = 2 * (4 * D_e * tile + 4 * D_q * tile + out_isize * d_total * tile)
        if return_p:
            streaming += 2 * p_isize * THW * tile
        # logits / e / p / bf16 copies temporaries
        temps = 5 * 4 * THW * tile
        return resident + streaming + temps + (2 << 20)

    # --- HW tiling: lane-aligned, minimal padding, VMEM-fitting --------------
    hw128 = _round_up(HW, 128)          # minimal lane-aligned extent
    tile_hw = 128
    for k in range(hw128 // 128, 0, -1):
        t = k * 128
        if hw128 % t == 0 and vmem_need(t) <= budget:
            tile_hw = t
            break
    # Megacore (v7x has 2 TCs): make sure the parallel grid has >=2 work units.
    if B == 1 and hw128 // tile_hw == 1 and hw128 > 128:
        for k in range(hw128 // 256, 0, -1):
            t = k * 128
            if hw128 % t == 0:
                tile_hw = t
                break
    hw_pad = hw128
    n_hw = hw_pad // tile_hw

    vmem_limit = int(min(budget, max(vmem_need(tile_hw), 32 * 1024 * 1024)))

    # --- wrapper-side reshapes (no copies of the big m_in / m_out streams) ---
    mi = m_in.reshape(B, D_e, THW)
    mo = m_out.reshape(B, D_o, THW)
    qi = q_in.reshape(B, D_e, HW)
    qo = q_out.reshape(B, D_q, HW)
    if hw_pad != HW:                    # only the small query slabs get padded
        qi = jnp.pad(qi, ((0, 0), (0, 0), (0, hw_pad - HW)))
        qo = jnp.pad(qo, ((0, 0), (0, 0), (0, hw_pad - HW)))

    kernel = functools.partial(
        _memory_kernel,
        scale=1.0 / math.sqrt(D_e),
        d_o=D_o,
        d_q=D_q,
        matmul_dtype=jnp.bfloat16 if use_bf16_matmul else jnp.float32,
        return_p=return_p,
    )

    out_struct = jax.ShapeDtypeStruct((B, d_total, hw_pad), out_dtype)
    out_spec = pl.BlockSpec((1, d_total, tile_hw), lambda b, j: (b, 0, j))
    if return_p:
        p_struct = jax.ShapeDtypeStruct((B, THW, hw_pad), p_dtype)
        p_spec = pl.BlockSpec((1, THW, tile_hw), lambda b, j: (b, 0, j))
        out_shape = (p_struct, out_struct)
        out_specs = [p_spec, out_spec]
    else:
        out_shape = (out_struct,)
        out_specs = [out_spec]

    results = pl.pallas_call(
        kernel,
        out_shape=out_shape,
        grid_spec=pltpu.PrefetchScalarGridSpec(
            num_scalar_prefetch=0,
            grid=(B, n_hw),
            in_specs=[
                # mi / mo block indices ignore the HW-tile axis -> VMEM-resident
                # across the inner loop (no re-DMA per tile).
                pl.BlockSpec((1, D_e, THW), lambda b, j: (b, 0, 0)),
                pl.BlockSpec((1, D_e, tile_hw), lambda b, j: (b, 0, j)),
                pl.BlockSpec((1, D_o, THW), lambda b, j: (b, 0, 0)),
                pl.BlockSpec((1, D_q, tile_hw), lambda b, j: (b, 0, j)),
            ],
            out_specs=out_specs,
        ),
        compiler_params=pltpu.CompilerParams(
            dimension_semantics=("parallel", "parallel"),
            vmem_limit_bytes=vmem_limit,
        ),
    )(mi, qi, mo, qo)

    if return_p:
        p_full, out_full = results
    else:
        (out_full,) = results
        p_full = None

    out_full = out_full[:, :, :HW] if hw_pad != HW else out_full
    mem_out = out_full.reshape(B, d_total, H, W)
    if return_p:
        p = p_full[:, :, :HW] if hw_pad != HW else p_full
        return mem_out, p
    return mem_out


def _memory_reference(m_in, m_out, q_in, q_out):
    """Pure-JAX reference matching the PyTorch forward exactly (f32)."""
    B, D_e, T, H, W = m_in.shape
    D_o = m_out.shape[1]
    mi = jnp.transpose(m_in.reshape(B, D_e, T * H * W), (0, 2, 1))
    qi = q_in.reshape(B, D_e, H * W)
    p = jnp.einsum("bld,bdh->blh", mi, qi) / math.sqrt(D_e)
    p = jax.nn.softmax(p, axis=1)
    mo = m_out.reshape(B, D_o, T * H * W)
    mem = jnp.einsum("bdl,blh->bdh", mo, p).reshape(B, D_o, H, W)
    mem_out = jnp.concatenate([mem, q_out], axis=1)
    return mem_out, p


def _run_case(key, B, D_e, D_o, D_q, T, H, W, *, use_bf16, return_p):
    k1, k2, k3, k4 = jax.random.split(key, 4)
    m_in = jax.random.normal(k1, (B, D_e, T, H, W), dtype=jnp.float32)
    m_out = jax.random.normal(k2, (B, D_o, T, H, W), dtype=jnp.float32)
    q_in = jax.random.normal(k3, (B, D_e, H, W), dtype=jnp.float32)
    q_out = jax.random.normal(k4, (B, D_q, H, W), dtype=jnp.float32)

    res = memory_forward(m_in, m_out, q_in, q_out,
                         use_bf16_matmul=use_bf16, return_p=return_p)
    jax.block_until_ready(res)
    mem_out_ref, p_ref = _memory_reference(m_in, m_out, q_in, q_out)

    if return_p:
        mem_out, p = res
        assert p.shape == (B, T * H * W, H * W)
        # logits dot + softmax are always f32 -> p matches tightly in both modes
        assert jnp.allclose(p, p_ref, atol=1e-5, rtol=1e-5)
    else:
        mem_out = res
    assert mem_out.shape == (B, D_o + D_q, H, W)
    if use_bf16:
        assert jnp.allclose(mem_out, mem_out_ref, atol=5e-2, rtol=5e-2)
    else:
        assert jnp.allclose(mem_out, mem_out_ref, atol=1e-5, rtol=1e-5)


if __name__ == "__main__":
    key = jax.random.PRNGKey(0)
    k_a, k_b, k_c = jax.random.split(key, 3)

    # Case 1: aligned shapes, full-f32 path, tight 1e-5 check.
    _run_case(k_a, B=2, D_e=4, D_o=4, D_q=4, T=2, H=16, W=16,
              use_bf16=True, return_p=True)
    _run_case(k_a, B=2, D_e=4, D_o=4, D_q=4, T=2, H=16, W=16,
              use_bf16=False, return_p=True)

    # Case 2: ragged shapes (unaligned D_e/D_o/THW/HW) with the bf16 mem-dot.
    _run_case(k_b, B=2, D_e=5, D_o=6, D_q=3, T=3, H=10, W=10,
              use_bf16=True, return_p=True)

    # Case 3: B==1 (exercises the megacore HW split) and return_p=False
    # (skips the largest HBM write).
    _run_case(k_c, B=1, D_e=4, D_o=8, D_q=4, T=2, H=16, W=16,
              use_bf16=True, return_p=False)

    print("KERNEL_OK")
</pallas_src>

<mosaic_0001>
module attributes {stable_mosaic.version = 11 : i64} {
  func.func @_memory_kernel(%arg0: i32, %arg1: i32, %arg2: memref<1x4x512xf32, #tpu.memory_space<vmem>>, %arg3: memref<1x4x256xf32, #tpu.memory_space<vmem>>, %arg4: memref<1x4x512xf32, #tpu.memory_space<vmem>>, %arg5: memref<1x4x256xf32, #tpu.memory_space<vmem>>, %arg6: memref<1x512x256xf32, #tpu.memory_space<vmem>>, %arg7: memref<1x8x256xf32, #tpu.memory_space<vmem>>) attributes {dimension_semantics = [#tpu.dimension_semantics<parallel>, #tpu.dimension_semantics<parallel>], iteration_bounds = array<i64: 2, 1>, scalar_prefetch = 0 : i64, scratch_operands = 0 : i64, tpu.core_type = #tpu.core_type<tc>, window_params = [{transform_indices = @transform_0, window_bounds = array<i64: 1, 4, 512>}, {transform_indices = @transform_1, window_bounds = array<i64: 1, 4, 256>}, {transform_indices = @transform_2, window_bounds = array<i64: 1, 4, 512>}, {transform_indices = @transform_3, window_bounds = array<i64: 1, 4, 256>}, {transform_indices = @transform_4, window_bounds = array<i64: 1, 512, 256>}, {transform_indices = @transform_5, window_bounds = array<i64: 1, 8, 256>}]} {
    %c0 = arith.constant 0 : index
    %c0_0 = arith.constant 0 : index
    %c0_1 = arith.constant 0 : index
    %0 = vector.load %arg2[%c0, %c0_0, %c0_1] : memref<1x4x512xf32, #tpu.memory_space<vmem>>, vector<1x4x512xf32>
    %1 = vector.shape_cast %0 : vector<1x4x512xf32> to vector<4x512xf32>
    %c0_2 = arith.constant 0 : index
    %c0_3 = arith.constant 0 : index
    %c0_4 = arith.constant 0 : index
    %2 = vector.load %arg3[%c0_2, %c0_3, %c0_4] : memref<1x4x256xf32, #tpu.memory_space<vmem>>, vector<1x4x256xf32>
    %3 = vector.shape_cast %2 : vector<1x4x256xf32> to vector<4x256xf32>
    %cst = arith.constant 5.000000e-01 : f32
    %4 = vector.broadcast %cst : f32 to vector<4x256xf32>
    %5 = arith.mulf %3, %4 : vector<4x256xf32>
    %cst_5 = arith.constant dense<0.000000e+00> : vector<512x256xf32>
    %6 = tpu.matmul %1, %5, %cst_5 {dimension_numbers = #tpu.dot_dimension_numbers<[0], [0], [1], [1], [0, 1, 1, 1], [], []>} : vector<4x512xf32>, vector<4x256xf32>, vector<512x256xf32> -> vector<512x256xf32>
    %cst_6 = arith.constant dense<0xFF800000> : vector<256xf32>
    %7 = vector.multi_reduction <maximumf>, %6, %cst_6 [0] : vector<512x256xf32> to vector<256xf32>
    %8 = vector.shape_cast %7 : vector<256xf32> to vector<1x256xf32>
    %9 = vector.broadcast %8 : vector<1x256xf32> to vector<512x256xf32>
    %10 = arith.subf %6, %9 : vector<512x256xf32>
    %11 = math.exp %10 : vector<512x256xf32>
    %cst_7 = arith.constant dense<0.000000e+00> : vector<256xf32>
    %12 = vector.multi_reduction <add>, %11, %cst_7 [0] : vector<512x256xf32> to vector<256xf32>
    %13 = vector.shape_cast %12 : vector<256xf32> to vector<1x256xf32>
    %14 = tpu.reciprocal %13 : vector<1x256xf32> -> vector<1x256xf32>
    %15 = vector.broadcast %14 : vector<1x256xf32> to vector<512x256xf32>
    %16 = arith.mulf %11, %15 : vector<512x256xf32>
    %c0_8 = arith.constant 0 : index
    %c0_9 = arith.constant 0 : index
    %c0_10 = arith.constant 0 : index
    %17 = vector.load %arg6[%c0_8, %c0_9, %c0_10] : memref<1x512x256xf32, #tpu.memory_space<vmem>>, vector<1x512x256xf32>
    %18 = vector.shape_cast %17 : vector<1x512x256xf32> to vector<512x256xf32>
    %19 = vector.shape_cast %16 : vector<512x256xf32> to vector<1x512x256xf32>
    tpu.vector_store %arg6[%c0_8, %c0_9, %c0_10], %19 {strides = array<i32>} : memref<1x512x256xf32, #tpu.memory_space<vmem>>, vector<1x512x256xf32>,
    %c0_11 = arith.constant 0 : index
    %c0_12 = arith.constant 0 : index
    %c0_13 = arith.constant 0 : index
    %20 = vector.load %arg4[%c0_11, %c0_12, %c0_13] : memref<1x4x512xf32, #tpu.memory_space<vmem>>, vector<1x4x512xf32>
    %21 = vector.shape_cast %20 : vector<1x4x512xf32> to vector<4x512xf32>
    %22 = arith.truncf %21 : vector<4x512xf32> to vector<4x512xbf16>
    %23 = arith.truncf %16 : vector<512x256xf32> to vector<512x256xbf16>
    %cst_14 = arith.constant dense<0.000000e+00> : vector<4x256xf32>
    %24 = tpu.matmul %22, %23, %cst_14 {dimension_numbers = #tpu.dot_dimension_numbers<[1], [0], [0], [1], [0, 0, 1, 1], [], []>} : vector<4x512xbf16>, vector<512x256xbf16>, vector<4x256xf32> -> vector<4x256xf32>
    %c0_15 = arith.constant 0 : index
    %c0_16 = arith.constant 0 : index
    %c0_17 = arith.constant 0 : index
    %25 = vector.load %arg7[%c0_15, %c0_16, %c0_17] : memref<1x8x256xf32, #tpu.memory_space<vmem>>, vector<1x4x256xf32>
    %26 = vector.shape_cast %25 : vector<1x4x256xf32> to vector<4x256xf32>
    %27 = vector.shape_cast %24 : vector<4x256xf32> to vector<1x4x256xf32>
    tpu.vector_store %arg7[%c0_15, %c0_16, %c0_17], %27 {strides = array<i32>} : memref<1x8x256xf32, #tpu.memory_space<vmem>>, vector<1x4x256xf32>,
    %c0_18 = arith.constant 0 : index
    %c0_19 = arith.constant 0 : index
    %c0_20 = arith.constant 0 : index
    %28 = vector.load %arg5[%c0_18, %c0_19, %c0_20] : memref<1x4x256xf32, #tpu.memory_space<vmem>>, vector<1x4x256xf32>
    %29 = vector.shape_cast %28 : vector<1x4x256xf32> to vector<4x256xf32>
    %c0_21 = arith.constant 0 : index
    %c4 = arith.constant 4 : index
    %c0_22 = arith.constant 0 : index
    %30 = vector.load %arg7[%c0_21, %c4, %c0_22] : memref<1x8x256xf32, #tpu.memory_space<vmem>>, vector<1x4x256xf32>
    %31 = vector.shape_cast %30 : vector<1x4x256xf32> to vector<4x256xf32>
    %32 = vector.shape_cast %29 : vector<4x256xf32> to vector<1x4x256xf32>
    tpu.vector_store %arg7[%c0_21, %c4, %c0_22], %32 {strides = array<i32>} : memref<1x8x256xf32, #tpu.memory_space<vmem>>, vector<1x4x256xf32>,
    return
  }
  func.func @transform_0(%arg0: i32, %arg1: i32) -> (i32, i32, i32) {
    %c0_i32 = arith.constant 0 : i32
    %c0_i32_0 = arith.constant 0 : i32
    %c0_i32_1 = arith.constant 0 : i32
    return %arg0, %c0_i32, %c0_i32_0 : i32, i32, i32
  }
  func.func @transform_1(%arg0: i32, %arg1: i32) -> (i32, i32, i32) {
    %c0_i32 = arith.constant 0 : i32
    %c0_i32_0 = arith.constant 0 : i32
    return %arg0, %c0_i32, %arg1 : i32, i32, i32
  }
  func.func @transform_2(%arg0: i32, %arg1: i32) -> (i32, i32, i32) {
    %c0_i32 = arith.constant 0 : i32
    %c0_i32_0 = arith.constant 0 : i32
    %c0_i32_1 = arith.constant 0 : i32
    return %arg0, %c0_i32, %c0_i32_0 : i32, i32, i32
  }
  func.func @transform_3(%arg0: i32, %arg1: i32) -> (i32, i32, i32) {
    %c0_i32 = arith.constant 0 : i32
    %c0_i32_0 = arith.constant 0 : i32
    return %arg0, %c0_i32, %arg1 : i32, i32, i32
  }
  func.func @transform_4(%arg0: i32, %arg1: i32) -> (i32, i32, i32) {
    %c0_i32 = arith.constant 0 : i32
    %c0_i32_0 = arith.constant 0 : i32
    return %arg0, %c0_i32, %arg1 : i32, i32, i32
  }
  func.func @transform_5(%arg0: i32, %arg1: i32) -> (i32, i32, i32) {
    %c0_i32 = arith.constant 0 : i32
    %c0_i32_0 = arith.constant 0 : i32
    return %arg0, %c0_i32, %arg1 : i32, i32, i32
  }
}

</mosaic_0001>

<bundles_post_ra>
// kernel: tpu_custom_call.1
= control target key start
LH: loop header
LB: loop body
LE: loop exit
PB: predicated region body
PF: predicated region fallthrough
CT: control target
= control target key end

     0   :  { %s5709_s0 = inlined_call_operand.hbm [shape: f32[2,4,512], index: 0, kind: input, shape index: {}]   ;;  %s5710_s1 = inlined_call_operand.hbm [shape: f32[2,4,256], index: 1, kind: input, shape index: {}]   ;;  %s5711_s2 = inlined_call_operand.hbm [shape: f32[2,4,512], index: 2, kind: input, shape index: {}]   ;;  %s5712_s3 = inlined_call_operand.hbm [shape: f32[2,4,256], index: 3, kind: input, shape index: {}]   ;;  %s5713_s4 = inlined_call_operand.hbm [shape: f32[2,512,256], index: 4, kind: output, shape index: {0}]   ;;  %s5714_s5 = inlined_call_operand.hbm [shape: f32[2,8,256], index: 5, kind: output, shape index: {1}]  }
   0x1   :  { %5942 = sst [smem:[#allocation114_spill]] %s5710_s1 }
   0x2   :  { %11 = vsyncpa [#allocation3], 0 }
   0x3   :  { %13 = vsyncpa [#allocation3 + $0x1], 0 }
   0x4   :  { %14 = vsyncpa [#allocation6], 0 }
   0x5   :  { %16 = vsyncpa [#allocation6 + $0x1], 0 }
   0x6   :  { %17 = vsyncpa [#allocation9], 0 }
   0x7   :  { %19 = vsyncpa [#allocation9 + $0x1], 0 }
   0x8   :  { %20 = vsyncpa [#allocation4], 0 }
   0x9   :  { %22 = vsyncpa [#allocation4 + $0x1], 0 }
   0xa   :  { %23 = vsyncpa [#allocation12], 0 }
   0xb   :  { %25 = vsyncpa [#allocation12 + $0x1], 0  ;;  %s3216_s18 = smov 0   ;;  %s3218_s19 = smov 0  }
   0xc   :  { %s3220_s20 = smov 0   ;;  %s3222_s21 = smov 0  }
   0xd   :  { %s3224_s22 = smov 0   ;;  %s3226_s23 = smov 0  }
   0xe LB: > { %5943 = sst [smem:[#allocation18_spill]] %s3163_s20  ;;  %s3247_s24 = sadd.s32 4294967295, %s3175_s23   ;;  %s3175_s23 = sphi %s3226_s23, %s31_s23   ;;  %s3171_s22 = sphi %s3224_s22, %s6481_s22   ;;  %s3167_s21 = sphi %s3222_s21, %s6480_s21   ;;  %s3163_s20 = sphi %s3220_s20, %s6476_s20   ;;  %s3159_s19 = sphi %s3218_s19, %s6479_s19   ;;  %s3155_s18 = sphi %s3216_s18, %s6478_s18  }
   0xf   : > { %5944 = sst [smem:[#allocation19_spill]] %s3175_s23  ;;  %s2491_s25 = sadd.s32 4294967294, %s3175_s23  }
  0x10   : > { %s43_s26 = sadd.s32 1, %s3171_s22  ;;  %s50_s27 = sadd.s32 1, %s3163_s20 }
  0x11   : > { %p45_p0 = scmp.ge.s32.totalorder %s43_s26, 2  ;;  %p57_p1 = scmp.ne.s32.totalorder %s3163_s20, %s3159_s19 }
  0x12   : > { %p58_p2 = scmp.eq.s32.totalorder %s3175_s23, 0  ;;  %p63_p3 = scmp.ne.s32.totalorder %s3159_s19, %s3155_s18 }
  0x13   : > { %s6483_s26 = smov (%p45_p0, %s43_s26), 0  ;;  %p64_p5 = scmp.eq.s32.totalorder %s3247_s24, 0 }
  0x14   : > { %5945 = sst [smem:[#allocation20_spill]] %s6483_s26  ;;  %p3259_p4 = por %p58_p2, %p57_p1 }
  0x15   : > { %s47_s29 = ssub.s32 %s3171_s22, %s6483_s26  ;;  %p171_p6 = scmp.eq.s32.totalorder %s3247_s24, 1 }
  0x16   : > { %p48_p7 = scmp.eq.s32.totalorder %s47_s29, 0  ;;  %p3267_p8 = por %p64_p5, %p63_p3 }
  0x17   : > { %p3271_p9 = por %p171_p6, %p57_p1  ;;  %p177_p10 = scmp.eq.s32.totalorder %s2491_s25, 1 }
  0x18   : > { %s3276_s7 = scalar_select %p48_p7, %s3163_s20, %s50_s27  }
  0x19   : > { %p3278_p11 = por %p177_p10, %p63_p3  ;;  %p2627_p13 = scmp.lt.s32.totalorder %s3175_s23, 2 }
  0x1a   : > { %5949 = sst [smem:[#allocation21_spill]] %s3276_s7  ;;  %s3285_s9 = sand.u32 1, %s3163_s20  }
  0x1b   : > { %s244_s10 = sand.u32 1, %s3175_s23   ;;  %s5716_s11 = sshll.u32 %s3285_s9, 3 }
  0x1c   : > { %p3291_p0 = pnand %p2627_p13, %p3259_p4  ;;  %s5717_s13 = sshll.u32 %s3171_s22, 7 }
  0x1d   : > { %s5952_s1 = sld [smem:[#allocation114_spill]]  ;;  %s248_s17 = scalar_lea.vmem [#allocation5], %s5716_s11 }
  0x1e   : > { %s258_s25 = sshll.u32 %s248_s17, 4  ;;  %p2506_p1 = scmp.ge.s32.totalorder %s3175_s23, 1  ;;  %s259_s25 = int_to_ptr.vmem [resolvable:$true] %s258_s25 }
  0x1f   : > { %p303_p2 = scmp.lt.s32.totalorder %s3175_s23, 3  ;;  %s3305_s27 = scalar_lea.sflag [#allocation6], %s244_s10 }
  0x20   : > { %p2947_p3 = pneg %p3291_p0  ;;  %s2958_s28 = scalar_lea.vmem %s259_s25, 128 }
  0x21   : > { %p2959_p4 = scmp.ne.s32.totalorder %s259_s25, %s2958_s28  ;;  %s3177_s29 = smov [#allocation5]  }
  0x22   : > { %s2963_s26 = sshll.u32 %s3177_s29, 4  ;;  %s2964_s26 = int_to_ptr.vmem [resolvable:$false] %s2963_s26 }
  0x23   : > { %s256_s16 = scalar_lea.hbm %s5952_s1, %s5717_s13  ;;  %p2961_p5 = pnand %p2959_p4, %p2947_p3 }
  0x24   : > { %s2965_s14 = scalar_lea.vmem %s2964_s26, 256  ;;  %p2966_p7 = scmp.lt.s32.totalorder %s259_s25, %s2964_s26 }
  0x25   : > { %p2962_p6 = pneg %p2961_p5  ;;  %p2967_p10 = scmp.lt.s32.totalorder %s2965_s14, %s2958_s28 }
  0x27   : > { %p2968_p13 = por %p2967_p10, %p2966_p7 }
  0x29   : > { %p2969_p12 = pnand %p2968_p13, %p2962_p6 }
  0x2b   : > { %2972 = shalt.err (!%p2969_p12)
}
  0x2c   : > { %2613 = dma.hbm_to_vmem [thread:$0]  (!%p3291_p0), %s256_s16, 128, %s259_s25, %s3305_s27  }
  0x2d   : > { %p3319_p4 = pnand %p2506_p1, %p303_p2  ;;  %s2494_s26 = sshll.u32 %s3285_s9, 4 }
  0x2e   : > { %s2587_s15 = sshll.u32 %s3171_s22, 8  ;;  %s229_s14 = scalar_lea.vmem [#allocation2], %s2494_s26 }
  0x2f   : > { %s235_s29 = scalar_lea.hbm %s5709_s0, %s2587_s15  ;;  %s237_s11 = sshll.u32 %s229_s14, 4  ;;  %s238_s11 = int_to_ptr.vmem [resolvable:$true] %s237_s11 }
  0x30   : > { %s3331_s7 = scalar_lea.hbm %s5711_s2, %s2587_s15  ;;  %s226_s16 = scalar_lea.sflag [#allocation3], %s3285_s9 }
  0x31   : > { %s2986_s25 = scalar_lea.vmem %s238_s11, 256  ;;  %s3178_s20 = smov [#allocation2]  }
  0x32   : > { %p2987_p12 = scmp.ne.s32.totalorder %s238_s11, %s2986_s25  ;;  %s2991_s23 = sshll.u32 %s3178_s20, 4  ;;  %s2992_s23 = int_to_ptr.vmem [resolvable:$false] %s2991_s23 }
  0x33   : > { %s2993_s17 = scalar_lea.vmem %s2992_s23, 512  ;;  %p2994_p5 = scmp.lt.s32.totalorder %s238_s11, %s2992_s23 }
  0x34   : > { %p2989_p1 = pnand %p2987_p12, %p2947_p3  ;;  %p2995_p6 = scmp.lt.s32.totalorder %s2993_s17, %s2986_s25 }
  0x36   : > { %p2990_p2 = pneg %p2989_p1  ;;  %p2996_p7 = por %p2995_p6, %p2994_p5 }
  0x38   : > { %p2997_p10 = pnand %p2996_p7, %p2990_p2 }
  0x3a   : > { %3000 = shalt.err (!%p2997_p10)
}
  0x3b   : > { %2610 = dma.hbm_to_vmem [thread:$0]  (!%p3291_p0), %s235_s29, 256, %s238_s11, %s226_s16  }
  0x3c   : > { %s269_s1 = scalar_lea.vmem [#allocation7], %s2494_s26  ;;  %s3179_s20 = smov [#allocation7]  }
  0x3d   : > { %s277_s13 = sshll.u32 %s269_s1, 4  ;;  %s3019_s28 = sshll.u32 %s3179_s20, 4  ;;  %s278_s13 = int_to_ptr.vmem [resolvable:$true] %s277_s13  ;;  %s3020_s28 = int_to_ptr.vmem [resolvable:$false] %s3019_s28 }
  0x3e   : > { %s3014_s15 = scalar_lea.vmem %s278_s13, 256  ;;  %s3021_s23 = scalar_lea.vmem %s3020_s28, 512 }
  0x3f   : > { %p3015_p13 = scmp.ne.s32.totalorder %s278_s13, %s3014_s15  ;;  %p3022_p5 = scmp.lt.s32.totalorder %s278_s13, %s3020_s28 }
  0x40   : > { %p3023_p2 = scmp.lt.s32.totalorder %s3021_s23, %s3014_s15 }
  0x41   : > { %p3017_p12 = pnand %p3015_p13, %p2947_p3 }
  0x42   : > { %p3024_p6 = por %p3023_p2, %p3022_p5 }
  0x43   : > { %p3018_p1 = pneg %p3017_p12 }
  0x45   : > { %p3025_p7 = pnand %p3024_p6, %p3018_p1 }
  0x47   : > { %3028 = shalt.err (!%p3025_p7)
}
  0x48   : > { %2616 = dma.hbm_to_vmem [thread:$0]  (!%p3291_p0), %s3331_s7, 256, %s278_s13, %s3305_s27  }
  0x49   : > { %s5954_s11 = sshll.u32 %s3171_s22, 7  ;;  %s5955_s16 = sshll.u32 %s3285_s9, 3 }
  0x4a   : > { %s296_s14 = scalar_lea.hbm %s5712_s3, %s5954_s11  ;;  %s288_s25 = scalar_lea.vmem [#allocation8], %s5955_s16 }
  0x4b   : > { %s298_s17 = sshll.u32 %s288_s25, 4  ;;  %s285_s1 = scalar_lea.sflag [#allocation9], %s3285_s9  ;;  %s299_s17 = int_to_ptr.vmem [resolvable:$true] %s298_s17 }
  0x4c   : > { %s3042_s15 = scalar_lea.vmem %s299_s17, 128  ;;  %s3180_s20 = smov [#allocation8]  }
  0x4d   : > { %p3043_p10 = scmp.ne.s32.totalorder %s299_s17, %s3042_s15  ;;  %s3047_s28 = sshll.u32 %s3180_s20, 4  ;;  %s3048_s28 = int_to_ptr.vmem [resolvable:$false] %s3047_s28 }
  0x4e   : > { %s3049_s7 = scalar_lea.vmem %s3048_s28, 256  ;;  %p3050_p1 = scmp.lt.s32.totalorder %s299_s17, %s3048_s28 }
  0x4f   : > { %p3045_p13 = pnand %p3043_p10, %p2947_p3  ;;  %p3051_p5 = scmp.lt.s32.totalorder %s3049_s7, %s3042_s15 }
  0x51   : > { %p3046_p12 = pneg %p3045_p13  ;;  %p3052_p2 = por %p3051_p5, %p3050_p1 }
  0x53   : > { %p3053_p6 = pnand %p3052_p2, %p3046_p12 }
  0x55   : > { %3056 = shalt.err (!%p3053_p6)
}
  0x56   : > { %2619 = dma.hbm_to_vmem [thread:$0]  (!%p3291_p0), %s296_s14, 128, %s299_s17, %s285_s1  }
  0x57   : > { %307 = sbr.rel (%p3319_p4) target bundleno = 1219 (0x4c3), region = 36 }
  0x5c   : > { %s3362_s9 = sand.u32 1, %s3159_s19  }
  0x5d   : > { %s3365_s27 = sshll.u32 %s3362_s9, 4  ;;  %s310_s13 = scalar_lea.sflag [#allocation3], %s3362_s9 }
  0x5e   : > { %s313_s23 = scalar_lea.vmem [#allocation2], %s3365_s27 }
  0x5f   : > { %3134 = dma.done.wait (%p3267_p8), %s310_s13, 256  }
  0x60   : > { %3136 = vsyncadd (%p3267_p8), %s310_s13, 4294967040  ;;  %s318_s12 = sand.u32 1, %s3247_s24   ;;  %s2508_s10 = sshll.u32 %s3362_s9, 3 }
  0x61   : > { %s319_s11 = scalar_lea.sflag [#allocation6], %s318_s12  ;;  %s322_s26 = scalar_lea.vmem [#allocation5], %s2508_s10 }
  0x62   : > { %3138 = dma.done.wait (%p3267_p8), %s319_s11, 384  }
  0x63   : > { %3140 = vsyncadd (%p3267_p8), %s319_s11, 4294966912  ;;  %s331_s29 = scalar_lea.vmem [#allocation7], %s3365_s27  ;;  %s337_s14 = scalar_lea.sflag [#allocation9], %s3362_s9 }
  0x64   : > { %s3381_s16 = scalar_lea.vmem [#allocation8], %s2508_s10 }
  0x65   : > { %3142 = dma.done.wait (%p3267_p8), %s337_s14, 128  }
  0x66   : > { %3144 = vsyncadd (%p3267_p8), %s337_s14, 4294967168  ;;  %v3181_v0 = vmov 0.0   ;;  %v391_v1 = vld [vmem:[%s313_s23] sm:$0xff]  ;;  %v392_v2 = vld [vmem:[%s313_s23 + $0x8] sm:$0xff]  ;;  %vm724_vm0 = vcmask 1043456   ;;  %vm531_vm1 = vcmask 31744  }
  0x67   : > { %793 = vmatprep.mubr.f32.mxu0 %v3181_v0  ;;  %1039 = vmatprep.mubr.f32.mxu1 %v3181_v0  ;;  %v393_v3 = vld [vmem:[%s322_s26] sm:$0xff]  ;;  %v397_v6 = vcombine.high %v391_v1, %v391_v1  ;;  %v398_v7 = vcombine.high %v392_v2, %v392_v2  ;;  %s2511_s24 = sshll.u32 %s3362_s9, 10  ;;  %s2591_s25 = sshll.u32 %s3167_s21, 14 }
  0x68   : > { %401 = vxpose.xlu0.b32.start.end [1/1] (short) %v391_v1, 128  ;;  %465 = vxpose.xlu1.b32.start.end [1/1] (short) %v392_v2, 128  ;;  %v394_v4 = vmul.f32 0.5, %v393_v3  ;;  %s4594_s30 = scalar_lea.vmem [#allocation10], %s2511_s24  ;;  %s5621_s15 = scalar_lea.hbm %s5713_s4, %s2591_s25 }
  0x69   : > { %s2283_s20 = sshll.u32 %s4594_s30, 4  ;;  %s5625_s28 = scalar_lea.vmem [#allocation11], %s3365_s27  ;;  %s5628_s20 = int_to_ptr.vmem [resolvable:$true] %s2283_s20 }
  0x6a   : > { %v530_v5 = vcombine.high %v394_v4, %v394_v4  ;;  %s2263_s7 = scalar_lea.sflag [#allocation4], %s3362_s9  ;;  %s3057_s13 = scalar_lea.vmem %s5628_s20, 16384 }
  0x6b   : > { %p3058_p8 = scmp.ne.s32.totalorder %s5628_s20, %s3057_s13  ;;  %s3182_s23 = smov [#allocation10]  }
  0x6c   : > { %2513 = vmatprep.subr.msk.mxu0 %vm724_vm0, %v530_v5  ;;  %2593 = vmatprep.subr.msk.mxu1 %vm724_vm0, %v530_v5  ;;  %s3061_s12 = sshll.u32 %s3182_s23, 4  ;;  %s3062_s12 = int_to_ptr.vmem [resolvable:$false] %s3061_s12 }
  0x6d   : > { %2514 = vmatpush1.msk.msra.mxu0 %vm724_vm0, %v394_v4  ;;  %2594 = vmatpush1.msk.msra.mxu1 %vm724_vm0, %v394_v4  ;;  %p3059_p0 = pnand %p3058_p8, %p3271_p9  ;;  %s3063_s27 = scalar_lea.vmem %s3062_s12, 32768 }
  0x6e   : > { %p3064_p4 = scmp.lt.s32.totalorder %s5628_s20, %s3062_s12  ;;  %p3065_p7 = scmp.lt.s32.totalorder %s3063_s27, %s3057_s13 }
  0x6f   : > { %p3060_p3 = pneg %p3059_p0 }
  0x70   : > { %p3066_p10 = por %p3065_p7, %p3064_p4 }
  0x72   : > { %p3067_p13 = pnand %p3066_p10, %p3060_p3 }
  0xa5   : > { %433 = vxpose.xlu0.b32.start.end [1/1] (short) %v397_v6, 128  ;;  %497 = vxpose.xlu1.b32.start.end [1/1] (short) %v398_v7, 128 }
  0xe4   : > { %v417_v8 = vpop.trf.xlu0  ;;  %v3389_v9 = vpop.trf.xlu1 }
  0xe5   : > { %2515 = vmatmul.mubr.msk.f32.vlgmr.msra.gmra.mxu0 %vm531_vm1, %v417_v8 }
  0xe6   : > { %799 = vmatprep.mubr.f32.mxu0 %v3181_v0 }
  0xe8   : > { %v418_v10 = vpop.trf.xlu0  ;;  %v3393_v11 = vpop.trf.xlu1 }
  0xe9   : > { %2516 = vmatmul.mubr.msk.f32.gmra.mxu0 %vm531_vm1, %v418_v10 }
  0xea   : > { %805 = vmatprep.mubr.f32.mxu0 %v3181_v0 }
  0xec   : > { %v419_v12 = vpop.trf.xlu0  ;;  %v3397_v13 = vpop.trf.xlu1 }
  0xed   : > { %2517 = vmatmul.mubr.msk.f32.gmra.mxu0 %vm531_vm1, %v419_v12 }
  0xee   : > { %811 = vmatprep.mubr.f32.mxu0 %v3181_v0 }
  0xf0   : > { %v420_v14 = vpop.trf.xlu0  ;;  %v3401_v15 = vpop.trf.xlu1 }
  0xf1   : > { %2518 = vmatmul.mubr.msk.f32.gmra.mxu0 %vm531_vm1, %v420_v14 }
  0xf2   : > { %817 = vmatprep.mubr.f32.mxu0 %v3181_v0 }
  0xf4   : > { %v421_v16 = vpop.trf.xlu0  ;;  %v3405_v17 = vpop.trf.xlu1 }
  0xf5   : > { %2519 = vmatmul.mubr.msk.f32.gmra.mxu0 %vm531_vm1, %v421_v16 }
  0xf6   : > { %823 = vmatprep.mubr.f32.mxu0 %v3181_v0 }
  0xf8   : > { %v422_v18 = vpop.trf.xlu0  ;;  %v3409_v19 = vpop.trf.xlu1 }
  0xf9   : > { %2520 = vmatmul.mubr.msk.f32.gmra.mxu0 %vm531_vm1, %v422_v18 }
  0xfa   : > { %829 = vmatprep.mubr.f32.mxu0 %v3181_v0 }
  0xfc   : > { %v423_v20 = vpop.trf.xlu0  ;;  %v3413_v21 = vpop.trf.xlu1 }
  0xfd   : > { %2521 = vmatmul.mubr.msk.f32.gmra.mxu0 %vm531_vm1, %v423_v20 }
  0xfe   : > { %835 = vmatprep.mubr.f32.mxu0 %v3181_v0 }
 0x100   : > { %v424_v22 = vpop.trf.xlu0  ;;  %v3417_v23 = vpop.trf.xlu1 }
 0x101   : > { %2522 = vmatmul.mubr.msk.f32.gmra.mxu0 %vm531_vm1, %v424_v22 }
 0x102   : > { %841 = vmatprep.mubr.f32.mxu0 %v3181_v0 }
 0x104   : > { %v425_v24 = vpop.trf.xlu0  ;;  %v3421_v25 = vpop.trf.xlu1 }
 0x105   : > { %2523 = vmatmul.mubr.msk.f32.gmra.mxu0 %vm531_vm1, %v425_v24 }
 0x106   : > { %847 = vmatprep.mubr.f32.mxu0 %v3181_v0 }
 0x108   : > { %v426_v26 = vpop.trf.xlu0  ;;  %v490_v27 = vpop.trf.xlu1 }
 0x109   : > { %2524 = vmatmul.mubr.msk.f32.gmra.mxu0 %vm531_vm1, %v426_v26  ;;  %2556 = vmatmul.mubr.msk.f32.vlgmr.msra.gmra.mxu1 %vm531_vm1, %v490_v27 }
 0x10a   : > { %853 = vmatprep.mubr.f32.mxu0 %v3181_v0  ;;  %1045 = vmatprep.mubr.f32.mxu1 %v3181_v0 }
 0x10c   : > { %v427_v28 = vpop.trf.xlu0  ;;  %v491_v29 = vpop.trf.xlu1 }
 0x10d   : > { %2525 = vmatmul.mubr.msk.f32.gmra.mxu0 %vm531_vm1, %v427_v28  ;;  %2557 = vmatmul.mubr.msk.f32.gmra.mxu1 %vm531_vm1, %v491_v29 }
 0x10e   : > { %859 = vmatprep.mubr.f32.mxu0 %v3181_v0  ;;  %1051 = vmatprep.mubr.f32.mxu1 %v3181_v0 }
 0x110   : > { %v428_v30 = vpop.trf.xlu0  ;;  %v492_v31 = vpop.trf.xlu1 }
 0x111   : > { %2526 = vmatmul.mubr.msk.f32.gmra.mxu0 %vm531_vm1, %v428_v30  ;;  %2558 = vmatmul.mubr.msk.f32.gmra.mxu1 %vm531_vm1, %v492_v31 }
 0x112   : > { %865 = vmatprep.mubr.f32.mxu0 %v3181_v0  ;;  %1057 = vmatprep.mubr.f32.mxu1 %v3181_v0 }
 0x114   : > { %v429_v32 = vpop.trf.xlu0  ;;  %v493_v33 = vpop.trf.xlu1 }
 0x115   : > { %2527 = vmatmul.mubr.msk.f32.gmra.mxu0 %vm531_vm1, %v429_v32  ;;  %2559 = vmatmul.mubr.msk.f32.gmra.mxu1 %vm531_vm1, %v493_v33 }
 0x116   : > { %871 = vmatprep.mubr.f32.mxu0 %v3181_v0  ;;  %1063 = vmatprep.mubr.f32.mxu1 %v3181_v0 }
 0x118   : > { %v430_v34 = vpop.trf.xlu0  ;;  %v494_v35 = vpop.trf.xlu1 }
 0x119   : > { %2528 = vmatmul.mubr.msk.f32.gmra.mxu0 %vm531_vm1, %v430_v34  ;;  %2560 = vmatmul.mubr.msk.f32.gmra.mxu1 %vm531_vm1, %v494_v35 }
 0x11a   : > { %877 = vmatprep.mubr.f32.mxu0 %v3181_v0  ;;  %1069 = vmatprep.mubr.f32.mxu1 %v3181_v0 }
 0x11c   : > { %v431_v36 = vpop.trf.xlu0  ;;  %v495_v37 = vpop.trf.xlu1 }
 0x11d   : > { %2529 = vmatmul.mubr.msk.f32.gmra.mxu0 %vm531_vm1, %v431_v36  ;;  %2561 = vmatmul.mubr.msk.f32.gmra.mxu1 %vm531_vm1, %v495_v37 }
 0x11e   : > { %883 = vmatprep.mubr.f32.mxu0 %v3181_v0  ;;  %1075 = vmatprep.mubr.f32.mxu1 %v3181_v0 }
 0x120   : > { %v432_v38 = vpop.trf.xlu0  ;;  %v496_v39 = vpop.trf.xlu1 }
 0x121   : > { %2530 = vmatmul.mubr.msk.f32.gmra.mxu0 %vm531_vm1, %v432_v38  ;;  %2562 = vmatmul.mubr.msk.f32.gmra.mxu1 %vm531_vm1, %v496_v39 }
 0x122   : > { %889 = vmatprep.mubr.f32.mxu0 %v3181_v0  ;;  %1081 = vmatprep.mubr.f32.mxu1 %v3181_v0 }
 0x124   : > { %v449_v40 = vpop.trf.xlu0  ;;  %v513_v41 = vpop.trf.xlu1 }
 0x125   : > { %2531 = vmatmul.mubr.msk.f32.gmra.mxu0 %vm531_vm1, %v449_v40  ;;  %2563 = vmatmul.mubr.msk.f32.gmra.mxu1 %vm531_vm1, %v513_v41 }
 0x126   : > { %895 = vmatprep.mubr.f32.mxu0 %v3181_v0  ;;  %1087 = vmatprep.mubr.f32.mxu1 %v3181_v0 }
 0x128   : > { %v450_v42 = vpop.trf.xlu0  ;;  %v514_v43 = vpop.trf.xlu1 }
 0x129   : > { %2532 = vmatmul.mubr.msk.f32.gmra.mxu0 %vm531_vm1, %v450_v42  ;;  %2564 = vmatmul.mubr.msk.f32.gmra.mxu1 %vm531_vm1, %v514_v43 }
 0x12a   : > { %901 = vmatprep.mubr.f32.mxu0 %v3181_v0  ;;  %1093 = vmatprep.mubr.f32.mxu1 %v3181_v0 }
 0x12c   : > { %v451_v44 = vpop.trf.xlu0  ;;  %v515_v45 = vpop.trf.xlu1 }
 0x12d   : > { %2533 = vmatmul.mubr.msk.f32.gmra.mxu0 %vm531_vm1, %v451_v44  ;;  %2565 = vmatmul.mubr.msk.f32.gmra.mxu1 %vm531_vm1, %v515_v45 }
 0x12e   : > { %907 = vmatprep.mubr.f32.mxu0 %v3181_v0  ;;  %1099 = vmatprep.mubr.f32.mxu1 %v3181_v0 }
 0x130   : > { %v452_v46 = vpop.trf.xlu0  ;;  %v516_v47 = vpop.trf.xlu1 }
 0x131   : > { %2534 = vmatmul.mubr.msk.f32.gmra.mxu0 %vm531_vm1, %v452_v46  ;;  %2566 = vmatmul.mubr.msk.f32.gmra.mxu1 %vm531_vm1, %v516_v47 }
 0x132   : > { %913 = vmatprep.mubr.f32.mxu0 %v3181_v0  ;;  %1105 = vmatprep.mubr.f32.mxu1 %v3181_v0 }
 0x134   : > { %v453_v48 = vpop.trf.xlu0  ;;  %v517_v49 = vpop.trf.xlu1 }
 0x135   : > { %2535 = vmatmul.mubr.msk.f32.gmra.mxu0 %vm531_vm1, %v453_v48  ;;  %2567 = vmatmul.mubr.msk.f32.gmra.mxu1 %vm531_vm1, %v517_v49 }
 0x136   : > { %919 = vmatprep.mubr.f32.mxu0 %v3181_v0  ;;  %1111 = vmatprep.mubr.f32.mxu1 %v3181_v0 }
 0x138   : > { %v454_v50 = vpop.trf.xlu0  ;;  %v518_v51 = vpop.trf.xlu1 }
 0x139   : > { %2536 = vmatmul.mubr.msk.f32.gmra.mxu0 %vm531_vm1, %v454_v50  ;;  %2568 = vmatmul.mubr.msk.f32.gmra.mxu1 %vm531_vm1, %v518_v51 }
 0x13a   : > { %925 = vmatprep.mubr.f32.mxu0 %v3181_v0  ;;  %1117 = vmatprep.mubr.f32.mxu1 %v3181_v0 }
 0x13c   : > { %v455_v52 = vpop.trf.xlu0  ;;  %v519_v53 = vpop.trf.xlu1 }
 0x13d   : > { %2537 = vmatmul.mubr.msk.f32.gmra.mxu0 %vm531_vm1, %v455_v52  ;;  %2569 = vmatmul.mubr.msk.f32.gmra.mxu1 %vm531_vm1, %v519_v53 }
 0x13e   : > { %931 = vmatprep.mubr.f32.mxu0 %v3181_v0  ;;  %1123 = vmatprep.mubr.f32.mxu1 %v3181_v0 }
 0x140   : > { %v456_v54 = vpop.trf.xlu0  ;;  %v520_v55 = vpop.trf.xlu1 }
 0x141   : > { %2538 = vmatmul.mubr.msk.f32.gmra.mxu0 %vm531_vm1, %v456_v54  ;;  %2570 = vmatmul.mubr.msk.f32.gmra.mxu1 %vm531_vm1, %v520_v55 }
 0x142   : > { %937 = vmatprep.mubr.f32.mxu0 %v3181_v0  ;;  %1129 = vmatprep.mubr.f32.mxu1 %v3181_v0 }
 0x144   : > { %v457_v56 = vpop.trf.xlu0  ;;  %v521_v57 = vpop.trf.xlu1 }
 0x145   : > { %2539 = vmatmul.mubr.msk.f32.gmra.mxu0 %vm531_vm1, %v457_v56  ;;  %2571 = vmatmul.mubr.msk.f32.gmra.mxu1 %vm531_vm1, %v521_v57 }
 0x146   : > { %943 = vmatprep.mubr.f32.mxu0 %v3181_v0  ;;  %1135 = vmatprep.mubr.f32.mxu1 %v3181_v0 }
 0x148   : > { %v458_v58 = vpop.trf.xlu0  ;;  %v522_v59 = vpop.trf.xlu1 }
 0x149   : > { %2540 = vmatmul.mubr.msk.f32.gmra.mxu0 %vm531_vm1, %v458_v58  ;;  %2572 = vmatmul.mubr.msk.f32.gmra.mxu1 %vm531_vm1, %v522_v59 }
 0x14a   : > { %949 = vmatprep.mubr.f32.mxu0 %v3181_v0  ;;  %1141 = vmatprep.mubr.f32.mxu1 %v3181_v0 }
 0x14c   : > { %v459_v60 = vpop.trf.xlu0  ;;  %v523_v61 = vpop.trf.xlu1 }
 0x14d   : > { %2541 = vmatmul.mubr.msk.f32.gmra.mxu0 %vm531_vm1, %v459_v60  ;;  %2573 = vmatmul.mubr.msk.f32.gmra.mxu1 %vm531_vm1, %v523_v61 }
 0x14e   : > { %955 = vmatprep.mubr.f32.mxu0 %v3181_v0  ;;  %1147 = vmatprep.mubr.f32.mxu1 %v3181_v0 }
 0x150   : > { %v460_v62 = vpop.trf.xlu0  ;;  %v524_v63 = vpop.trf.xlu1 }
 0x151   : > { %2542 = vmatmul.mubr.msk.f32.gmra.mxu0 %vm531_vm1, %v460_v62  ;;  %2574 = vmatmul.mubr.msk.f32.gmra.mxu1 %vm531_vm1, %v524_v63 }
 0x152   : > { %961 = vmatprep.mubr.f32.mxu0 %v3181_v0  ;;  %1153 = vmatprep.mubr.f32.mxu1 %v3181_v0 }
 0x154   : > { %v461_v1 = vpop.trf.xlu0  ;;  %v525_v2 = vpop.trf.xlu1 }
 0x155   : > { %2543 = vmatmul.mubr.msk.f32.gmra.mxu0 %vm531_vm1, %v461_v1  ;;  %2575 = vmatmul.mubr.msk.f32.gmra.mxu1 %vm531_vm1, %v525_v2 }
 0x156   : > { %967 = vmatprep.mubr.f32.mxu0 %v3181_v0  ;;  %1159 = vmatprep.mubr.f32.mxu1 %v3181_v0 }
 0x158   : > { %v462_v3 = vpop.trf.xlu0  ;;  %v526_v4 = vpop.trf.xlu1 }
 0x159   : > { %2544 = vmatmul.mubr.msk.f32.gmra.mxu0 %vm531_vm1, %v462_v3  ;;  %2576 = vmatmul.mubr.msk.f32.gmra.mxu1 %vm531_vm1, %v526_v4 }
 0x15a   : > { %973 = vmatprep.mubr.f32.mxu0 %v3181_v0  ;;  %1165 = vmatprep.mubr.f32.mxu1 %v3181_v0 }
 0x15c   : > { %v463_v5 = vpop.trf.xlu0  ;;  %v527_v6 = vpop.trf.xlu1 }
 0x15d   : > { %2545 = vmatmul.mubr.msk.f32.gmra.mxu0 %vm531_vm1, %v463_v5  ;;  %2577 = vmatmul.mubr.msk.f32.gmra.mxu1 %vm531_vm1, %v527_v6 }
 0x15e   : > { %979 = vmatprep.mubr.f32.mxu0 %v3181_v0  ;;  %1171 = vmatprep.mubr.f32.mxu1 %v3181_v0 }
 0x160   : > { %v464_v7 = vpop.trf.xlu0  ;;  %v528_v8 = vpop.trf.xlu1 }
 0x161   : > { %2546 = vmatmul.mubr.msk.f32.gmra.mxu0 %vm531_vm1, %v464_v7  ;;  %2578 = vmatmul.mubr.msk.f32.gmra.mxu1 %vm531_vm1, %v528_v8 }
 0x162   : > { %985 = vmatprep.mubr.f32.mxu0 %v3181_v0 }
 0x165   : > { %2547 = vmatmul.mubr.msk.f32.gmra.mxu0 %vm531_vm1, %v3389_v9 }
 0x166   : > { %991 = vmatprep.mubr.f32.mxu0 %v3181_v0 }
 0x169   : > { %2548 = vmatmul.mubr.msk.f32.gmra.mxu0 %vm531_vm1, %v3393_v11 }
 0x16a   : > { %997 = vmatprep.mubr.f32.mxu0 %v3181_v0 }
 0x16d   : > { %2549 = vmatmul.mubr.msk.f32.gmra.mxu0 %vm531_vm1, %v3397_v13 }
 0x16e   : > { %1003 = vmatprep.mubr.f32.mxu0 %v3181_v0 }
 0x171   : > { %2550 = vmatmul.mubr.msk.f32.gmra.mxu0 %vm531_vm1, %v3401_v15 }
 0x172   : > { %1009 = vmatprep.mubr.f32.mxu0 %v3181_v0 }
 0x175   : > { %2551 = vmatmul.mubr.msk.f32.gmra.mxu0 %vm531_vm1, %v3405_v17 }
 0x176   : > { %1015 = vmatprep.mubr.f32.mxu0 %v3181_v0 }
 0x179   : > { %2552 = vmatmul.mubr.msk.f32.gmra.mxu0 %vm531_vm1, %v3409_v19 }
 0x17a   : > { %1021 = vmatprep.mubr.f32.mxu0 %v3181_v0 }
 0x17d   : > { %2553 = vmatmul.mubr.msk.f32.gmra.mxu0 %vm531_vm1, %v3413_v21 }
 0x17e   : > { %1027 = vmatprep.mubr.f32.mxu0 %v3181_v0 }
 0x181   : > { %2554 = vmatmul.mubr.msk.f32.gmra.mxu0 %vm531_vm1, %v3417_v23 }
 0x182   : > { %1033 = vmatprep.mubr.f32.mxu0 %v3181_v0 }
 0x185   : > { %2555 = vmatmul.mubr.msk.f32.gmra.mxu0 %vm531_vm1, %v3421_v25 }
 0x1a5   : > { %v3542_v9 = vpop.f32.mrf.mxu0 }
 0x1a7   : > { %v3544_v10 = vpop.f32.mrf.mxu0 }
 0x1a8   : > { %5956 = vst [vmem:[#allocation22_spill] sm:$0xff] %v3544_v10 }
 0x1a9   : > { %v3546_v11 = vpop.f32.mrf.mxu0 }
 0x1aa   : > { %5957 = vst [vmem:[#allocation23_spill] sm:$0xff] %v3546_v11 }
 0x1ab   : > { %v3548_v12 = vpop.f32.mrf.mxu0 }
 0x1ac   : > { %5958 = vst [vmem:[#allocation24_spill] sm:$0xff] %v3548_v12 }
 0x1ad   : > { %v3550_v13 = vpop.f32.mrf.mxu0 }
 0x1ae   : > { %5959 = vst [vmem:[#allocation25_spill] sm:$0xff] %v3550_v13 }
 0x1af   : > { %v3552_v14 = vpop.f32.mrf.mxu0 }
 0x1b0   : > { %5960 = vst [vmem:[#allocation26_spill] sm:$0xff] %v3552_v14 }
 0x1b1   : > { %v3554_v15 = vpop.f32.mrf.mxu0 }
 0x1b2   : > { %5961 = vst [vmem:[#allocation27_spill] sm:$0xff] %v3554_v15 }
 0x1b3   : > { %v3556_v16 = vpop.f32.mrf.mxu0 }
 0x1b4   : > { %5962 = vst [vmem:[#allocation28_spill] sm:$0xff] %v3556_v16 }
 0x1b5   : > { %v3558_v0 = vpop.f32.mrf.mxu0 }
 0x1b6   : > { %5963 = vst [vmem:[#allocation29_spill] sm:$0xff] %v3558_v0 }
 0x1b7   : > { %v3560_v17 = vpop.f32.mrf.mxu0 }
 0x1b8   : > { %5964 = vst [vmem:[#allocation30_spill] sm:$0xff] %v3560_v17 }
 0x1b9   : > { %v3562_v18 = vpop.f32.mrf.mxu0 }
 0x1ba   : > { %5965 = vst [vmem:[#allocation31_spill] sm:$0xff] %v3562_v18 }
 0x1bb   : > { %v3564_v19 = vpop.f32.mrf.mxu0 }
 0x1bc   : > { %5966 = vst [vmem:[#allocation32_spill] sm:$0xff] %v3564_v19 }
 0x1bd   : > { %v3566_v20 = vpop.f32.mrf.mxu0 }
 0x1bf   : > { %v3568_v21 = vpop.f32.mrf.mxu0 }
 0x1c0   : > { %5967 = vst [vmem:[#allocation33_spill] sm:$0xff] %v3568_v21 }
 0x1c1   : > { %v3570_v22 = vpop.f32.mrf.mxu0 }
 0x1c2   : > { %5968 = vst [vmem:[#allocation34_spill] sm:$0xff] %v3570_v22 }
 0x1c3   : > { %v3572_v23 = vpop.f32.mrf.mxu0 }
 0x1c4   : > { %5969 = vst [vmem:[#allocation35_spill] sm:$0xff] %v3572_v23 }
 0x1c5   : > { %v3574_v24 = vpop.f32.mrf.mxu0 }
 0x1c7   : > { %v3576_v25 = vpop.f32.mrf.mxu0 }
 0x1c8   : > { %5970 = vst [vmem:[#allocation36_spill] sm:$0xff] %v3576_v25 }
 0x1c9   : > { %v3578_v26 = vpop.f32.mrf.mxu0  ;;  %v3580_v27 = vpop.f32.mrf.mxu1 }
 0x1ca   : > { %5971 = vst [vmem:[#allocation37_spill] sm:$0xff] %v3578_v26  ;;  %5972 = vst [vmem:[#allocation38_spill] sm:$0xff] %v3580_v27 }
 0x1cb   : > { %v3582_v28 = vpop.f32.mrf.mxu0  ;;  %v3584_v29 = vpop.f32.mrf.mxu1 }
 0x1cc   : > { %5973 = vst [vmem:[#allocation39_spill] sm:$0xff] %v3582_v28  ;;  %5974 = vst [vmem:[#allocation40_spill] sm:$0xff] %v3584_v29 }
 0x1cd   : > { %v3586_v30 = vpop.f32.mrf.mxu0  ;;  %v3588_v31 = vpop.f32.mrf.mxu1 }
 0x1ce   : > { %5975 = vst [vmem:[#allocation41_spill] sm:$0xff] %v3588_v31 }
 0x1cf   : > { %v3590_v32 = vpop.f32.mrf.mxu0  ;;  %v3592_v33 = vpop.f32.mrf.mxu1 }
 0x1d0   : > { %5976 = vst [vmem:[#allocation42_spill] sm:$0xff] %v3590_v32  ;;  %5977 = vst [vmem:[#allocation43_spill] sm:$0xff] %v3592_v33 }
 0x1d1   : > { %v3594_v34 = vpop.f32.mrf.mxu0  ;;  %v3596_v35 = vpop.f32.mrf.mxu1 }
 0x1d2   : > { %5978 = vst [vmem:[#allocation44_spill] sm:$0xff] %v3594_v34  ;;  %5979 = vst [vmem:[#allocation45_spill] sm:$0xff] %v3596_v35 }
 0x1d3   : > { %v3598_v36 = vpop.f32.mrf.mxu0  ;;  %v3600_v37 = vpop.f32.mrf.mxu1 }
 0x1d4   : > { %5980 = vst [vmem:[#allocation46_spill] sm:$0xff] %v3598_v36  ;;  %5981 = vst [vmem:[#allocation47_spill] sm:$0xff] %v3600_v37 }
 0x1d5   : > { %v3602_v38 = vpop.f32.mrf.mxu0  ;;  %v3604_v39 = vpop.f32.mrf.mxu1 }
 0x1d6   : > { %5982 = vst [vmem:[#allocation48_spill] sm:$0xff] %v3604_v39 }
 0x1d7   : > { %v3606_v40 = vpop.f32.mrf.mxu0  ;;  %v3608_v41 = vpop.f32.mrf.mxu1 }
 0x1d8   : > { %5983 = vst [vmem:[#allocation49_spill] sm:$0xff] %v3606_v40  ;;  %5984 = vst [vmem:[#allocation50_spill] sm:$0xff] %v3608_v41 }
 0x1d9   : > { %v3610_v42 = vpop.f32.mrf.mxu0  ;;  %v3612_v43 = vpop.f32.mrf.mxu1 }
 0x1da   : > { %5985 = vst [vmem:[#allocation51_spill] sm:$0xff] %v3610_v42  ;;  %5986 = vst [vmem:[#allocation52_spill] sm:$0xff] %v3612_v43 }
 0x1db   : > { %v3614_v44 = vpop.f32.mrf.mxu0  ;;  %v3616_v45 = vpop.f32.mrf.mxu1 }
 0x1dc   : > { %5987 = vst [vmem:[#allocation53_spill] sm:$0xff] %v3614_v44  ;;  %5988 = vst [vmem:[#allocation54_spill] sm:$0xff] %v3616_v45  ;;  %v1217_v44 = vmax.f32 %v3588_v31, %v3580_v27 }
 0x1dd   : > { %v3618_v46 = vpop.f32.mrf.mxu0  ;;  %v3620_v47 = vpop.f32.mrf.mxu1 }
 0x1de   : > { %5989 = vst [vmem:[#allocation55_spill] sm:$0xff] %v3620_v47 }
 0x1df   : > { %v3622_v48 = vpop.f32.mrf.mxu0  ;;  %v3624_v49 = vpop.f32.mrf.mxu1 }
 0x1e0   : > { %5990 = vst [vmem:[#allocation56_spill] sm:$0xff] %v3622_v48  ;;  %5991 = vst [vmem:[#allocation57_spill] sm:$0xff] %v3624_v49 }
 0x1e1   : > { %v3626_v50 = vpop.f32.mrf.mxu0  ;;  %v3628_v51 = vpop.f32.mrf.mxu1 }
 0x1e2   : > { %5992 = vst [vmem:[#allocation58_spill] sm:$0xff] %v3626_v50  ;;  %5993 = vst [vmem:[#allocation59_spill] sm:$0xff] %v3628_v51 }
 0x1e3   : > { %v3630_v52 = vpop.f32.mrf.mxu0  ;;  %v3632_v53 = vpop.f32.mrf.mxu1 }
 0x1e4   : > { %5994 = vst [vmem:[#allocation60_spill] sm:$0xff] %v3630_v52  ;;  %5995 = vst [vmem:[#allocation61_spill] sm:$0xff] %v3632_v53 }
 0x1e5   : > { %v3634_v54 = vpop.f32.mrf.mxu0  ;;  %v3636_v55 = vpop.f32.mrf.mxu1 }
 0x1e6   : > { %5996 = vst [vmem:[#allocation62_spill] sm:$0xff] %v3636_v55 }
 0x1e7   : > { %v3638_v56 = vpop.f32.mrf.mxu0  ;;  %v3640_v57 = vpop.f32.mrf.mxu1 }
 0x1e8   : > { %5997 = vst [vmem:[#allocation63_spill] sm:$0xff] %v3638_v56  ;;  %5998 = vst [vmem:[#allocation64_spill] sm:$0xff] %v3640_v57 }
 0x1e9   : > { %v3642_v58 = vpop.f32.mrf.mxu0  ;;  %v3644_v59 = vpop.f32.mrf.mxu1 }
 0x1ea   : > { %5999 = vst [vmem:[#allocation65_spill] sm:$0xff] %v3642_v58  ;;  %6000 = vst [vmem:[#allocation66_spill] sm:$0xff] %v3644_v59 }
 0x1eb   : > { %v3646_v60 = vpop.f32.mrf.mxu0  ;;  %v3648_v61 = vpop.f32.mrf.mxu1 }
 0x1ec   : > { %6001 = vst [vmem:[#allocation67_spill] sm:$0xff] %v3646_v60  ;;  %6002 = vst [vmem:[#allocation68_spill] sm:$0xff] %v3648_v61 }
 0x1ed   : > { %v3650_v62 = vpop.f32.mrf.mxu0  ;;  %v3652_v63 = vpop.f32.mrf.mxu1 }
 0x1ee   : > { %6003 = vst [vmem:[#allocation69_spill] sm:$0xff] %v3652_v63 }
 0x1ef   : > { %v3654_v1 = vpop.f32.mrf.mxu0  ;;  %v3658_v3 = vpop.f32.mrf.mxu1 }
 0x1f0   : > { %6004 = vst [vmem:[#allocation70_spill] sm:$0xff] %v3654_v1  ;;  %6005 = vst [vmem:[#allocation71_spill] sm:$0xff] %v3658_v3 }
 0x1f1   : > { %v3656_v2 = vpop.f32.mrf.mxu0  ;;  %v3664_v6 = vpop.f32.mrf.mxu1 }
 0x1f2   : > { %6007 = vst [vmem:[#allocation73_spill] sm:$0xff] %v3664_v6 }
 0x1f3   : > { %v3660_v4 = vpop.f32.mrf.mxu0  ;;  %v3670_v56 = vpop.f32.mrf.mxu1 }
 0x1f4   : > { %6006 = vst [vmem:[#allocation72_spill] sm:$0xff] %v3660_v4  ;;  %6010 = vst [vmem:[#allocation76_spill] sm:$0xff] %v3670_v56 }
 0x1f5   : > { %v3662_v5 = vpop.f32.mrf.mxu0  ;;  %v3676_v1 = vpop.f32.mrf.mxu1 }
 0x1f6   : > { %6012 = vst [vmem:[#allocation78_spill] sm:$0xff] %v3676_v1 }
 0x1f7   : > { %v3666_v7 = vpop.f32.mrf.mxu0  ;;  %v3682_v4 = vpop.f32.mrf.mxu1 }
 0x1f8   : > { %6008 = vst [vmem:[#allocation74_spill] sm:$0xff] %v3666_v7  ;;  %6015 = vst [vmem:[#allocation81_spill] sm:$0xff] %v3682_v4 }
 0x1f9   : > { %v3668_v8 = vpop.f32.mrf.mxu0  ;;  %v3688_v7 = vpop.f32.mrf.mxu1 }
 0x1fa   : > { %6009 = vst [vmem:[#allocation75_spill] sm:$0xff] %v3668_v8  ;;  %6017 = vst [vmem:[#allocation83_spill] sm:$0xff] %v3688_v7 }
 0x1fb   : > { %v3672_v48 = vpop.f32.mrf.mxu0 }
 0x1fc   : > { %6011 = vst [vmem:[#allocation77_spill] sm:$0xff] %v3672_v48  ;;  %v3694_v48 = vpop.f32.mrf.mxu1 }
 0x1fd   : > { %v3674_v40 = vpop.f32.mrf.mxu0  ;;  %6020 = vst [vmem:[#allocation86_spill] sm:$0xff] %v3694_v48 }
 0x1fe   : > { %v3702_v4 = vpop.f32.mrf.mxu1 }
 0x1ff   : > { %v3678_v60 = vpop.f32.mrf.mxu0  ;;  %6022 = vst [vmem:[#allocation88_spill] sm:$0xff] %v3702_v4 }
 0x200   : > { %6013 = vst [vmem:[#allocation79_spill] sm:$0xff] %v3678_v60 }
 0x201   : > { %v3680_v3 = vpop.f32.mrf.mxu0 }
 0x202   : > { %6014 = vst [vmem:[#allocation80_spill] sm:$0xff] %v3680_v3 }
 0x203   : > { %v3684_v32 = vpop.f32.mrf.mxu0 }
 0x204   : > { %6016 = vst [vmem:[#allocation82_spill] sm:$0xff] %v3684_v32  ;;  %v1219_v32 = vmax.f32 %v1217_v44, %v3596_v35 }
 0x205   : > { %v3686_v52 = vpop.f32.mrf.mxu0 }
 0x206   : > { %v1221_v17 = vmax.f32 %v1219_v32, %v3604_v39  ;;  %v1179_v39 = vmax.f32 %v3546_v11, %v3554_v15 }
 0x207   : > { %v3690_v25 = vpop.f32.mrf.mxu0 }
 0x208   : > { %6018 = vst [vmem:[#allocation84_spill] sm:$0xff] %v3690_v25  ;;  %v3709_v25 = vpop.f32.mrf.mxu1  ;;  %v1223_v27 = vmax.f32 %v1221_v17, %v3612_v43  ;;  %v1178_v43 = vmax.f32 %v3542_v9, %v3550_v13 }
 0x209   : > { %v3692_v56 = vpop.f32.mrf.mxu0  ;;  %6025 = vst [vmem:[#allocation91_spill] sm:$0xff] %v3709_v25 }
 0x20a   : > { %6019 = vst [vmem:[#allocation85_spill] sm:$0xff] %v3692_v56  ;;  %v3716_v31 = vpop.f32.mrf.mxu1  ;;  %v1225_v35 = vmax.f32 %v1223_v27, %v3620_v47  ;;  %v1180_v47 = vmax.f32 %v1178_v43, %v3558_v0 }
 0x20b   : > { %v3698_v60 = vpop.f32.mrf.mxu0  ;;  %6028 = vst [vmem:[#allocation94_spill] sm:$0xff] %v3716_v31 }
 0x20c   : > { %6021 = vst [vmem:[#allocation87_spill] sm:$0xff] %v3698_v60  ;;  %v3723_v44 = vpop.f32.mrf.mxu1 }
 0x20d   : > { %v3700_v61 = vpop.f32.mrf.mxu0  ;;  %6031 = vst [vmem:[#allocation97_spill] sm:$0xff] %v3723_v44  ;;  %v1181_v44 = vmax.f32 %v1179_v39, %v3562_v18 }
 0x20e   : > { %v3730_v32 = vpop.f32.mrf.mxu1 }
 0x20f   : > { %v3705_v21 = vpop.f32.mrf.mxu0  ;;  %6034 = vst [vmem:[#allocation100_spill] sm:$0xff] %v3730_v32 }
 0x210   : > { %6023 = vst [vmem:[#allocation89_spill] sm:$0xff] %v3705_v21  ;;  %v3742_v27 = vpop.f32.mrf.mxu1 }
 0x211   : > { %v3707_v36 = vpop.f32.mrf.mxu0  ;;  %6036 = vst [vmem:[#allocation102_spill] sm:$0xff] %v3742_v27 }
 0x212   : > { %6024 = vst [vmem:[#allocation90_spill] sm:$0xff] %v3707_v36 }
 0x213   : > { %v3712_v48 = vpop.f32.mrf.mxu0 }
 0x214   : > { %6026 = vst [vmem:[#allocation92_spill] sm:$0xff] %v3712_v48  ;;  %v1227_v48 = vmax.f32 %v1225_v35, %v3628_v51  ;;  %v3749_v35 = vpop.f32.mrf.mxu1  ;;  %v1182_v51 = vmax.f32 %v1180_v47, %v3566_v20 }
 0x215   : > { %v3714_v28 = vpop.f32.mrf.mxu0  ;;  %6037 = vst [vmem:[#allocation103_spill] sm:$0xff] %v3749_v35 }
 0x216   : > { %6027 = vst [vmem:[#allocation93_spill] sm:$0xff] %v3714_v28  ;;  %v1229_v10 = vmax.f32 %v1227_v48, %v3636_v55  ;;  %v1184_v39 = vmax.f32 %v1182_v51, %v3574_v24 }
 0x217   : > { %v3719_v60 = vpop.f32.mrf.mxu0 }
 0x218   : > { %6029 = vst [vmem:[#allocation95_spill] sm:$0xff] %v3719_v60  ;;  %v1231_v43 = vmax.f32 %v1229_v10, %v3644_v59  ;;  %v1186_v48 = vmax.f32 %v1184_v39, %v3586_v30 }
 0x219   : > { %v3721_v57 = vpop.f32.mrf.mxu0 }
 0x21a   : > { %6030 = vst [vmem:[#allocation96_spill] sm:$0xff] %v3721_v57  ;;  %v1233_v51 = vmax.f32 %v1231_v43, %v3652_v63 }
 0x21b   : > { %v3726_v21 = vpop.f32.mrf.mxu0 }
 0x21c   : > { %6032 = vst [vmem:[#allocation98_spill] sm:$0xff] %v3726_v21  ;;  %v1183_v21 = vmax.f32 %v1181_v44, %v3570_v22  ;;  %v3760_v44 = vpop.f32.mrf.mxu1 }
 0x21d   : > { %v3728_v25 = vpop.f32.mrf.mxu0 }
 0x21e   : > { %6033 = vst [vmem:[#allocation99_spill] sm:$0xff] %v3728_v25  ;;  %v1185_v13 = vmax.f32 %v1183_v21, %v3578_v26  ;;  %v1188_v21 = vmax.f32 %v1186_v48, %v3602_v38  ;;  %v1218_v48 = vmax.f32 %v3664_v6, %v1233_v51 }
 0x21f   : > { %v3735_v17 = vpop.f32.mrf.mxu0 }
 0x220   : > { %v1187_v18 = vmax.f32 %v1185_v13, %v3594_v34  ;;  %v3771_v13 = vpop.f32.mrf.mxu1  ;;  %v1190_v10 = vmax.f32 %v1188_v21, %v3618_v46 }
 0x221   : > { %v3740_v60 = vpop.f32.mrf.mxu0  ;;  %6039 = vst [vmem:[#allocation105_spill] sm:$0xff] %v3771_v13 }
 0x222   : > { %6035 = vst [vmem:[#allocation101_spill] sm:$0xff] %v3740_v60  ;;  %v1189_v55 = vmax.f32 %v1187_v18, %v3610_v42  ;;  %v1192_v18 = vmax.f32 %v1190_v10, %v3634_v54  ;;  %v1220_v10 = vmax.f32 %v1218_v48, %v3676_v1 }
 0x223   : > { %v3747_v15 = vpop.f32.mrf.mxu0 }
 0x224   : > { %v1191_v47 = vmax.f32 %v1189_v55, %v3626_v50  ;;  %v3782_v55 = vpop.f32.mrf.mxu1  ;;  %v1194_v43 = vmax.f32 %v1192_v18, %v3650_v62  ;;  %v1286_v18 = vmax.f32 %v3592_v33, %v3584_v29 }
 0x225   : > { %v3753_v11 = vpop.f32.mrf.mxu0 }
 0x226   : > { %6038 = vst [vmem:[#allocation104_spill] sm:$0xff] %v3753_v11  ;;  %v1193_v59 = vmax.f32 %v1191_v47, %v3642_v58  ;;  %v1196_v21 = vmax.f32 %v1194_v43, %v3662_v5 }
 0x227   : > { %v3758_v0 = vpop.f32.mrf.mxu0 }
 0x228   : > { %v1195_v39 = vmax.f32 %v1193_v59, %v3656_v2  ;;  %v3793_v59 = vpop.f32.mrf.mxu1  ;;  %v1198_v51 = vmax.f32 %v1196_v21, %v3674_v40 }
 0x229   : > { %v3764_v22 = vpop.f32.mrf.mxu0  ;;  %6040 = vst [vmem:[#allocation106_spill] sm:$0xff] %v3793_v59 }
 0x22a   : > { %v1197_v63 = vmax.f32 %v1195_v39, %v3668_v8  ;;  %v1200_v8 = vmax.f32 %v1198_v51, %v3686_v52  ;;  %v3806_v1 = vpop.f32.mrf.mxu1 }
 0x22b   : > { %v3769_v26 = vpop.f32.mrf.mxu0 }
 0x22c   : > { %v1199_v47 = vmax.f32 %v1197_v63, %v3680_v3  ;;  %v1222_v63 = vmax.f32 %v1220_v10, %v3688_v7  ;;  %v1202_v3 = vmax.f32 %v1200_v8, %v3700_v61  ;;  %v3818_v10 = vpop.f32.mrf.mxu1 }
 0x22d   : > { %v3775_v34 = vpop.f32.mrf.mxu0  ;;  %6041 = vst [vmem:[#allocation107_spill] sm:$0xff] %v3818_v10 }
 0x22e   : > { %v1201_v6 = vmax.f32 %v1199_v47, %v3692_v56  ;;  %v1288_v47 = vmax.f32 %v1286_v18, %v3600_v37  ;;  %v1204_v33 = vmax.f32 %v1202_v3, %v3714_v28  ;;  %v6047_v28 = vld [vmem:[#allocation39_spill] sm:$0xff] }
 0x22f   : > { %v3780_v42 = vpop.f32.mrf.mxu0 }
 0x230   : > { %v1203_v43 = vmax.f32 %v1201_v6, %v3707_v36  ;;  %v1224_v6 = vmax.f32 %v1222_v63, %v3702_v4  ;;  %v1206_v7 = vmax.f32 %v1204_v33, %v3728_v25  ;;  %v3830_v63 = vpop.f32.mrf.mxu1  ;;  %v6068_v36 = vld [vmem:[#allocation87_spill] sm:$0xff] }
 0x231   : > { %v3786_v50 = vpop.f32.mrf.mxu0 }
 0x232   : > { %v1205_v21 = vmax.f32 %v1203_v43, %v3721_v57  ;;  %v1290_v43 = vmax.f32 %v1288_v47, %v3608_v41  ;;  %v1208_v18 = vmax.f32 %v1206_v7, %v3753_v11 }
 0x233   : > { %v3791_v58 = vpop.f32.mrf.mxu0 }
 0x234   : > { %v1207_v51 = vmax.f32 %v1205_v21, %v3740_v60  ;;  %v1226_v21 = vmax.f32 %v1224_v6, %v3716_v31  ;;  %v1210_v4 = vmax.f32 %v1208_v18, %v3775_v34  ;;  %v3842_v6 = vpop.f32.mrf.mxu1 }
 0x235   : > { %v3799_v39 = vpop.f32.mrf.mxu0  ;;  %6043 = vst [vmem:[#allocation109_spill] sm:$0xff] %v3842_v6 }
 0x236   : > { %v1209_v8 = vmax.f32 %v1207_v51, %v3764_v22  ;;  %v1292_v51 = vmax.f32 %v1290_v43, %v3616_v45  ;;  %v1212_v47 = vmax.f32 %v1210_v4, %v3799_v39  ;;  %v1228_v7 = vmax.f32 %v1226_v21, %v3730_v32  ;;  %v3850_v4 = vpop.f32.mrf.mxu1 }
 0x237   : > { %v3804_v48 = vpop.f32.mrf.mxu0  ;;  %v1248_v21 = vmax.f32 %v3548_v12, %v3556_v16 }
 0x238   : > { %v1211_v3 = vmax.f32 %v1209_v8, %v3786_v50  ;;  %v1294_v18 = vmax.f32 %v1292_v51, %v3624_v49  ;;  %v6046_v49 = vld [vmem:[#allocation64_spill] sm:$0xff] }
 0x239   : > { %v3811_v56 = vpop.f32.mrf.mxu0  ;;  %v1250_v25 = vmax.f32 %v1248_v21, %v3564_v19  ;;  %v6052_v19 = vld [vmem:[#allocation53_spill] sm:$0xff] }
 0x23a   : > { %v1213_v33 = vmax.f32 %v1211_v3, %v3811_v56  ;;  %v1296_v32 = vmax.f32 %v1294_v18, %v3632_v53  ;;  %v6048_v18 = vld [vmem:[#allocation30_spill] sm:$0xff] }
 0x23b   : > { %v3816_v29 = vpop.f32.mrf.mxu0  ;;  %v1252_v51 = vmax.f32 %v1250_v25, %v3572_v23  ;;  %v6050_v25 = vld [vmem:[#allocation33_spill] sm:$0xff] }
 0x23d   : > { %v3823_v57 = vpop.f32.mrf.mxu0  ;;  %v1254_v16 = vmax.f32 %v1252_v51, %v6047_v28 }
 0x23e   : > { %v1214_v31 = vmax.f32 %v1212_v47, %v3823_v57 }
 0x23f   : > { %v3828_v37 = vpop.f32.mrf.mxu0 }
 0x241   : > { %v3835_v60 = vpop.f32.mrf.mxu0 }
 0x242   : > { %v1215_v8 = vmax.f32 %v1213_v33, %v3835_v60 }
 0x243   : > { %v3840_v41 = vpop.f32.mrf.mxu0 }
 0x244   : > { %6042 = vst [vmem:[#allocation108_spill] sm:$0xff] %v3840_v41  ;;  %v1230_v11 = vmax.f32 %v1228_v7, %v1215_v8  ;;  %v3857_v7 = vpop.f32.mrf.mxu1 }
 0x245   : > { %v3846_v3 = vpop.f32.mrf.mxu0  ;;  %6044 = vst [vmem:[#allocation110_spill] sm:$0xff] %v3857_v7 }
 0x246   : > { %v1232_v43 = vmax.f32 %v1230_v11, %v3749_v35  ;;  %v1216_v45 = vmax.f32 %v1214_v31, %v3846_v3  ;;  %v6045_v31 = vld [vmem:[#allocation22_spill] sm:$0xff]  ;;  %v1298_v35 = vmax.f32 %v1296_v32, %v6046_v49  ;;  %v3867_v21 = vpop.f32.mrf.mxu1  ;;  %v6053_v49 = vld [vmem:[#allocation36_spill] sm:$0xff] }
 0x247   : > { %v1247_v8 = vmax.f32 %v6045_v31, %v3552_v14  ;;  %v6063_v31 = vld [vmem:[#allocation77_spill] sm:$0xff] }
 0x248   : > { %v1234_v33 = vmax.f32 %v1232_v43, %v1216_v45  ;;  %v3876_v28 = vpop.f32.mrf.mxu1 }
 0x249   : > { %v1249_v43 = vmax.f32 %v1247_v8, %v6048_v18  ;;  %6054 = vst [vmem:[#allocation111_spill] sm:$0xff] %v3876_v28  ;;  %v6056_v18 = vld [vmem:[#allocation42_spill] sm:$0xff] }
 0x24a   : > { %v1235_v47 = vmax.f32 %v3771_v13, %v1234_v33  ;;  %v6049_v33 = vld [vmem:[#allocation46_spill] sm:$0xff] }
 0x24b   : > { %v1256_v53 = vmax.f32 %v1254_v16, %v6049_v33  ;;  %v1251_v23 = vmax.f32 %v1249_v43, %v6050_v25  ;;  %v6057_v33 = vld [vmem:[#allocation71_spill] sm:$0xff] }
 0x24c   : > { %v1236_v11 = vmax.f32 %v3793_v59, %v1235_v47  ;;  %v6051_v47 = vld [vmem:[#allocation68_spill] sm:$0xff] }
 0x24d   : > { %v1300_v59 = vmax.f32 %v1298_v35, %v6051_v47  ;;  %v1258_v14 = vmax.f32 %v1256_v53, %v6052_v19  ;;  %v1253_v51 = vmax.f32 %v1251_v23, %v6053_v49  ;;  %v6059_v35 = vld [vmem:[#allocation49_spill] sm:$0xff]  ;;  %v6060_v53 = vld [vmem:[#allocation72_spill] sm:$0xff] }
 0x24e   : > { %v1237_v45 = vmax.f32 %v3818_v10, %v1236_v11  ;;  %v6055_v11 = vld [vmem:[#allocation60_spill] sm:$0xff] }
 0x24f   : > { %v1260_v8 = vmax.f32 %v1258_v14, %v6055_v11  ;;  %v1255_v16 = vmax.f32 %v1253_v51, %v6056_v18  ;;  %v6062_v49 = vld [vmem:[#allocation76_spill] sm:$0xff]  ;;  %v6065_v51 = vld [vmem:[#allocation82_spill] sm:$0xff] }
 0x250   : > { %v1238_v13 = vmax.f32 %v3842_v6, %v1237_v45  ;;  %v1302_v45 = vmax.f32 %v1300_v59, %v6057_v33  ;;  %v6058_v6 = vld [vmem:[#allocation67_spill] sm:$0xff]  ;;  %v6066_v59 = vld [vmem:[#allocation70_spill] sm:$0xff] }
 0x251   : > { %v1262_v43 = vmax.f32 %v1260_v8, %v6058_v6  ;;  %v1257_v47 = vmax.f32 %v1255_v16, %v6059_v35  ;;  %v6067_v8 = vld [vmem:[#allocation81_spill] sm:$0xff] }
 0x252   : > { %v1239_v32 = vmax.f32 %v3857_v7, %v1238_v13  ;;  %v6061_v7 = vld [vmem:[#allocation56_spill] sm:$0xff]  ;;  %v1287_v12 = vmax.f32 %v6062_v49, %v1302_v45  ;;  %v6072_v49 = vld [vmem:[#allocation86_spill] sm:$0xff] }
 0x253   : > { %v1264_v19 = vmax.f32 %v1262_v43, %v6060_v53  ;;  %v1259_v23 = vmax.f32 %v1257_v47, %v6061_v7  ;;  %v6069_v43 = vld [vmem:[#allocation74_spill] sm:$0xff]  ;;  %v6071_v53 = vld [vmem:[#allocation79_spill] sm:$0xff] }
 0x254   : > { %v1240_v10 = vmax.f32 %v3876_v28, %v1239_v32  ;;  %v6064_v32 = vld [vmem:[#allocation63_spill] sm:$0xff]  ;;  %v1289_v6 = vmax.f32 %v1287_v12, %v6067_v8 }
 0x255   : > { %v1266_v14 = vmax.f32 %v1264_v19, %v6063_v31  ;;  %v1261_v28 = vmax.f32 %v1259_v23, %v6064_v32  ;;  %v6073_v31 = vld [vmem:[#allocation98_spill] sm:$0xff]  ;;  %v6074_v32 = vld [vmem:[#allocation84_spill] sm:$0xff]  ;;  %v6076_v8 = vld [vmem:[#allocation91_spill] sm:$0xff] }
 0x256   : > { %v1241_v25 = vrot.slane %v1240_v10, 4  ;;  %v1291_v19 = vmax.f32 %v1289_v6, %v6072_v49 }
 0x257   : > { %v1268_v18 = vmax.f32 %v1266_v14, %v6065_v51  ;;  %v1263_v33 = vmax.f32 %v1261_v28, %v6066_v59  ;;  %v6075_v51 = vld [vmem:[#allocation89_spill] sm:$0xff] }
 0x258   : > { %v1242_v13 = vmax.f32 %v1240_v10, %v1241_v25  ;;  %v6070_v25 = vld [vmem:[#allocation92_spill] sm:$0xff] }
 0x259   : > { %v1270_v16 = vmax.f32 %v1268_v18, %v6068_v36  ;;  %v1265_v10 = vmax.f32 %v1263_v33, %v6069_v43  ;;  %v1293_v18 = vmax.f32 %v1291_v19, %v6076_v8 }
 0x25a   : > { %v1243_v11 = vrot.slane %v1242_v13, 2 }
 0x25b   : > { %v1272_v47 = vmax.f32 %v1270_v16, %v6070_v25  ;;  %v1267_v45 = vmax.f32 %v1265_v10, %v6071_v53 }
 0x25c   : > { %v1244_v35 = vmax.f32 %v1242_v13, %v1243_v11  ;;  %v6077_v13 = vld [vmem:[#allocation95_spill] sm:$0xff] }
 0x25d   : > { %v1274_v7 = vmax.f32 %v1272_v47, %v6073_v31  ;;  %v1269_v14 = vmax.f32 %v1267_v45, %v6074_v32  ;;  %v6078_v47 = vld [vmem:[#allocation97_spill] sm:$0xff] }
 0x25e   : > { %v1245_v23 = vrot.slane %v1244_v35, 1  ;;  %v1295_v49 = vmax.f32 %v1293_v18, %v6078_v47 }
 0x25f   : > { %v1276_v28 = vmax.f32 %v1274_v7, %v3747_v15  ;;  %v1271_v12 = vmax.f32 %v1269_v14, %v6075_v51  ;;  %v3935_v7 = vpop.f32.mrf.mxu0 }
 0x260   : > { %v3903_v33 = vmax.f32 %v1244_v35, %v1245_v23  ;;  %v1297_v23 = vmax.f32 %v1295_v49, %v3742_v27  ;;  %v6079_v35 = vld [vmem:[#allocation23_spill] sm:$0xff] }
 0x261   : > { %v1278_v11 = vmax.f32 %v1276_v28, %v3769_v26  ;;  %v1273_v16 = vmax.f32 %v1271_v12, %v6077_v13 }
 0x262   : > { %v1316_v14 = vsub.f32 %v3542_v9, %v3903_v33  ;;  %v1318_v28 = vsub.f32 %v6079_v35, %v3903_v33  ;;  %v6081_v9 = vld [vmem:[#allocation27_spill] sm:$0xff]  ;;  %v6082_v35 = vld [vmem:[#allocation29_spill] sm:$0xff] }
 0x263   : > { %v1280_v10 = vmax.f32 %v1278_v11, %v3791_v58  ;;  %v1275_v6 = vmax.f32 %v1273_v16, %v3735_v17  ;;  %v6080_v16 = vld [vmem:[#allocation25_spill] sm:$0xff]  ;;  %v1322_v8 = vsub.f32 %v6081_v9, %v3903_v33 }
 0x264   : > { %v1320_v47 = vsub.f32 %v6080_v16, %v3903_v33 }
 0x265   : > { %v1282_v45 = vmax.f32 %v1280_v10, %v3816_v29  ;;  %v1277_v18 = vmax.f32 %v1275_v6, %v3758_v0 }
 0x267   : > { %v1284_v11 = vmax.f32 %v1282_v45, %v3840_v41  ;;  %v1279_v10 = vmax.f32 %v1277_v18, %v3780_v42  ;;  %v1444_v45 = vmul.f32 1.442695, %v1316_v14  ;;  %v1448_v18 = vmul.f32 1.442695, %v1318_v28 }
 0x268   : > { %v1456_v41 = vmul.f32 1.442695, %v1322_v8  ;;  %v1328_v28 = vsub.f32 %v3566_v20, %v3903_v33  ;;  %v6085_v8 = vld [vmem:[#allocation37_spill] sm:$0xff] }
 0x269   : > { %v1281_v19 = vmax.f32 %v1279_v10, %v3804_v48  ;;  %v1299_v12 = vmax.f32 %v1297_v23, %v1284_v11  ;;  %2685 = vpow2.f32 %v1444_v45  ;;  %v1324_v23 = vsub.f32 %v6082_v35, %v3903_v33 }
 0x26a   : > { %2687 = vpow2.f32 %v1448_v18  ;;  %v1452_v11 = vmul.f32 1.442695, %v1320_v47  ;;  %v1332_v47 = vsub.f32 %v3574_v24, %v3903_v33 }
 0x26b   : > { %v1283_v6 = vmax.f32 %v1281_v19, %v3828_v37  ;;  %v1301_v49 = vmax.f32 %v1299_v12, %v3760_v44  ;;  %v6083_v19 = vld [vmem:[#allocation31_spill] sm:$0xff]  ;;  %v1460_v12 = vmul.f32 1.442695, %v1324_v23  ;;  %v1336_v23 = vsub.f32 %v3586_v30, %v3903_v33 }
 0x26c   : > { %v1326_v14 = vsub.f32 %v6083_v19, %v3903_v33  ;;  %2689 = vpow2.f32 %v1452_v11 }
 0x26d   : > { %v1285_v27 = vmax.f32 %v1283_v6, %v3935_v7  ;;  %v6084_v6 = vld [vmem:[#allocation34_spill] sm:$0xff]  ;;  %2691 = vpow2.f32 %v1456_v41  ;;  %v1476_v41 = vmul.f32 1.442695, %v1332_v47 }
 0x26e   : > { %v1330_v45 = vsub.f32 %v6084_v6, %v3903_v33  ;;  %v1464_v9 = vmul.f32 1.442695, %v1326_v14  ;;  %2693 = vpow2.f32 %v1460_v12  ;;  %v1484_v12 = vmul.f32 1.442695, %v1336_v23 }
 0x26f   : > { %v1303_v10 = vmax.f32 %v1301_v49, %v1285_v27  ;;  %v1468_v27 = vmul.f32 1.442695, %v1328_v28  ;;  %v1334_v49 = vsub.f32 %v6085_v8, %v3903_v33  ;;  %v1340_v28 = vsub.f32 %v3602_v38, %v3903_v33 }
 0x270   : > { %2695 = vpow2.f32 %v1464_v9  ;;  %v1472_v20 = vmul.f32 1.442695, %v1330_v45  ;;  %v6090_v45 = vld [vmem:[#allocation51_spill] sm:$0xff]  ;;  %v1344_v38 = vsub.f32 %v3618_v46, %v3903_v33  ;;  %v1348_v46 = vsub.f32 %v3634_v54, %v3903_v33 }
 0x271   : > { %v1304_v16 = vmax.f32 %v3782_v55, %v1303_v10  ;;  %2697 = vpow2.f32 %v1468_v27  ;;  %v6088_v10 = vld [vmem:[#allocation44_spill] sm:$0xff]  ;;  %v1480_v14 = vmul.f32 1.442695, %v1334_v49  ;;  %v1342_v9 = vsub.f32 %v6090_v45, %v3903_v33 }
 0x272   : > { %v1338_v19 = vsub.f32 %v6088_v10, %v3903_v33  ;;  %2699 = vpow2.f32 %v1472_v20  ;;  %v1492_v8 = vmul.f32 1.442695, %v1340_v28  ;;  %v1500_v28 = vmul.f32 1.442695, %v1344_v38 }
 0x273   : > { %v1305_v18 = vmax.f32 %v3806_v1, %v1304_v16  ;;  %2701 = vpow2.f32 %v1476_v41  ;;  %v6093_v41 = vld [vmem:[#allocation58_spill] sm:$0xff]  ;;  %v1496_v10 = vmul.f32 1.442695, %v1342_v9  ;;  %v1352_v54 = vsub.f32 %v3650_v62, %v3903_v33 }
 0x274   : > { %2703 = vpow2.f32 %v1480_v14  ;;  %v1488_v47 = vmul.f32 1.442695, %v1338_v19  ;;  %v1508_v38 = vmul.f32 1.442695, %v1348_v46 }
 0x275   : > { %v1306_v24 = vmax.f32 %v3830_v63, %v1305_v18  ;;  %2705 = vpow2.f32 %v1484_v12  ;;  %v1516_v62 = vmul.f32 1.442695, %v1352_v54 }
 0x276   : > { %v3958_v35 = vpop.eup %2685  ;;  %2707 = vpow2.f32 %v1488_v47  ;;  %v6096_v47 = vld [vmem:[#allocation65_spill] sm:$0xff] }
 0x277   : > { %6086 = vst [vmem:[#allocation70_spill] sm:$0xff] %v3958_v35  ;;  %v3962_v11 = vpop.eup %2687  ;;  %v1307_v6 = vmax.f32 %v3850_v4, %v1306_v24  ;;  %v1346_v24 = vsub.f32 %v6093_v41, %v3903_v33  ;;  %2709 = vpow2.f32 %v1492_v8  ;;  %v1350_v9 = vsub.f32 %v6096_v47, %v3903_v33 }
 0x278   : > { %6087 = vst [vmem:[#allocation87_spill] sm:$0xff] %v3962_v11  ;;  %v1700_v16 = vadd.f32 %v3962_v11, %v3958_v35  ;;  %2711 = vpow2.f32 %v1496_v10  ;;  %v1356_v47 = vsub.f32 %v3662_v5, %v3903_v33  ;;  %v6100_v35 = vld [vmem:[#allocation75_spill] sm:$0xff] }
 0x279   : > { %v3971_v30 = vpop.eup %2689  ;;  %v1308_v23 = vmax.f32 %v3867_v21, %v1307_v6  ;;  %2713 = vpow2.f32 %v1500_v28  ;;  %v1512_v10 = vmul.f32 1.442695, %v1350_v9 }
 0x27a   : > { %6089 = vst [vmem:[#allocation74_spill] sm:$0xff] %v3971_v30  ;;  %v1701_v27 = vadd.f32 %v3971_v30, %v1700_v16  ;;  %v3977_v18 = vpop.eup %2691  ;;  %v3993_v16 = vpop.f32.mrf.mxu1  ;;  %v1524_v5 = vmul.f32 1.442695, %v1356_v47  ;;  %v6102_v30 = vld [vmem:[#allocation85_spill] sm:$0xff] }
 0x27b   : > { %6091 = vst [vmem:[#allocation92_spill] sm:$0xff] %v3977_v18  ;;  %v3982_v20 = vpop.eup %2693  ;;  %v1309_v6 = vmax.f32 %v3993_v16, %v1308_v23  ;;  %v1354_v23 = vsub.f32 %v3656_v2, %v3903_v33 }
 0x27c   : > { %v1702_v49 = vadd.f32 %v3977_v18, %v1701_v27  ;;  %6092 = vst [vmem:[#allocation79_spill] sm:$0xff] %v3982_v20  ;;  %v1504_v27 = vmul.f32 1.442695, %v1346_v24  ;;  %v1358_v18 = vsub.f32 %v6100_v35, %v3903_v33 }
 0x27d   : > { %v3988_v14 = vpop.eup %2695  ;;  %v1310_v11 = vrot.slane %v1309_v6, 4  ;;  %v1520_v2 = vmul.f32 1.442695, %v1354_v23 }
 0x27e   : > { %v1703_v19 = vadd.f32 %v3982_v20, %v1702_v49  ;;  %6094 = vst [vmem:[#allocation98_spill] sm:$0xff] %v3988_v14  ;;  %v3995_v45 = vpop.eup %2697  ;;  %2715 = vpow2.f32 %v1504_v27  ;;  %v1528_v35 = vmul.f32 1.442695, %v1358_v18 }
 0x27f   : > { %6095 = vst [vmem:[#allocation84_spill] sm:$0xff] %v3995_v45  ;;  %v4001_v41 = vpop.eup %2699  ;;  %2717 = vpow2.f32 %v1508_v38 }
 0x280   : > { %v1704_v12 = vadd.f32 %v3988_v14, %v1703_v19  ;;  %6097 = vst [vmem:[#allocation89_spill] sm:$0xff] %v4001_v41  ;;  %v4006_v19 = vpop.eup %2701  ;;  %2719 = vpow2.f32 %v1512_v10  ;;  %v1366_v14 = vsub.f32 %v6102_v30, %v3903_v33 }
 0x281   : > { %6098 = vst [vmem:[#allocation95_spill] sm:$0xff] %v4006_v19  ;;  %2721 = vpow2.f32 %v1516_v62 }
 0x282   : > { %v1705_v49 = vadd.f32 %v3995_v45, %v1704_v12  ;;  %v4011_v12 = vpop.eup %2703  ;;  %2723 = vpow2.f32 %v1520_v2  ;;  %v1544_v30 = vmul.f32 1.442695, %v1366_v14  ;;  %v6117_v45 = vld [vmem:[#allocation26_spill] sm:$0xff] }
 0x283   : > { %6099 = vst [vmem:[#allocation23_spill] sm:$0xff] %v4011_v12  ;;  %v4016_v28 = vpop.eup %2705  ;;  %2725 = vpow2.f32 %v1524_v5 }
 0x284   : > { %v1706_v8 = vadd.f32 %v4001_v41, %v1705_v49  ;;  %v1311_v49 = vmax.f32 %v1309_v6, %v1310_v11  ;;  %v4021_v27 = vpop.eup %2707  ;;  %v6101_v11 = vld [vmem:[#allocation80_spill] sm:$0xff]  ;;  %2727 = vpow2.f32 %v1528_v35 }
 0x285   : > { %v4026_v38 = vpop.eup %2709  ;;  %v1362_v6 = vsub.f32 %v6101_v11, %v3903_v33  ;;  %v1368_v11 = vsub.f32 %v3700_v61, %v3903_v33  ;;  %v6108_v41 = vld [vmem:[#allocation96_spill] sm:$0xff] }
 0x286   : > { %v1707_v24 = vadd.f32 %v4006_v19, %v1706_v8  ;;  %v1360_v8 = vsub.f32 %v3674_v40, %v3903_v33  ;;  %v4031_v10 = vpop.eup %2711 }
 0x287   : > { %v4036_v62 = vpop.eup %2713  ;;  %v1536_v2 = vmul.f32 1.442695, %v1362_v6  ;;  %v1548_v61 = vmul.f32 1.442695, %v1368_v11  ;;  %v6111_v11 = vld [vmem:[#allocation101_spill] sm:$0xff] }
 0x288   : > { %v1708_v46 = vadd.f32 %v4011_v12, %v1707_v24  ;;  %v1312_v24 = vrot.slane %v1311_v49, 2  ;;  %v1532_v40 = vmul.f32 1.442695, %v1360_v8 }
 0x28a   : > { %v1709_v9 = vadd.f32 %v4016_v28, %v1708_v46  ;;  %v1364_v46 = vsub.f32 %v3686_v52, %v3903_v33  ;;  %2729 = vpow2.f32 %v1532_v40 }
 0x28b   : > { %2731 = vpow2.f32 %v1536_v2 }
 0x28c   : > { %v1710_v54 = vadd.f32 %v4021_v27, %v1709_v9  ;;  %v1313_v9 = vmax.f32 %v1311_v49, %v1312_v24  ;;  %v1540_v52 = vmul.f32 1.442695, %v1364_v46  ;;  %v6104_v49 = vld [vmem:[#allocation90_spill] sm:$0xff] }
 0x28d   : > { %v1370_v24 = vsub.f32 %v6104_v49, %v3903_v33  ;;  %v1374_v49 = vsub.f32 %v6108_v41, %v3903_v33  ;;  %v6113_v41 = vld [vmem:[#allocation22_spill] sm:$0xff] }
 0x28e   : > { %v1711_v23 = vadd.f32 %v4026_v38, %v1710_v54  ;;  %v4041_v54 = vpop.eup %2715  ;;  %2733 = vpow2.f32 %v1540_v52  ;;  %v1378_v52 = vsub.f32 %v6111_v11, %v3903_v33  ;;  %v6116_v11 = vld [vmem:[#allocation104_spill] sm:$0xff] }
 0x28f   : > { %v4046_v5 = vpop.eup %2717  ;;  %2735 = vpow2.f32 %v1544_v30  ;;  %v1552_v14 = vmul.f32 1.442695, %v1370_v24  ;;  %v1560_v24 = vmul.f32 1.442695, %v1374_v49 }
 0x290   : > { %v1712_v47 = vadd.f32 %v4031_v10, %v1711_v23  ;;  %6103 = vst [vmem:[#allocation25_spill] sm:$0xff] %v4046_v5  ;;  %v1314_v23 = vrot.slane %v1313_v9, 1  ;;  %v4051_v35 = vpop.eup %2719  ;;  %2737 = vpow2.f32 %v1548_v61  ;;  %v1380_v61 = vsub.f32 %v6116_v11, %v3903_v33 }
 0x291   : > { %6105 = vst [vmem:[#allocation27_spill] sm:$0xff] %v4051_v35  ;;  %v4056_v40 = vpop.eup %2721  ;;  %2739 = vpow2.f32 %v1552_v14 }
 0x292   : > { %v1713_v18 = vadd.f32 %v4036_v62, %v1712_v47  ;;  %v6106_v47 = vld [vmem:[#allocation93_spill] sm:$0xff]  ;;  %6107 = vst [vmem:[#allocation29_spill] sm:$0xff] %v4056_v40 }
 0x293   : > { %v1372_v20 = vsub.f32 %v6106_v47, %v3903_v33 }
 0x294   : > { %v1714_v8 = vadd.f32 %v4041_v54, %v1713_v18  ;;  %v4058_v18 = vmax.f32 %v1313_v9, %v1314_v23 }
 0x296   : > { %v1715_v6 = vadd.f32 %v4046_v5, %v1714_v8  ;;  %v4063_v8 = vpop.eup %2723  ;;  %v6110_v5 = vld [vmem:[#allocation99_spill] sm:$0xff]  ;;  %v1317_v30 = vsub.f32 %v6113_v41, %v4058_v18  ;;  %v1321_v41 = vsub.f32 %v6117_v45, %v4058_v18 }
 0x297   : > { %6109 = vst [vmem:[#allocation31_spill] sm:$0xff] %v4063_v8  ;;  %v1376_v47 = vsub.f32 %v6110_v5, %v3903_v33  ;;  %v4070_v23 = vpop.eup %2725 }
 0x298   : > { %v1716_v46 = vadd.f32 %v4051_v35, %v1715_v6  ;;  %v1556_v6 = vmul.f32 1.442695, %v1372_v20  ;;  %6112 = vst [vmem:[#allocation34_spill] sm:$0xff] %v4070_v23  ;;  %v6114_v35 = vld [vmem:[#allocation24_spill] sm:$0xff]  ;;  %v4077_v5 = vpop.eup %2727  ;;  %v1446_v49 = vmul.f32 1.442695, %v1317_v30 }
 0x299   : > { %6115 = vst [vmem:[#allocation37_spill] sm:$0xff] %v4077_v5  ;;  %v1564_v20 = vmul.f32 1.442695, %v1376_v47  ;;  %v4084_v14 = vpop.eup %2729  ;;  %v1572_v47 = vmul.f32 1.442695, %v1380_v61 }
 0x29a   : > { %v1717_v2 = vadd.f32 %v4056_v40, %v1716_v46  ;;  %v1319_v40 = vsub.f32 %v6114_v35, %v4058_v18  ;;  %2741 = vpow2.f32 %v1556_v6  ;;  %6118 = vst [vmem:[#allocation44_spill] sm:$0xff] %v4084_v14  ;;  %v6119_v35 = vld [vmem:[#allocation28_spill] sm:$0xff]  ;;  %v4089_v19 = vpop.eup %2731  ;;  %v6121_v6 = vld [vmem:[#allocation30_spill] sm:$0xff] }
 0x29b   : > { %2743 = vpow2.f32 %v1560_v24  ;;  %6120 = vst [vmem:[#allocation51_spill] sm:$0xff] %v4089_v19  ;;  %v1325_v45 = vsub.f32 %v6121_v6, %v4058_v18  ;;  %v4094_v11 = vpop.eup %2733  ;;  %v6124_v24 = vld [vmem:[#allocation32_spill] sm:$0xff] }
 0x29c   : > { %v1718_v9 = vadd.f32 %v4063_v8, %v1717_v2  ;;  %v1568_v2 = vmul.f32 1.442695, %v1378_v52  ;;  %v1450_v12 = vmul.f32 1.442695, %v1319_v40  ;;  %2745 = vpow2.f32 %v1564_v20  ;;  %6122 = vst [vmem:[#allocation58_spill] sm:$0xff] %v4094_v11 }
 0x29d   : > { %v1327_v20 = vsub.f32 %v6124_v24, %v4058_v18 }
 0x29e   : > { %v1719_v46 = vadd.f32 %v4070_v23, %v1718_v9  ;;  %v1323_v23 = vsub.f32 %v6119_v35, %v4058_v18  ;;  %2747 = vpow2.f32 %v1568_v2  ;;  %v4102_v2 = vpop.eup %2735 }
 0x29f   : > { %2749 = vpow2.f32 %v1446_v49  ;;  %6125 = vst [vmem:[#allocation65_spill] sm:$0xff] %v4102_v2  ;;  %v1462_v49 = vmul.f32 1.442695, %v1325_v45  ;;  %v1466_v24 = vmul.f32 1.442695, %v1327_v20  ;;  %v6131_v45 = vsub.f32 %v3799_v39, %v3903_v33 }
 0x2a0   : > { %v1720_v8 = vadd.f32 %v4077_v5, %v1719_v46  ;;  %v1454_v46 = vmul.f32 1.442695, %v1321_v41  ;;  %2751 = vpow2.f32 %v1450_v12  ;;  %v1458_v61 = vmul.f32 1.442695, %v1323_v23 }
 0x2a1   : > { %2753 = vpow2.f32 %v1572_v47  ;;  %v6126_v41 = vsub.f32 %v3775_v34, %v3903_v33  ;;  %v6128_v12 = vsub.f32 %v3786_v50, %v3903_v33  ;;  %v6133_v20 = vsub.f32 %v3811_v56, %v3903_v33  ;;  %v6136_v56 = vld [vmem:[#allocation42_spill] sm:$0xff] }
 0x2a2   : > { %v1721_v9 = vadd.f32 %v4084_v14, %v1720_v8  ;;  %v6123_v8 = vsub.f32 %v3764_v22, %v3903_v33  ;;  %v6127_v22 = vld [vmem:[#allocation33_spill] sm:$0xff]  ;;  %2755 = vpow2.f32 %v1454_v46  ;;  %v1588_v46 = vmul.f32 1.442695, %v6131_v45 }
 0x2a3   : > { %v1329_v6 = vsub.f32 %v6127_v22, %v4058_v18  ;;  %v1584_v23 = vmul.f32 1.442695, %v6128_v12  ;;  %v6134_v12 = vld [vmem:[#allocation39_spill] sm:$0xff] }
 0x2a4   : > { %v1722_v52 = vadd.f32 %v4089_v19, %v1721_v9  ;;  %v1576_v30 = vmul.f32 1.442695, %v6123_v8  ;;  %v1580_v9 = vmul.f32 1.442695, %v6126_v41  ;;  %v6129_v8 = vld [vmem:[#allocation35_spill] sm:$0xff]  ;;  %v6132_v41 = vld [vmem:[#allocation36_spill] sm:$0xff]  ;;  %v1335_v39 = vsub.f32 %v6134_v12, %v4058_v18 }
 0x2a5   : > { %v1331_v34 = vsub.f32 %v6129_v8, %v4058_v18  ;;  %v1333_v50 = vsub.f32 %v6132_v41, %v4058_v18  ;;  %v1470_v22 = vmul.f32 1.442695, %v1329_v6  ;;  %v6135_v6 = vsub.f32 %v3823_v57, %v3903_v33 }
 0x2a6   : > { %v1723_v40 = vadd.f32 %v4094_v11, %v1722_v52  ;;  %v4110_v52 = vpop.eup %2737  ;;  %2757 = vpow2.f32 %v1576_v30  ;;  %v1337_v41 = vsub.f32 %v6136_v56, %v4058_v18  ;;  %v6142_v56 = vld [vmem:[#allocation41_spill] sm:$0xff] }
 0x2a7   : > { %2759 = vpow2.f32 %v1458_v61  ;;  %v1592_v61 = vmul.f32 1.442695, %v6133_v20  ;;  %v1474_v8 = vmul.f32 1.442695, %v1331_v34  ;;  %v6137_v34 = vld [vmem:[#allocation38_spill] sm:$0xff]  ;;  %v1400_v19 = vsub.f32 %v6142_v56, %v3903_v33 }
 0x2a8   : > { %v1724_v35 = vadd.f32 %v4102_v2, %v1723_v40  ;;  %v4118_v40 = vpop.eup %2739  ;;  %2761 = vpow2.f32 %v1580_v9 }
 0x2a9   : > { %6130 = vst [vmem:[#allocation75_spill] sm:$0xff] %v4118_v40  ;;  %2763 = vpow2.f32 %v1462_v49  ;;  %v1596_v49 = vmul.f32 1.442695, %v6135_v6 }
 0x2aa   : > { %v1725_v47 = vadd.f32 %v4110_v52, %v1724_v35  ;;  %v4126_v35 = vpop.eup %2741  ;;  %2765 = vpow2.f32 %v1584_v23 }
 0x2ab   : > { %2767 = vpow2.f32 %v1466_v24  ;;  %v1398_v24 = vsub.f32 %v6137_v34, %v3903_v33  ;;  %v6144_v34 = vld [vmem:[#allocation49_spill] sm:$0xff] }
 0x2ac   : > { %v1726_v30 = vadd.f32 %v4118_v40, %v1725_v47  ;;  %v4134_v47 = vpop.eup %2743  ;;  %2769 = vpow2.f32 %v1588_v46  ;;  %v6138_v46 = vsub.f32 %v3835_v60, %v3903_v33 }
 0x2ad   : > { %v4139_v45 = vpop.eup %2745  ;;  %2771 = vpow2.f32 %v1470_v22  ;;  %v1482_v22 = vmul.f32 1.442695, %v1335_v39 }
 0x2ae   : > { %v1727_v9 = vadd.f32 %v4126_v35, %v1726_v30  ;;  %v1478_v30 = vmul.f32 1.442695, %v1333_v50  ;;  %v4144_v20 = vpop.eup %2747  ;;  %2773 = vpow2.f32 %v1592_v61  ;;  %v1600_v57 = vmul.f32 1.442695, %v6138_v46 }
 0x2af   : > { %v4151_v12 = vpop.eup %2749  ;;  %2775 = vpow2.f32 %v1474_v8  ;;  %v6143_v61 = vsub.f32 %v3846_v3, %v3903_v33  ;;  %v1341_v46 = vsub.f32 %v6144_v34, %v4058_v18  ;;  %v1486_v8 = vmul.f32 1.442695, %v1337_v41 }
 0x2b0   : > { %v1728_v23 = vadd.f32 %v4134_v47, %v1727_v9  ;;  %6139 = vst [vmem:[#allocation80_spill] sm:$0xff] %v4151_v12  ;;  %v6140_v9 = vld [vmem:[#allocation46_spill] sm:$0xff]  ;;  %v4156_v50 = vpop.eup %2751  ;;  %2777 = vpow2.f32 %v1596_v49  ;;  %v6147_v49 = vld [vmem:[#allocation45_spill] sm:$0xff]  ;;  %v1608_v3 = vmul.f32 1.442695, %v1398_v24  ;;  %v6152_v24 = vld [vmem:[#allocation56_spill] sm:$0xff] }
 0x2b1   : > { %v1339_v5 = vsub.f32 %v6140_v9, %v4058_v18  ;;  %6141 = vst [vmem:[#allocation85_spill] sm:$0xff] %v4156_v50  ;;  %v1604_v60 = vmul.f32 1.442695, %v6143_v61  ;;  %v4165_v14 = vpop.eup %2753  ;;  %2779 = vpow2.f32 %v1478_v30  ;;  %v1769_v39 = vadd.f32 %v4156_v50, %v4151_v12  ;;  %v6148_v61 = vld [vmem:[#allocation53_spill] sm:$0xff]  ;;  %v6151_v50 = vld [vmem:[#allocation48_spill] sm:$0xff] }
 0x2b2   : > { %v1729_v6 = vadd.f32 %v4139_v45, %v1728_v23  ;;  %6145 = vst [vmem:[#allocation90_spill] sm:$0xff] %v4165_v14  ;;  %v4170_v9 = vpop.eup %2755  ;;  %v1402_v56 = vsub.f32 %v6147_v49, %v3903_v33  ;;  %2781 = vpow2.f32 %v1600_v57  ;;  %v1343_v2 = vsub.f32 %v6148_v61, %v4058_v18 }
 0x2b3   : > { %6146 = vst [vmem:[#allocation93_spill] sm:$0xff] %v4170_v9  ;;  %v4176_v34 = vpop.eup %2757  ;;  %2783 = vpow2.f32 %v1482_v22  ;;  %v1490_v30 = vmul.f32 1.442695, %v1339_v5  ;;  %v1770_v41 = vadd.f32 %v4170_v9, %v1769_v39  ;;  %v1404_v12 = vsub.f32 %v6151_v50, %v3903_v33  ;;  %v6155_v39 = vld [vmem:[#allocation52_spill] sm:$0xff] }
 0x2b4   : > { %v1730_v23 = vadd.f32 %v4144_v20, %v1729_v6  ;;  %6149 = vst [vmem:[#allocation96_spill] sm:$0xff] %v4176_v34  ;;  %v4180_v6 = vpop.eup %2759  ;;  %2785 = vpow2.f32 %v1604_v60  ;;  %v1612_v49 = vmul.f32 1.442695, %v1400_v19  ;;  %v1345_v57 = vsub.f32 %v6152_v24, %v4058_v18  ;;  %v6156_v19 = vld [vmem:[#allocation60_spill] sm:$0xff] }
 0x2b5   : > { %6150 = vst [vmem:[#allocation99_spill] sm:$0xff] %v4180_v6  ;;  %v4186_v40 = vpop.eup %2761  ;;  %2787 = vpow2.f32 %v1486_v8  ;;  %v1771_v5 = vadd.f32 %v4180_v6, %v1770_v41  ;;  %v1406_v9 = vsub.f32 %v6155_v39, %v3903_v33  ;;  %v1616_v50 = vmul.f32 1.442695, %v1402_v56  ;;  %v6159_v41 = vld [vmem:[#allocation55_spill] sm:$0xff] }
 0x2b6   : > { %v1731_v11 = vadd.f32 %v4165_v14, %v1730_v23  ;;  %6153 = vst [vmem:[#allocation101_spill] sm:$0xff] %v4186_v40  ;;  %v1494_v23 = vmul.f32 1.442695, %v1341_v46  ;;  %v4190_v22 = vpop.eup %2763  ;;  %2789 = vpow2.f32 %v1608_v3  ;;  %v1347_v60 = vsub.f32 %v6156_v19, %v4058_v18  ;;  %v6160_v56 = vld [vmem:[#allocation63_spill] sm:$0xff] }
 0x2b7   : > { %6154 = vst [vmem:[#allocation22_spill] sm:$0xff] %v4190_v22  ;;  %v4196_v14 = vpop.eup %2765  ;;  %2791 = vpow2.f32 %v1490_v30  ;;  %v1772_v46 = vadd.f32 %v4190_v22, %v1771_v5  ;;  %v1408_v6 = vsub.f32 %v6159_v41, %v3903_v33  ;;  %v1620_v39 = vmul.f32 1.442695, %v1404_v12  ;;  %v6163_v5 = vld [vmem:[#allocation59_spill] sm:$0xff] }
 0x2b8   : > { %v1732_v61 = vadd.f32 %v4176_v34, %v1731_v11  ;;  %6157 = vst [vmem:[#allocation24_spill] sm:$0xff] %v4196_v14  ;;  %v1498_v11 = vmul.f32 1.442695, %v1343_v2  ;;  %v4200_v8 = vpop.eup %2767  ;;  %2793 = vpow2.f32 %v1612_v49  ;;  %v1349_v3 = vsub.f32 %v6160_v56, %v4058_v18  ;;  %v6164_v12 = vld [vmem:[#allocation67_spill] sm:$0xff] }
 0x2b9   : > { %6158 = vst [vmem:[#allocation104_spill] sm:$0xff] %v4200_v8  ;;  %v4206_v34 = vpop.eup %2769  ;;  %2795 = vpow2.f32 %v1494_v23  ;;  %v1773_v2 = vadd.f32 %v4200_v8, %v1772_v46  ;;  %v1410_v22 = vsub.f32 %v6163_v5, %v3903_v33  ;;  %v1624_v41 = vmul.f32 1.442695, %v1406_v9  ;;  %v6167_v46 = vld [vmem:[#allocation62_spill] sm:$0xff] }
 0x2ba   : > { %v1733_v24 = vadd.f32 %v4186_v40, %v1732_v61  ;;  %6161 = vst [vmem:[#allocation26_spill] sm:$0xff] %v4206_v34  ;;  %v1502_v61 = vmul.f32 1.442695, %v1345_v57  ;;  %v4210_v30 = vpop.eup %2771  ;;  %2797 = vpow2.f32 %v1616_v50  ;;  %v1351_v49 = vsub.f32 %v6164_v12, %v4058_v18 }
 0x2bb   : > { %6162 = vst [vmem:[#allocation28_spill] sm:$0xff] %v4210_v30  ;;  %v4216_v40 = vpop.eup %2773  ;;  %2799 = vpow2.f32 %v1498_v11  ;;  %v1774_v57 = vadd.f32 %v4210_v30, %v1773_v2  ;;  %v1412_v8 = vsub.f32 %v6167_v46, %v3903_v33  ;;  %v1628_v5 = vmul.f32 1.442695, %v1408_v6  ;;  %v6169_v2 = vld [vmem:[#allocation66_spill] sm:$0xff]  ;;  %v6170_v6 = vld [vmem:[#allocation72_spill] sm:$0xff] }
 0x2bc   : > { %v1734_v19 = vadd.f32 %v4196_v14, %v1733_v24  ;;  %6165 = vst [vmem:[#allocation30_spill] sm:$0xff] %v4216_v40  ;;  %v1506_v24 = vmul.f32 1.442695, %v1347_v60  ;;  %v4220_v23 = vpop.eup %2775  ;;  %2801 = vpow2.f32 %v1620_v39  ;;  %v1353_v9 = vsub.f32 %v6066_v59, %v4058_v18 }
 0x2bd   : > { %6166 = vst [vmem:[#allocation32_spill] sm:$0xff] %v4220_v23  ;;  %v4226_v50 = vpop.eup %2777  ;;  %2803 = vpow2.f32 %v1502_v61  ;;  %v1775_v60 = vadd.f32 %v4220_v23, %v1774_v57  ;;  %v1414_v30 = vsub.f32 %v6169_v2, %v3903_v33  ;;  %v1632_v46 = vmul.f32 1.442695, %v1410_v22  ;;  %v6172_v57 = vld [vmem:[#allocation69_spill] sm:$0xff] }
 0x2be   : > { %v1735_v56 = vadd.f32 %v4206_v34, %v1734_v19  ;;  %v1510_v19 = vmul.f32 1.442695, %v1349_v3  ;;  %v4230_v11 = vpop.eup %2779  ;;  %2805 = vpow2.f32 %v1624_v41  ;;  %v1355_v39 = vsub.f32 %v6170_v6, %v4058_v18 }
 0x2bf   : > { %6168 = vst [vmem:[#allocation33_spill] sm:$0xff] %v4230_v11  ;;  %v4236_v14 = vpop.eup %2781  ;;  %2807 = vpow2.f32 %v1506_v24  ;;  %v1776_v3 = vadd.f32 %v4230_v11, %v1775_v60  ;;  %v1416_v23 = vsub.f32 %v6172_v57, %v3903_v33  ;;  %v1636_v2 = vmul.f32 1.442695, %v1412_v8  ;;  %v6174_v60 = vld [vmem:[#allocation73_spill] sm:$0xff] }
 0x2c0   : > { %v1736_v12 = vadd.f32 %v4216_v40, %v1735_v56  ;;  %v1514_v56 = vmul.f32 1.442695, %v1351_v49  ;;  %v4240_v61 = vpop.eup %2783  ;;  %2809 = vpow2.f32 %v1628_v5  ;;  %v1357_v22 = vsub.f32 %v6069_v43, %v4058_v18  ;;  %v6175_v8 = vld [vmem:[#allocation77_spill] sm:$0xff] }
 0x2c1   : > { %6171 = vst [vmem:[#allocation35_spill] sm:$0xff] %v4240_v61  ;;  %v4246_v41 = vpop.eup %2785  ;;  %2811 = vpow2.f32 %v1510_v19  ;;  %v1777_v49 = vadd.f32 %v4240_v61, %v1776_v3  ;;  %v1418_v11 = vsub.f32 %v6174_v60, %v3903_v33  ;;  %v1640_v57 = vmul.f32 1.442695, %v1414_v30  ;;  %v6177_v3 = vld [vmem:[#allocation78_spill] sm:$0xff] }
 0x2c2   : > { %v1737_v59 = vadd.f32 %v4226_v50, %v1736_v12  ;;  %v1518_v12 = vmul.f32 1.442695, %v1353_v9  ;;  %v4250_v24 = vpop.eup %2787  ;;  %2813 = vpow2.f32 %v1632_v46  ;;  %v1359_v5 = vsub.f32 %v6175_v8, %v4058_v18 }
 0x2c3   : > { %6173 = vst [vmem:[#allocation36_spill] sm:$0xff] %v4250_v24  ;;  %v4256_v40 = vpop.eup %2789  ;;  %2815 = vpow2.f32 %v1514_v56  ;;  %v1778_v9 = vadd.f32 %v4250_v24, %v1777_v49  ;;  %v1420_v61 = vsub.f32 %v6177_v3, %v3903_v33  ;;  %v1644_v60 = vmul.f32 1.442695, %v1416_v23  ;;  %v6179_v49 = vld [vmem:[#allocation83_spill] sm:$0xff]  ;;  %v6180_v23 = vld [vmem:[#allocation82_spill] sm:$0xff] }
 0x2c4   : > { %v1738_v6 = vadd.f32 %v4236_v14, %v1737_v59  ;;  %v1522_v59 = vmul.f32 1.442695, %v1355_v39  ;;  %v4260_v19 = vpop.eup %2791  ;;  %2817 = vpow2.f32 %v1636_v2  ;;  %v1361_v30 = vsub.f32 %v6071_v53, %v4058_v18 }
 0x2c5   : > { %6176 = vst [vmem:[#allocation39_spill] sm:$0xff] %v4260_v19  ;;  %v4266_v46 = vpop.eup %2793  ;;  %2819 = vpow2.f32 %v1518_v12  ;;  %v1779_v39 = vadd.f32 %v4260_v19, %v1778_v9  ;;  %v1422_v24 = vsub.f32 %v6179_v49, %v3903_v33  ;;  %v1648_v3 = vmul.f32 1.442695, %v1418_v11  ;;  %v6182_v9 = vld [vmem:[#allocation88_spill] sm:$0xff] }
 0x2c6   : > { %v1739_v43 = vadd.f32 %v4246_v41, %v1738_v6  ;;  %v1526_v6 = vmul.f32 1.442695, %v1357_v22  ;;  %v4270_v56 = vpop.eup %2795  ;;  %2821 = vpow2.f32 %v1640_v57  ;;  %v1363_v2 = vsub.f32 %v6180_v23, %v4058_v18 }
 0x2c7   : > { %6178 = vst [vmem:[#allocation42_spill] sm:$0xff] %v4270_v56  ;;  %v4276_v34 = vpop.eup %2797  ;;  %2823 = vpow2.f32 %v1522_v59  ;;  %v1780_v22 = vadd.f32 %v4270_v56, %v1779_v39  ;;  %v1424_v19 = vsub.f32 %v6182_v9, %v3903_v33  ;;  %v1652_v49 = vmul.f32 1.442695, %v1420_v61  ;;  %v6184_v39 = vld [vmem:[#allocation94_spill] sm:$0xff] }
 0x2c8   : > { %v1740_v8 = vadd.f32 %v4256_v40, %v1739_v43  ;;  %v1530_v43 = vmul.f32 1.442695, %v1359_v5  ;;  %v4280_v12 = vpop.eup %2799  ;;  %2825 = vpow2.f32 %v1644_v60  ;;  %v1365_v11 = vsub.f32 %v6074_v32, %v4058_v18 }
 0x2c9   : > { %6181 = vst [vmem:[#allocation38_spill] sm:$0xff] %v4280_v12  ;;  %v4286_v57 = vpop.eup %2801  ;;  %2827 = vpow2.f32 %v1526_v6  ;;  %v1781_v5 = vadd.f32 %v4280_v12, %v1780_v22  ;;  %v1426_v56 = vsub.f32 %v6184_v39, %v3903_v33  ;;  %v1656_v9 = vmul.f32 1.442695, %v1422_v24  ;;  %v6186_v22 = vld [vmem:[#allocation100_spill] sm:$0xff] }
 0x2ca   : > { %v1741_v53 = vadd.f32 %v4266_v46, %v1740_v8  ;;  %v1534_v8 = vmul.f32 1.442695, %v1361_v30  ;;  %v4290_v59 = vpop.eup %2803  ;;  %2829 = vpow2.f32 %v1648_v3  ;;  %v1367_v61 = vsub.f32 %v6068_v36, %v4058_v18 }
 0x2cb   : > { %6183 = vst [vmem:[#allocation46_spill] sm:$0xff] %v4290_v59  ;;  %v4296_v60 = vpop.eup %2805  ;;  %2831 = vpow2.f32 %v1530_v43  ;;  %v1782_v30 = vadd.f32 %v4290_v59, %v1781_v5  ;;  %v1428_v12 = vsub.f32 %v6186_v22, %v3903_v33  ;;  %v1660_v39 = vmul.f32 1.442695, %v1424_v19  ;;  %v6188_v5 = vld [vmem:[#allocation103_spill] sm:$0xff] }
 0x2cc   : > { %v1742_v23 = vadd.f32 %v4276_v34, %v1741_v53  ;;  %v1538_v53 = vmul.f32 1.442695, %v1363_v2  ;;  %v4300_v6 = vpop.eup %2807  ;;  %2833 = vpow2.f32 %v1652_v49  ;;  %v1369_v24 = vsub.f32 %v6075_v51, %v4058_v18 }
 0x2cd   : > { %6185 = vst [vmem:[#allocation41_spill] sm:$0xff] %v4300_v6  ;;  %v4306_v3 = vpop.eup %2809  ;;  %2835 = vpow2.f32 %v1534_v8  ;;  %v1783_v2 = vadd.f32 %v4300_v6, %v1782_v30  ;;  %v1430_v59 = vsub.f32 %v6188_v5, %v3903_v33  ;;  %v1664_v22 = vmul.f32 1.442695, %v1426_v56  ;;  %v6190_v30 = vld [vmem:[#allocation105_spill] sm:$0xff] }
 0x2ce   : > { %v1743_v32 = vadd.f32 %v4286_v57, %v1742_v23  ;;  %v1542_v23 = vmul.f32 1.442695, %v1365_v11  ;;  %v4310_v43 = vpop.eup %2811  ;;  %2837 = vpow2.f32 %v1656_v9  ;;  %v1371_v19 = vsub.f32 %v6070_v25, %v4058_v18 }
 0x2cf   : > { %6187 = vst [vmem:[#allocation49_spill] sm:$0xff] %v4310_v43  ;;  %v4316_v49 = vpop.eup %2813  ;;  %2839 = vpow2.f32 %v1538_v53  ;;  %v1784_v11 = vadd.f32 %v4310_v43, %v1783_v2  ;;  %v1432_v6 = vsub.f32 %v6190_v30, %v3903_v33  ;;  %v1668_v5 = vmul.f32 1.442695, %v1428_v12  ;;  %v6193_v2 = vld [vmem:[#allocation106_spill] sm:$0xff] }
 0x2d0   : > { %v1744_v36 = vadd.f32 %v4296_v60, %v1743_v32  ;;  %v1546_v32 = vmul.f32 1.442695, %v1367_v61  ;;  %v4320_v8 = vpop.eup %2815  ;;  %2841 = vpow2.f32 %v1660_v39  ;;  %v1373_v56 = vsub.f32 %v6077_v13, %v4058_v18 }
 0x2d1   : > { %6189 = vst [vmem:[#allocation45_spill] sm:$0xff] %v4320_v8  ;;  %v4326_v9 = vpop.eup %2817  ;;  %2843 = vpow2.f32 %v1542_v23  ;;  %v1785_v61 = vadd.f32 %v4320_v8, %v1784_v11  ;;  %v1434_v43 = vsub.f32 %v6193_v2, %v3903_v33  ;;  %v1672_v30 = vmul.f32 1.442695, %v1430_v59  ;;  %v6196_v11 = vld [vmem:[#allocation107_spill] sm:$0xff] }
 0x2d2   : > { %v1745_v51 = vadd.f32 %v4306_v3, %v1744_v36  ;;  %6191 = vst [vmem:[#allocation53_spill] sm:$0xff] %v4326_v9  ;;  %v1550_v36 = vmul.f32 1.442695, %v1369_v24  ;;  %v4330_v53 = vpop.eup %2819  ;;  %2845 = vpow2.f32 %v1664_v22  ;;  %v1375_v12 = vsub.f32 %v6073_v31, %v4058_v18 }
 0x2d3   : > { %6192 = vst [vmem:[#allocation48_spill] sm:$0xff] %v4330_v53  ;;  %v4336_v39 = vpop.eup %2821  ;;  %2847 = vpow2.f32 %v1546_v32  ;;  %v1786_v24 = vadd.f32 %v4330_v53, %v1785_v61  ;;  %v1436_v8 = vsub.f32 %v6196_v11, %v3903_v33  ;;  %v1676_v2 = vmul.f32 1.442695, %v1432_v6  ;;  %v6199_v61 = vld [vmem:[#allocation109_spill] sm:$0xff] }
 0x2d4   : > { %v1746_v25 = vadd.f32 %v4316_v49, %v1745_v51  ;;  %6194 = vst [vmem:[#allocation56_spill] sm:$0xff] %v4336_v39  ;;  %v1554_v51 = vmul.f32 1.442695, %v1371_v19  ;;  %v4340_v23 = vpop.eup %2823  ;;  %2849 = vpow2.f32 %v1668_v5  ;;  %v1377_v59 = vsub.f32 %v3735_v17, %v4058_v18 }
 0x2d5   : > { %6195 = vst [vmem:[#allocation52_spill] sm:$0xff] %v4340_v23  ;;  %v4346_v22 = vpop.eup %2825  ;;  %2851 = vpow2.f32 %v1550_v36  ;;  %v1787_v19 = vadd.f32 %v4340_v23, %v1786_v24  ;;  %v1438_v53 = vsub.f32 %v6199_v61, %v3903_v33  ;;  %v1680_v11 = vmul.f32 1.442695, %v1434_v43  ;;  %v6202_v24 = vld [vmem:[#allocation110_spill] sm:$0xff] }
 0x2d6   : > { %v1747_v13 = vadd.f32 %v4326_v9, %v1746_v25  ;;  %6197 = vst [vmem:[#allocation60_spill] sm:$0xff] %v4346_v22  ;;  %v1558_v25 = vmul.f32 1.442695, %v1373_v56  ;;  %v4350_v32 = vpop.eup %2827  ;;  %2853 = vpow2.f32 %v1672_v30  ;;  %v1379_v6 = vsub.f32 %v3747_v15, %v4058_v18 }
 0x2d7   : > { %6198 = vst [vmem:[#allocation55_spill] sm:$0xff] %v4350_v32  ;;  %v4356_v5 = vpop.eup %2829  ;;  %2855 = vpow2.f32 %v1554_v51  ;;  %v1788_v56 = vadd.f32 %v4350_v32, %v1787_v19  ;;  %v1440_v23 = vsub.f32 %v6202_v24, %v3903_v33  ;;  %v1684_v61 = vmul.f32 1.442695, %v1436_v8  ;;  %v6205_v19 = vld [vmem:[#allocation111_spill] sm:$0xff] }
 0x2d8   : > { %v1748_v31 = vadd.f32 %v4336_v39, %v1747_v13  ;;  %6200 = vst [vmem:[#allocation63_spill] sm:$0xff] %v4356_v5  ;;  %v1562_v13 = vmul.f32 1.442695, %v1375_v12  ;;  %v4360_v36 = vpop.eup %2831  ;;  %2857 = vpow2.f32 %v1676_v2  ;;  %v1381_v43 = vsub.f32 %v3758_v0, %v4058_v18 }
 0x2d9   : > { %6201 = vst [vmem:[#allocation59_spill] sm:$0xff] %v4360_v36  ;;  %v4366_v30 = vpop.eup %2833  ;;  %2859 = vpow2.f32 %v1558_v25  ;;  %v1789_v12 = vadd.f32 %v4360_v36, %v1788_v56  ;;  %v1442_v32 = vsub.f32 %v6205_v19, %v3903_v33  ;;  %v1688_v24 = vmul.f32 1.442695, %v1438_v53 }
 0x2da   : > { %v1749_v17 = vadd.f32 %v4346_v22, %v1748_v31  ;;  %6203 = vst [vmem:[#allocation67_spill] sm:$0xff] %v4366_v30  ;;  %v1566_v31 = vmul.f32 1.442695, %v1377_v59  ;;  %v4370_v51 = vpop.eup %2835  ;;  %2861 = vpow2.f32 %v1680_v11  ;;  %v1383_v8 = vsub.f32 %v3769_v26, %v4058_v18 }
 0x2db   : > { %6204 = vst [vmem:[#allocation62_spill] sm:$0xff] %v4370_v51  ;;  %v4376_v2 = vpop.eup %2837  ;;  %2863 = vpow2.f32 %v1562_v13  ;;  %v1790_v59 = vadd.f32 %v4370_v51, %v1789_v12  ;;  %v1692_v56 = vmul.f32 1.442695, %v1440_v23  ;;  %v1385_v33 = vsub.f32 %v3780_v42, %v4058_v18 }
 0x2dc   : > { %v1750_v15 = vadd.f32 %v4356_v5, %v1749_v17  ;;  %6206 = vst [vmem:[#allocation66_spill] sm:$0xff] %v4376_v2  ;;  %v1570_v17 = vmul.f32 1.442695, %v1379_v6  ;;  %v4380_v25 = vpop.eup %2839  ;;  %2865 = vpow2.f32 %v1684_v61  ;;  %v1574_v26 = vmul.f32 1.442695, %v1381_v43 }
 0x2dd   : > { %6207 = vst [vmem:[#allocation72_spill] sm:$0xff] %v4380_v25  ;;  %v4384_v11 = vpop.eup %2841  ;;  %2867 = vpow2.f32 %v1566_v31  ;;  %v1791_v19 = vadd.f32 %v4380_v25, %v1790_v59  ;;  %v1696_v6 = vmul.f32 1.442695, %v1442_v32  ;;  %v1387_v13 = vsub.f32 %v3791_v58, %v4058_v18 }
 0x2de   : > { %v1751_v0 = vadd.f32 %v4366_v30, %v1750_v15  ;;  %v4388_v15 = vpop.eup %2843  ;;  %2869 = vpow2.f32 %v1688_v24  ;;  %v1578_v42 = vmul.f32 1.442695, %v1383_v8  ;;  %v1389_v43 = vsub.f32 %v3804_v48, %v4058_v18 }
 0x2df   : > { %6208 = vst [vmem:[#allocation69_spill] sm:$0xff] %v4388_v15  ;;  %v4392_v61 = vpop.eup %2845  ;;  %2871 = vpow2.f32 %v1570_v17  ;;  %v1792_v12 = vadd.f32 %v4388_v15, %v1791_v19  ;;  %v1582_v58 = vmul.f32 1.442695, %v1385_v33  ;;  %v1391_v8 = vsub.f32 %v3816_v29, %v4058_v18 }
 0x2e0   : > { %v1752_v53 = vadd.f32 %v4376_v2, %v1751_v0  ;;  %v4396_v0 = vpop.eup %2847  ;;  %2873 = vpow2.f32 %v1692_v56  ;;  %v1586_v48 = vmul.f32 1.442695, %v1387_v13  ;;  %v1393_v33 = vsub.f32 %v3828_v37, %v4058_v18 }
 0x2e1   : > { %6209 = vst [vmem:[#allocation73_spill] sm:$0xff] %v4396_v0  ;;  %v4400_v31 = vpop.eup %2849  ;;  %2875 = vpow2.f32 %v1574_v26  ;;  %v1793_v24 = vadd.f32 %v4396_v0, %v1792_v12  ;;  %v1594_v36 = vmul.f32 1.442695, %v1391_v8 }
 0x2e2   : > { %v1753_v23 = vadd.f32 %v4384_v11, %v1752_v53  ;;  %v4404_v59 = vpop.eup %2851  ;;  %2877 = vpow2.f32 %v1696_v6 }
 0x2e3   : > { %6210 = vst [vmem:[#allocation77_spill] sm:$0xff] %v4404_v59  ;;  %v4408_v17 = vpop.eup %2853  ;;  %2879 = vpow2.f32 %v1578_v42  ;;  %v1794_v53 = vadd.f32 %v4404_v59, %v1793_v24  ;;  %v6213_v42 = vld [vmem:[#allocation108_spill] sm:$0xff] }
 0x2e4   : > { %v1754_v32 = vadd.f32 %v4392_v61, %v1753_v23  ;;  %v4412_v19 = vpop.eup %2855  ;;  %2881 = vpow2.f32 %v1582_v58  ;;  %v1590_v23 = vmul.f32 1.442695, %v1389_v43  ;;  %v1395_v13 = vsub.f32 %v6213_v42, %v4058_v18 }
 0x2e5   : > { %6211 = vst [vmem:[#allocation78_spill] sm:$0xff] %v4412_v19  ;;  %v4416_v26 = vpop.eup %2857  ;;  %v1795_v29 = vadd.f32 %v4412_v19, %v1794_v53  ;;  %2883 = vpow2.f32 %v1586_v48  ;;  %v1397_v43 = vsub.f32 %v3935_v7, %v4058_v18  ;;  %v1598_v53 = vmul.f32 1.442695, %v1393_v33  ;;  %v6216_v48 = vld [vmem:[#allocation40_spill] sm:$0xff] }
 0x2e6   : > { %v1755_v56 = vadd.f32 %v4400_v31, %v1754_v32  ;;  %v4420_v12 = vpop.eup %2859  ;;  %2885 = vpow2.f32 %v1590_v23  ;;  %v1399_v8 = vsub.f32 %v6216_v48, %v4058_v18  ;;  %v1602_v0 = vmul.f32 1.442695, %v1395_v13  ;;  %v6218_v23 = vld [vmem:[#allocation43_spill] sm:$0xff] }
 0x2e7   : > { %6212 = vst [vmem:[#allocation83_spill] sm:$0xff] %v4420_v12  ;;  %v4424_v32 = vpop.eup %2861  ;;  %v1796_v37 = vadd.f32 %v4420_v12, %v1795_v29  ;;  %2887 = vpow2.f32 %v1594_v36  ;;  %v1401_v33 = vsub.f32 %v6218_v23, %v4058_v18  ;;  %v1606_v19 = vmul.f32 1.442695, %v1397_v43  ;;  %v6220_v36 = vld [vmem:[#allocation47_spill] sm:$0xff] }
 0x2e8   : > { %v1756_v6 = vadd.f32 %v4408_v17, %v1755_v56  ;;  %v4428_v25 = vpop.eup %2863  ;;  %2889 = vpow2.f32 %v1598_v53  ;;  %v1403_v13 = vsub.f32 %v6220_v36, %v4058_v18  ;;  %v6222_v53 = vld [vmem:[#allocation50_spill] sm:$0xff] }
 0x2e9   : > { %6214 = vst [vmem:[#allocation82_spill] sm:$0xff] %v4428_v25  ;;  %v4432_v58 = vpop.eup %2865  ;;  %v1797_v42 = vadd.f32 %v4428_v25, %v1796_v37  ;;  %2891 = vpow2.f32 %v1602_v0  ;;  %v1610_v25 = vmul.f32 1.442695, %v1399_v8  ;;  %v1405_v43 = vsub.f32 %v6222_v53, %v4058_v18  ;;  %v6225_v0 = vld [vmem:[#allocation57_spill] sm:$0xff] }
 0x2ea   : > { %v1757_v24 = vadd.f32 %v4416_v26, %v1756_v6  ;;  %v4436_v51 = vpop.eup %2867  ;;  %2893 = vpow2.f32 %v1606_v19  ;;  %v1614_v36 = vmul.f32 1.442695, %v1401_v33  ;;  %v1409_v8 = vsub.f32 %v6225_v0, %v4058_v18  ;;  %v6228_v19 = vld [vmem:[#allocation64_spill] sm:$0xff] }
 0x2eb   : > { %6215 = vst [vmem:[#allocation88_spill] sm:$0xff] %v4436_v51  ;;  %v4440_v6 = vpop.eup %2869  ;;  %v1798_v7 = vadd.f32 %v4436_v51, %v1797_v42  ;;  %2895 = vpow2.f32 %v1610_v25  ;;  %v1618_v53 = vmul.f32 1.442695, %v1403_v13  ;;  %v1413_v33 = vsub.f32 %v6228_v19, %v4058_v18  ;;  %v6231_v25 = vld [vmem:[#allocation71_spill] sm:$0xff] }
 0x2ec   : > { %v1758_v56 = vadd.f32 %v4424_v32, %v1757_v24  ;;  %v4444_v15 = vpop.eup %2871  ;;  %2897 = vpow2.f32 %v1614_v36  ;;  %v1417_v13 = vsub.f32 %v6231_v25, %v4058_v18 }
 0x2ed   : > { %6217 = vst [vmem:[#allocation94_spill] sm:$0xff] %v4444_v15  ;;  %v4448_v24 = vpop.eup %2873  ;;  %v1799_v48 = vadd.f32 %v4444_v15, %v1798_v7  ;;  %2899 = vpow2.f32 %v1618_v53 }
 0x2ee   : > { %v1759_v29 = vadd.f32 %v4432_v58, %v1758_v56  ;;  %v4452_v59 = vpop.eup %2875  ;;  %v1646_v53 = vmul.f32 1.442695, %v1417_v13 }
 0x2ef   : > { %6219 = vst [vmem:[#allocation100_spill] sm:$0xff] %v4452_v59  ;;  %v4456_v56 = vpop.eup %2877  ;;  %v1800_v23 = vadd.f32 %v4452_v59, %v1799_v48 }
 0x2f0   : > { %v1760_v37 = vadd.f32 %v4440_v6, %v1759_v29  ;;  %v4460_v12 = vpop.eup %2879  ;;  %v6223_v29 = vld [vmem:[#allocation54_spill] sm:$0xff] }
 0x2f1   : > { %6221 = vst [vmem:[#allocation103_spill] sm:$0xff] %v4460_v12  ;;  %v1407_v7 = vsub.f32 %v6223_v29, %v4058_v18  ;;  %v1801_v51 = vadd.f32 %v4460_v12, %v1800_v23  ;;  %v4468_v39 = vpop.eup %2881  ;;  %v1622_v12 = vmul.f32 1.442695, %v1405_v43  ;;  %v6233_v43 = vld [vmem:[#allocation76_spill] sm:$0xff] }
 0x2f2   : > { %v1761_v42 = vadd.f32 %v4448_v24, %v1760_v37  ;;  %6224 = vst [vmem:[#allocation105_spill] sm:$0xff] %v4468_v39  ;;  %v6226_v37 = vld [vmem:[#allocation61_spill] sm:$0xff]  ;;  %v4475_v29 = vpop.eup %2883 }
 0x2f3   : > { %v1411_v48 = vsub.f32 %v6226_v37, %v4058_v18  ;;  %v1802_v9 = vadd.f32 %v4468_v39, %v1801_v51  ;;  %6227 = vst [vmem:[#allocation106_spill] sm:$0xff] %v4475_v29  ;;  %v1626_v0 = vmul.f32 1.442695, %v1407_v7  ;;  %v4482_v37 = vpop.eup %2885  ;;  %v1630_v51 = vmul.f32 1.442695, %v1409_v8 }
 0x2f4   : > { %v1762_v15 = vadd.f32 %v4456_v56, %v1761_v42  ;;  %v6229_v42 = vld [vmem:[#allocation68_spill] sm:$0xff]  ;;  %6230 = vst [vmem:[#allocation107_spill] sm:$0xff] %v4482_v37  ;;  %v4487_v30 = vpop.eup %2887  ;;  %2901 = vpow2.f32 %v1622_v12 }
 0x2f5   : > { %v1415_v23 = vsub.f32 %v6229_v42, %v4058_v18  ;;  %v1803_v22 = vadd.f32 %v4475_v29, %v1802_v9  ;;  %v1634_v2 = vmul.f32 1.442695, %v1411_v48  ;;  %6232 = vst [vmem:[#allocation109_spill] sm:$0xff] %v4487_v30  ;;  %v1638_v9 = vmul.f32 1.442695, %v1413_v33  ;;  %v4494_v25 = vpop.eup %2889  ;;  %v6235_v48 = vld [vmem:[#allocation86_spill] sm:$0xff] }
 0x2f6   : > { %v1763_v59 = vrot.slane %v1762_v15, 4  ;;  %2903 = vpow2.f32 %v1626_v0  ;;  %v4501_v33 = vpop.eup %2891 }
 0x2f7   : > { %v1804_v19 = vadd.f32 %v4482_v37, %v1803_v22  ;;  %v1642_v42 = vmul.f32 1.442695, %v1415_v23  ;;  %v1423_v22 = vsub.f32 %v6235_v48, %v4058_v18  ;;  %2905 = vpow2.f32 %v1630_v51  ;;  %6237 = vst [vmem:[#allocation110_spill] sm:$0xff] %v4501_v33  ;;  %v6239_v23 = vld [vmem:[#allocation102_spill] sm:$0xff]  ;;  %v4508_v48 = vpop.eup %2893 }
 0x2f8   : > { %v1764_v5 = vadd.f32 %v1763_v59, %v1762_v15  ;;  %v1419_v15 = vsub.f32 %v6233_v43, %v4058_v18  ;;  %v6234_v59 = vld [vmem:[#allocation81_spill] sm:$0xff]  ;;  %v6236_v43 = vld [vmem:[#allocation91_spill] sm:$0xff]  ;;  %2907 = vpow2.f32 %v1634_v2  ;;  %v1429_v0 = vsub.f32 %v6239_v23, %v4058_v18 }
 0x2f9   : > { %v1421_v7 = vsub.f32 %v6234_v59, %v4058_v18  ;;  %v1805_v8 = vadd.f32 %v4487_v30, %v1804_v19  ;;  %v1425_v37 = vsub.f32 %v6236_v43, %v4058_v18  ;;  %2909 = vpow2.f32 %v1638_v9 }
 0x2fa   : > { %v1765_v39 = vrot.slane %v1764_v5, 2  ;;  %v1650_v19 = vmul.f32 1.442695, %v1419_v15  ;;  %2911 = vpow2.f32 %v1642_v42  ;;  %v1431_v2 = vsub.f32 %v3760_v44, %v4058_v18  ;;  %v4515_v15 = vpop.eup %2895 }
 0x2fb   : > { %v1806_v12 = vadd.f32 %v4494_v25, %v1805_v8  ;;  %v1654_v13 = vmul.f32 1.442695, %v1421_v7  ;;  %2913 = vpow2.f32 %v1646_v53  ;;  %v1658_v8 = vmul.f32 1.442695, %v1423_v22  ;;  %v4522_v22 = vpop.eup %2897 }
 0x2fc   : > { %v1766_v36 = vadd.f32 %v1765_v39, %v1764_v5  ;;  %v6238_v39 = vld [vmem:[#allocation97_spill] sm:$0xff]  ;;  %v1433_v43 = vsub.f32 %v3782_v55, %v4058_v18  ;;  %v1670_v44 = vmul.f32 1.442695, %v1429_v0  ;;  %v1439_v55 = vsub.f32 %v3850_v4, %v4058_v18 }
 0x2fd   : > { %v1427_v5 = vsub.f32 %v6238_v39, %v4058_v18  ;;  %v1807_v51 = vadd.f32 %v4501_v33, %v1806_v12  ;;  %v1662_v39 = vmul.f32 1.442695, %v1425_v37  ;;  %v1674_v37 = vmul.f32 1.442695, %v1431_v2 }
 0x2fe   : > { %v1767_v29 = vrot.slane %v1766_v36, 1  ;;  %v1441_v53 = vsub.f32 %v3867_v21, %v4058_v18  ;;  %v1690_v21 = vmul.f32 1.442695, %v1439_v55 }
 0x2ff   : > { %v1808_v9 = vadd.f32 %v4508_v48, %v1807_v51  ;;  %v1666_v7 = vmul.f32 1.442695, %v1427_v5  ;;  %v4529_v5 = vpop.eup %2899 }
 0x300   : > { %v1768_v59 = vadd.f32 %v1767_v29, %v1766_v36  ;;  %v1435_v29 = vsub.f32 %v3806_v1, %v4058_v18  ;;  %v1437_v36 = vsub.f32 %v3830_v63, %v4058_v18  ;;  %v1678_v1 = vmul.f32 1.442695, %v1433_v43 }
 0x301   : > { %v1809_v42 = vadd.f32 %v4515_v15, %v1808_v9  ;;  %v1443_v63 = vsub.f32 %v3993_v16, %v4058_v18  ;;  %v4533_v0 = vpop.eup %2901  ;;  %v1694_v51 = vmul.f32 1.442695, %v1441_v53 }
 0x302   : > { %2915 = vrcp.f32 %v1768_v59  ;;  %v1682_v23 = vmul.f32 1.442695, %v1435_v29  ;;  %v1686_v4 = vmul.f32 1.442695, %v1437_v36  ;;  %v4556_v36 = vld [vmem:[%s331_s29] sm:$0xff] }
 0x303   : > { %2917 = vpow2.f32 %v1650_v19  ;;  %v1810_v12 = vadd.f32 %v4522_v22, %v1809_v42  ;;  %v4536_v59 = vpop.eup %2903  ;;  %v1698_v2 = vmul.f32 1.442695, %v1443_v63  ;;  %6243 = vst [vmem:[#allocation43_spill] sm:$0xff] %v4556_v36 }
 0x304   : > { %2919 = vpow2.f32 %v1654_v13  ;;  %v4538_v13 = vpop.eup %2905 }
 0x305   : > { %2921 = vpow2.f32 %v1658_v8  ;;  %v1811_v19 = vadd.f32 %v4529_v5, %v1810_v12  ;;  %v4541_v18 = vpop.eup %2907 }
 0x306   : > { %2923 = vpow2.f32 %v1662_v39  ;;  %v4543_v8 = vpop.eup %2909 }
 0x307   : > { %2925 = vpow2.f32 %v1666_v7  ;;  %v1812_v16 = vadd.f32 %v4533_v0, %v1811_v19  ;;  %6240 = vst [vmem:[#allocation111_spill] sm:$0xff] %v4543_v8  ;;  %v4547_v39 = vpop.eup %2911 }
 0x308   : > { %2927 = vpow2.f32 %v1670_v44  ;;  %6241 = vst [vmem:[#allocation108_spill] sm:$0xff] %v4547_v39  ;;  %v4549_v9 = vpop.eup %2913 }
 0x309   : > { %2929 = vpow2.f32 %v1674_v37  ;;  %v1813_v43 = vadd.f32 %v4536_v59, %v1812_v16  ;;  %6242 = vst [vmem:[#allocation40_spill] sm:$0xff] %v4549_v9  ;;  %v6253_v16 = vld [vmem:[#allocation98_spill] sm:$0xff] }
 0x30a   : > { %2931 = vpow2.f32 %v1678_v1 }
 0x30b   : > { %2933 = vpow2.f32 %v1682_v23  ;;  %v1814_v29 = vadd.f32 %v4538_v13, %v1813_v43  ;;  %v6250_v43 = vld [vmem:[#allocation89_spill] sm:$0xff] }
 0x30c   : > { %2935 = vpow2.f32 %v1686_v4 }
 0x30d   : > { %2937 = vpow2.f32 %v1690_v21  ;;  %v1815_v42 = vadd.f32 %v4541_v18, %v1814_v29  ;;  %v4612_v21 = vcombine.high %v4556_v36, %v4556_v36  ;;  %v6255_v36 = vld [vmem:[#allocation74_spill] sm:$0xff] }
 0x30e   : > { %2939 = vpow2.f32 %v1694_v51 }
 0x30f   : > { %v4552_v7 = vpop.eup %2915  ;;  %2941 = vpow2.f32 %v1698_v2  ;;  %v1816_v4 = vadd.f32 %v4543_v8, %v1815_v42  ;;  %v6251_v42 = vld [vmem:[#allocation79_spill] sm:$0xff]  ;;  %v6257_v2 = vld [vmem:[#allocation92_spill] sm:$0xff] }
 0x310   : > { %v4558_v44 = vpop.eup %2917  ;;  %v4563_v55 = vmul.f32 %v4552_v7, %v4036_v62  ;;  %v4567_v37 = vmul.f32 %v4552_v7, %v4041_v54  ;;  %v4571_v53 = vmul.f32 %v4552_v7, %v4026_v38  ;;  %v4577_v12 = vmul.f32 %v4552_v7, %v4031_v10  ;;  %v6245_v54 = vld [vmem:[#allocation95_spill] sm:$0xff]  ;;  %v6249_v10 = vld [vmem:[#allocation84_spill] sm:$0xff] }
 0x311   : > { %6244 = vst [vmem:[#allocation47_spill] sm:$0xff] %v4558_v44  ;;  %v4573_v1 = vpop.eup %2919  ;;  %v4581_v63 = vmul.f32 %v4552_v7, %v4016_v28  ;;  %v4585_v62 = vmul.f32 %v4552_v7, %v4021_v27  ;;  %v4589_v23 = vmul.f32 %v4552_v7, %v6245_v54  ;;  %v6247_v28 = vld [vmem:[#allocation23_spill] sm:$0xff]  ;;  %v4608_v19 = vmul.f32 %v4552_v7, %v6249_v10 }
 0x312   : > { %v4591_v38 = vpop.eup %2921  ;;  %1996 = vst [vmem:[%s4594_s30 + $0xe0] sm:$0xff] %v4563_v55  ;;  %1998 = vst [vmem:[%s4594_s30 + $0xf0] sm:$0xff] %v4567_v37  ;;  %v4604_v27 = vmul.f32 %v4552_v7, %v6247_v28  ;;  %v4630_v29 = vmul.f32 %v4552_v7, %v6250_v43  ;;  %v4634_v54 = vmul.f32 %v4552_v7, %v6251_v42 }
 0x313   : > { %6246 = vst [vmem:[#allocation50_spill] sm:$0xff] %v4589_v23  ;;  %1992 = vst [vmem:[%s4594_s30 + $0xc0] sm:$0xff] %v4571_v53  ;;  %v4614_v51 = vpop.eup %2923  ;;  %v1817_v10 = vadd.f32 %v4547_v39, %v1816_v4  ;;  %v4647_v43 = vmul.f32 %v4552_v7, %v6253_v16  ;;  %v4651_v42 = vmul.f32 %v4552_v7, %v6255_v36  ;;  %v6259_v39 = vld [vmem:[#allocation70_spill] sm:$0xff] }
 0x314   : > { %6248 = vst [vmem:[#allocation54_spill] sm:$0xff] %v4604_v27  ;;  %1994 = vst [vmem:[%s4594_s30 + $0xd0] sm:$0xff] %v4577_v12  ;;  %v4636_v28 = vpop.eup %2925  ;;  %v4663_v16 = vmul.f32 %v4552_v7, %v6257_v2  ;;  %v4667_v36 = vmul.f32 %v4552_v7, %v6259_v39  ;;  %v4684_v39 = vmul.f32 %v4552_v7, %v4139_v45  ;;  %v6270_v45 = vld [vmem:[#allocation58_spill] sm:$0xff] }
 0x315   : > { %1988 = vst [vmem:[%s4594_s30 + $0xa0] sm:$0xff] %v4581_v63  ;;  %1990 = vst [vmem:[%s4594_s30 + $0xb0] sm:$0xff] %v4585_v62  ;;  %v4653_v8 = vpop.eup %2927  ;;  %v1818_v33 = vadd.f32 %v4549_v9, %v1817_v10  ;;  %v4708_v2 = vmul.f32 %v4552_v7, %v4134_v47 }
 0x316   : > { %1984 = vst [vmem:[%s4594_s30 + $0x80] sm:$0xff] %v4589_v23  ;;  %6252 = vst [vmem:[#allocation57_spill] sm:$0xff] %v4634_v54  ;;  %v6261_v23 = vld [vmem:[#allocation87_spill] sm:$0xff]  ;;  %v4673_v30 = vpop.eup %2929 }
 0x317   : > { %1986 = vst [vmem:[%s4594_s30 + $0x90] sm:$0xff] %v4604_v27  ;;  %1980 = vst [vmem:[%s4594_s30 + $0x60] sm:$0xff] %v4608_v19  ;;  %v4671_v27 = vmul.f32 %v4552_v7, %v6261_v23  ;;  %v4688_v23 = vmul.f32 %v4552_v7, %v4144_v20  ;;  %v4690_v4 = vpop.eup %2931  ;;  %v4704_v20 = vmul.f32 %v4552_v7, %v4126_v35 }
 0x318   : > { %6254 = vst [vmem:[#allocation61_spill] sm:$0xff] %v4647_v43  ;;  %6256 = vst [vmem:[#allocation64_spill] sm:$0xff] %v4651_v42  ;;  %v1819_v10 = vadd.f32 %v4558_v44, %v1818_v33  ;;  %v4721_v35 = vmul.f32 %v4552_v7, %v4110_v52  ;;  %v4737_v52 = vmul.f32 %v4552_v7, %v6270_v45  ;;  %v6276_v33 = vld [vmem:[#allocation51_spill] sm:$0xff] }
 0x319   : > { %1982 = vst [vmem:[%s4594_s30 + $0x70] sm:$0xff] %v4630_v29  ;;  %1976 = vst [vmem:[%s4594_s30 + $0x40] sm:$0xff] %v4634_v54  ;;  %v4710_v54 = vpop.eup %2933 }
 0x31a   : > { %6258 = vst [vmem:[#allocation68_spill] sm:$0xff] %v4663_v16  ;;  %6260 = vst [vmem:[#allocation71_spill] sm:$0xff] %v4667_v36 }
 0x31b   : > { %6262 = vst [vmem:[#allocation76_spill] sm:$0xff] %v4671_v27  ;;  %1978 = vst [vmem:[%s4594_s30 + $0x50] sm:$0xff] %v4647_v43  ;;  %v1820_v43 = vadd.f32 %v4573_v1, %v1819_v10 }
 0x31c   : > { %1972 = vst [vmem:[%s4594_s30 + $0x20] sm:$0xff] %v4651_v42  ;;  %6263 = vst [vmem:[#allocation81_spill] sm:$0xff] %v4684_v39 }
 0x31d   : > { %6264 = vst [vmem:[#allocation86_spill] sm:$0xff] %v4688_v23  ;;  %1974 = vst [vmem:[%s4594_s30 + $0x30] sm:$0xff] %v4663_v16  ;;  %v1821_v10 = vadd.f32 %v4591_v38, %v1820_v43  ;;  %v6298_v43 = vld [vmem:[#allocation24_spill] sm:$0xff] }
 0x31e   : > { %1968 = vst [vmem:[%s4594_s30] sm:$0xff] %v4667_v36  ;;  %1970 = vst [vmem:[%s4594_s30 + $0x10] sm:$0xff] %v4671_v27  ;;  %v6268_v36 = vld [vmem:[#allocation75_spill] sm:$0xff]  ;;  %v4727_v27 = vpop.eup %2935 }
 0x31f   : > { %6265 = vst [vmem:[#allocation91_spill] sm:$0xff] %v4704_v20  ;;  %6266 = vst [vmem:[#allocation97_spill] sm:$0xff] %v4708_v2  ;;  %v4725_v47 = vmul.f32 %v4552_v7, %v6268_v36  ;;  %v4747_v16 = vpop.eup %2937 }
 0x320   : > { %2028 = vst [vmem:[%s4594_s30 + $0x1e0] sm:$0xff] %v4684_v39  ;;  %2030 = vst [vmem:[%s4594_s30 + $0x1f0] sm:$0xff] %v4688_v23  ;;  %v6272_v39 = vld [vmem:[#allocation65_spill] sm:$0xff]  ;;  %v6274_v23 = vld [vmem:[#allocation44_spill] sm:$0xff] }
 0x321   : > { %6267 = vst [vmem:[#allocation102_spill] sm:$0xff] %v4721_v35  ;;  %6269 = vst [vmem:[#allocation95_spill] sm:$0xff] %v4725_v47  ;;  %v4741_v36 = vmul.f32 %v4552_v7, %v6272_v39  ;;  %v4745_v42 = vmul.f32 %v4552_v7, %v6274_v23  ;;  %v4758_v39 = vmul.f32 %v4552_v7, %v6276_v33  ;;  %v6278_v33 = vld [vmem:[#allocation37_spill] sm:$0xff] }
 0x322   : > { %2024 = vst [vmem:[%s4594_s30 + $0x1c0] sm:$0xff] %v4704_v20  ;;  %2026 = vst [vmem:[%s4594_s30 + $0x1d0] sm:$0xff] %v4708_v2  ;;  %v6277_v20 = vld [vmem:[#allocation34_spill] sm:$0xff]  ;;  %v4764_v2 = vpop.eup %2939  ;;  %v4776_v45 = vmul.f32 %v4552_v7, %v6278_v33  ;;  %v4828_v33 = vmul.f32 %v4552_v7, %v4316_v49  ;;  %v4846_v49 = vmul.f32 %v4552_v7, %v4276_v34 }
 0x323   : > { %6271 = vst [vmem:[#allocation23_spill] sm:$0xff] %v4737_v52  ;;  %6273 = vst [vmem:[#allocation84_spill] sm:$0xff] %v4741_v36  ;;  %v4762_v23 = vmul.f32 %v4552_v7, %v6277_v20  ;;  %v6279_v20 = vld [vmem:[#allocation29_spill] sm:$0xff]  ;;  %v4786_v9 = vpop.eup %2941  ;;  %v4865_v34 = vmul.f32 %v4552_v7, %v4226_v50  ;;  %v6292_v50 = vld [vmem:[#allocation26_spill] sm:$0xff] }
 0x324   : > { %6275 = vst [vmem:[#allocation89_spill] sm:$0xff] %v4745_v42  ;;  %2020 = vst [vmem:[%s4594_s30 + $0x1a0] sm:$0xff] %v4721_v35  ;;  %v4780_v35 = vmul.f32 %v4552_v7, %v6279_v20 }
 0x325   : > { %2022 = vst [vmem:[%s4594_s30 + $0x1b0] sm:$0xff] %v4725_v47  ;;  %2016 = vst [vmem:[%s4594_s30 + $0x180] sm:$0xff] %v4737_v52  ;;  %v6280_v47 = vld [vmem:[#allocation31_spill] sm:$0xff]  ;;  %v6281_v52 = vld [vmem:[#allocation25_spill] sm:$0xff] }
 0x326   : > { %2018 = vst [vmem:[%s4594_s30 + $0x190] sm:$0xff] %v4741_v36  ;;  %2012 = vst [vmem:[%s4594_s30 + $0x160] sm:$0xff] %v4745_v42  ;;  %v4784_v44 = vmul.f32 %v4552_v7, %v6280_v47  ;;  %v4797_v20 = vmul.f32 %v4552_v7, %v6281_v52  ;;  %v6282_v36 = vld [vmem:[#allocation27_spill] sm:$0xff]  ;;  %v2105_v52 = vpack.c.bf16 %v4612_v21, %v4612_v21 }
 0x327   : > { %2014 = vst [vmem:[%s4594_s30 + $0x170] sm:$0xff] %v4758_v39  ;;  %2008 = vst [vmem:[%s4594_s30 + $0x140] sm:$0xff] %v4762_v23  ;;  %v4801_v47 = vmul.f32 %v4552_v7, %v6282_v36  ;;  %v4817_v36 = vmul.f32 %v4552_v7, %v4306_v3  ;;  %v1822_v42 = vadd.f32 %v4614_v51, %v1821_v10 }
 0x328   : > { %2010 = vst [vmem:[%s4594_s30 + $0x150] sm:$0xff] %v4776_v45  ;;  %2004 = vst [vmem:[%s4594_s30 + $0x120] sm:$0xff] %v4780_v35  ;;  %v4832_v3 = vmul.f32 %v4552_v7, %v4286_v57  ;;  %2204 = vmatprep.mubr.bf16.mxu1 %v2105_v52  ;;  %v4838_v21 = vmul.f32 %v4552_v7, %v4296_v60  ;;  %v4842_v10 = vmul.f32 %v4552_v7, %v4266_v46 }
 0x329   : > { %2006 = vst [vmem:[%s4594_s30 + $0x130] sm:$0xff] %v4784_v44  ;;  %6283 = vst [vmem:[#allocation79_spill] sm:$0xff] %v4817_v36  ;;  %v4850_v57 = vmul.f32 %v4552_v7, %v4246_v41  ;;  %v1823_v52 = vadd.f32 %v4636_v28, %v1822_v42  ;;  %v4861_v46 = vmul.f32 %v4552_v7, %v4256_v40  ;;  %v6294_v42 = vld [vmem:[#allocation30_spill] sm:$0xff] }
 0x32a   : > { %2000 = vst [vmem:[%s4594_s30 + $0x100] sm:$0xff] %v4797_v20  ;;  %2002 = vst [vmem:[%s4594_s30 + $0x110] sm:$0xff] %v4801_v47  ;;  %v4881_v40 = vmul.f32 %v4552_v7, %v4236_v14  ;;  %v4885_v60 = vmul.f32 %v4552_v7, %v6292_v50  ;;  %v6296_v14 = vld [vmem:[#allocation101_spill] sm:$0xff] }
 0x32b   : > { %6284 = vst [vmem:[#allocation98_spill] sm:$0xff] %v4832_v3  ;;  %2060 = vst [vmem:[%s4594_s30 + $0x2e0] sm:$0xff] %v4817_v36  ;;  %v1824_v41 = vadd.f32 %v4653_v8, %v1823_v52  ;;  %v4900_v50 = vmul.f32 %v4552_v7, %v6296_v14  ;;  %v6355_v36 = vld [vmem:[#allocation48_spill] sm:$0xff] }
 0x32c   : > { %6285 = vst [vmem:[#allocation74_spill] sm:$0xff] %v4838_v21  ;;  %6286 = vst [vmem:[#allocation92_spill] sm:$0xff] %v4842_v10 }
 0x32d   : > { %6287 = vst [vmem:[#allocation70_spill] sm:$0xff] %v4846_v49  ;;  %6288 = vst [vmem:[#allocation87_spill] sm:$0xff] %v4850_v57 }
 0x32e   : > { %2062 = vst [vmem:[%s4594_s30 + $0x2f0] sm:$0xff] %v4828_v33  ;;  %2056 = vst [vmem:[%s4594_s30 + $0x2c0] sm:$0xff] %v4832_v3  ;;  %v1825_v3 = vadd.f32 %v4673_v30, %v1824_v41 }
 0x32f   : > { %6289 = vst [vmem:[#allocation75_spill] sm:$0xff] %v4861_v46  ;;  %6290 = vst [vmem:[#allocation58_spill] sm:$0xff] %v4865_v34 }
 0x330   : > { %2058 = vst [vmem:[%s4594_s30 + $0x2d0] sm:$0xff] %v4838_v21  ;;  %2052 = vst [vmem:[%s4594_s30 + $0x2a0] sm:$0xff] %v4842_v10  ;;  %v4896_v10 = vmul.f32 %v4552_v7, %v6294_v42  ;;  %v1826_v52 = vadd.f32 %v4690_v4, %v1825_v3  ;;  %v4976_v3 = vmul.f32 %v4552_v7, %v4400_v31  ;;  %v6318_v31 = vld [vmem:[#allocation60_spill] sm:$0xff]  ;;  %v6354_v21 = vld [vmem:[#allocation59_spill] sm:$0xff] }
 0x331   : > { %2054 = vst [vmem:[%s4594_s30 + $0x2b0] sm:$0xff] %v4846_v49  ;;  %2048 = vst [vmem:[%s4594_s30 + $0x280] sm:$0xff] %v4850_v57  ;;  %v4910_v57 = vmul.f32 %v4552_v7, %v6298_v43  ;;  %v6302_v49 = vld [vmem:[#allocation96_spill] sm:$0xff]  ;;  %v4929_v43 = vmul.f32 %v4552_v7, %v4448_v24  ;;  %v4947_v24 = vmul.f32 %v4552_v7, %v4432_v58 }
 0x332   : > { %6291 = vst [vmem:[#allocation65_spill] sm:$0xff] %v4881_v40  ;;  %6293 = vst [vmem:[#allocation44_spill] sm:$0xff] %v4885_v60  ;;  %v4918_v14 = vmul.f32 %v4552_v7, %v6302_v49  ;;  %v4933_v49 = vmul.f32 %v4552_v7, %v4456_v56  ;;  %v4951_v56 = vmul.f32 %v4552_v7, %v4440_v6  ;;  %v6314_v6 = vld [vmem:[#allocation67_spill] sm:$0xff] }
 0x333   : > { %2050 = vst [vmem:[%s4594_s30 + $0x290] sm:$0xff] %v4861_v46  ;;  %2044 = vst [vmem:[%s4594_s30 + $0x260] sm:$0xff] %v4865_v34  ;;  %v6300_v46 = vld [vmem:[#allocation90_spill] sm:$0xff]  ;;  %v4962_v58 = vmul.f32 %v4552_v7, %v4416_v26  ;;  %v4980_v26 = vmul.f32 %v4552_v7, %v4408_v17  ;;  %v1827_v41 = vadd.f32 %v4710_v54, %v1826_v52 }
 0x334   : > { %6295 = vst [vmem:[#allocation51_spill] sm:$0xff] %v4896_v10  ;;  %6297 = vst [vmem:[#allocation34_spill] sm:$0xff] %v4900_v50  ;;  %v4914_v42 = vmul.f32 %v4552_v7, %v6300_v46  ;;  %v4966_v46 = vmul.f32 %v4552_v7, %v4424_v32  ;;  %v4984_v32 = vmul.f32 %v4552_v7, %v4384_v11  ;;  %v6316_v52 = vld [vmem:[#allocation66_spill] sm:$0xff] }
 0x335   : > { %2046 = vst [vmem:[%s4594_s30 + $0x270] sm:$0xff] %v4881_v40  ;;  %2040 = vst [vmem:[%s4594_s30 + $0x240] sm:$0xff] %v4885_v60  ;;  %v4995_v17 = vmul.f32 %v4552_v7, %v4392_v61  ;;  %v5011_v61 = vmul.f32 %v4552_v7, %v6316_v52  ;;  %v6322_v52 = vld [vmem:[#allocation53_spill] sm:$0xff] }
 0x336   : > { %6299 = vst [vmem:[#allocation37_spill] sm:$0xff] %v4910_v57  ;;  %6301 = vst [vmem:[#allocation29_spill] sm:$0xff] %v4914_v42 }
 0x337   : > { %6303 = vst [vmem:[#allocation31_spill] sm:$0xff] %v4918_v14  ;;  %2042 = vst [vmem:[%s4594_s30 + $0x250] sm:$0xff] %v4896_v10 }
 0x338   : > { %2036 = vst [vmem:[%s4594_s30 + $0x220] sm:$0xff] %v4900_v50  ;;  %6304 = vst [vmem:[#allocation25_spill] sm:$0xff] %v4929_v43  ;;  %v6346_v50 = vld [vmem:[#allocation77_spill] sm:$0xff] }
 0x339   : > { %6305 = vst [vmem:[#allocation27_spill] sm:$0xff] %v4933_v49  ;;  %2038 = vst [vmem:[%s4594_s30 + $0x230] sm:$0xff] %v4910_v57  ;;  %v6348_v57 = vld [vmem:[#allocation69_spill] sm:$0xff] }
 0x33a   : > { %2032 = vst [vmem:[%s4594_s30 + $0x200] sm:$0xff] %v4914_v42  ;;  %2034 = vst [vmem:[%s4594_s30 + $0x210] sm:$0xff] %v4918_v14  ;;  %v6340_v42 = vld [vmem:[#allocation80_spill] sm:$0xff]  ;;  %v6345_v14 = vld [vmem:[#allocation82_spill] sm:$0xff] }
 0x33b   : > { %6306 = vst [vmem:[#allocation26_spill] sm:$0xff] %v4947_v24  ;;  %6307 = vst [vmem:[#allocation30_spill] sm:$0xff] %v4951_v56 }
 0x33c   : > { %2092 = vst [vmem:[%s4594_s30 + $0x3e0] sm:$0xff] %v4929_v43  ;;  %2094 = vst [vmem:[%s4594_s30 + $0x3f0] sm:$0xff] %v4933_v49  ;;  %v6339_v49 = vld [vmem:[#allocation99_spill] sm:$0xff] }
 0x33d   : > { %6308 = vst [vmem:[#allocation101_spill] sm:$0xff] %v4962_v58  ;;  %6309 = vst [vmem:[#allocation24_spill] sm:$0xff] %v4966_v46 }
 0x33e   : > { %2088 = vst [vmem:[%s4594_s30 + $0x3c0] sm:$0xff] %v4947_v24  ;;  %2090 = vst [vmem:[%s4594_s30 + $0x3d0] sm:$0xff] %v4951_v56  ;;  %v4999_v24 = vmul.f32 %v4552_v7, %v6314_v6  ;;  %v5015_v6 = vmul.f32 %v4552_v7, %v6318_v31  ;;  %v1828_v56 = vadd.f32 %v4727_v27, %v1827_v41 }
 0x33f   : > { %6310 = vst [vmem:[#allocation90_spill] sm:$0xff] %v4976_v3  ;;  %6311 = vst [vmem:[#allocation96_spill] sm:$0xff] %v4980_v26 }
 0x340   : > { %6312 = vst [vmem:[#allocation112_spill] sm:$0xff] %v4984_v32  ;;  %2084 = vst [vmem:[%s4594_s30 + $0x3a0] sm:$0xff] %v4962_v58  ;;  %v6320_v58 = vld [vmem:[#allocation63_spill] sm:$0xff]  ;;  %v1829_v11 = vadd.f32 %v4747_v16, %v1828_v56 }
 0x341   : > { %2086 = vst [vmem:[%s4594_s30 + $0x3b0] sm:$0xff] %v4966_v46  ;;  %6313 = vst [vmem:[#allocation113_spill] sm:$0xff] %v4995_v17  ;;  %v5019_v46 = vmul.f32 %v4552_v7, %v6320_v58 }
 0x342   : > { %6315 = vst [vmem:[#allocation67_spill] sm:$0xff] %v4999_v24  ;;  %2080 = vst [vmem:[%s4594_s30 + $0x380] sm:$0xff] %v4976_v3  ;;  %v5030_v3 = vmul.f32 %v4552_v7, %v6322_v52 }
 0x343   : > { %2082 = vst [vmem:[%s4594_s30 + $0x390] sm:$0xff] %v4980_v26  ;;  %2076 = vst [vmem:[%s4594_s30 + $0x360] sm:$0xff] %v4984_v32  ;;  %v6324_v26 = vld [vmem:[#allocation56_spill] sm:$0xff] }
 0x344   : > { %6317 = vst [vmem:[#allocation66_spill] sm:$0xff] %v5011_v61  ;;  %6319 = vst [vmem:[#allocation60_spill] sm:$0xff] %v5015_v6  ;;  %v5034_v31 = vmul.f32 %v4552_v7, %v6324_v26  ;;  %v1830_v26 = vadd.f32 %v4764_v2, %v1829_v11 }
 0x345   : > { %6321 = vst [vmem:[#allocation63_spill] sm:$0xff] %v5019_v46  ;;  %2078 = vst [vmem:[%s4594_s30 + $0x370] sm:$0xff] %v4995_v17 }
 0x346   : > { %2072 = vst [vmem:[%s4594_s30 + $0x340] sm:$0xff] %v4999_v24  ;;  %6323 = vst [vmem:[#allocation53_spill] sm:$0xff] %v5030_v3  ;;  %v1831_v52 = vadd.f32 %v4786_v9, %v1830_v26  ;;  %v6328_v26 = vld [vmem:[#allocation42_spill] sm:$0xff] }
 0x347   : > { %6325 = vst [vmem:[#allocation56_spill] sm:$0xff] %v5034_v31  ;;  %2074 = vst [vmem:[%s4594_s30 + $0x350] sm:$0xff] %v5011_v61 }
 0x348   : > { %2068 = vst [vmem:[%s4594_s30 + $0x320] sm:$0xff] %v5015_v6  ;;  %2070 = vst [vmem:[%s4594_s30 + $0x330] sm:$0xff] %v5019_v46  ;;  %v1832_v41 = vrot.slane %v1831_v52, 4  ;;  %v6326_v46 = vld [vmem:[#allocation46_spill] sm:$0xff] }
 0x349   : > { %2064 = vst [vmem:[%s4594_s30 + $0x300] sm:$0xff] %v5030_v3  ;;  %2066 = vst [vmem:[%s4594_s30 + $0x310] sm:$0xff] %v5034_v31  ;;  %v6327_v3 = vld [vmem:[#allocation41_spill] sm:$0xff] }
 0x34a   : > { %v1833_v24 = vadd.f32 %v1832_v41, %v1831_v52  ;;  %v6329_v52 = vld [vmem:[#allocation38_spill] sm:$0xff] }
 0x34c   : > { %v1834_v61 = vrot.slane %v1833_v24, 2 }
 0x34e   : > { %v1835_v32 = vadd.f32 %v1834_v61, %v1833_v24  ;;  %v6330_v61 = vld [vmem:[#allocation36_spill] sm:$0xff] }
 0x350   : > { %v1836_v58 = vrot.slane %v1835_v32, 1 }
 0x352   : > { %v1837_v56 = vadd.f32 %v1836_v58, %v1835_v32  ;;  %v6331_v58 = vld [vmem:[#allocation39_spill] sm:$0xff] }
 0x354   : > { %2943 = vrcp.f32 %v1837_v56 }
 0x361   : > { %v5055_v6 = vpop.eup %2943 }
 0x362   : > { %v1869_v7 = vmul.f32 %v5055_v6, %v6326_v46  ;;  %v1871_v11 = vmul.f32 %v5055_v6, %v6327_v3  ;;  %v1865_v41 = vmul.f32 %v5055_v6, %v6328_v26  ;;  %v1867_v24 = vmul.f32 %v5055_v6, %v6329_v52  ;;  %v6332_v46 = vld [vmem:[#allocation33_spill] sm:$0xff]  ;;  %v6333_v3 = vld [vmem:[#allocation35_spill] sm:$0xff]  ;;  %v6334_v52 = vld [vmem:[#allocation28_spill] sm:$0xff] }
 0x363   : > { %v1861_v32 = vmul.f32 %v5055_v6, %v6330_v61  ;;  %v1863_v56 = vmul.f32 %v5055_v6, %v6331_v58  ;;  %v5071_v31 = vmul.f32 %v5055_v6, %v6332_v46  ;;  %v5075_v17 = vmul.f32 %v5055_v6, %v6333_v3  ;;  %v6335_v58 = vld [vmem:[#allocation32_spill] sm:$0xff] }
 0x364   : > { %1997 = vst [vmem:[%s4594_s30 + $0xe8] sm:$0xff] %v1869_v7  ;;  %1999 = vst [vmem:[%s4594_s30 + $0xf8] sm:$0xff] %v1871_v11  ;;  %v2123_v26 = vpack.c.bf16 %v1871_v11, %v1869_v7  ;;  %v5083_v61 = vmul.f32 %v5055_v6, %v6334_v52  ;;  %v5087_v43 = vmul.f32 %v5055_v6, %v6335_v58  ;;  %v6336_v7 = vld [vmem:[#allocation22_spill] sm:$0xff]  ;;  %v6337_v3 = vld [vmem:[#allocation104_spill] sm:$0xff] }
 0x365   : > { %1993 = vst [vmem:[%s4594_s30 + $0xc8] sm:$0xff] %v1865_v41  ;;  %1995 = vst [vmem:[%s4594_s30 + $0xd8] sm:$0xff] %v1867_v24  ;;  %v2122_v46 = vpack.c.bf16 %v4567_v37, %v4563_v55  ;;  %v5099_v11 = vmul.f32 %v5055_v6, %v6336_v7  ;;  %v5103_v52 = vmul.f32 %v5055_v6, %v6337_v3  ;;  %v6338_v37 = vld [vmem:[#allocation93_spill] sm:$0xff] }
 0x366   : > { %1989 = vst [vmem:[%s4594_s30 + $0xa8] sm:$0xff] %v1861_v32  ;;  %1991 = vst [vmem:[%s4594_s30 + $0xb8] sm:$0xff] %v1863_v56  ;;  %2172 = vmatprep.subr.bf16.mxu1 %v2123_v26  ;;  %v2121_v55 = vpack.c.bf16 %v1867_v24, %v1865_v41  ;;  %v5111_v58 = vmul.f32 %v5055_v6, %v6338_v37  ;;  %v5115_v7 = vmul.f32 %v5055_v6, %v6339_v49  ;;  %v6341_v41 = vld [vmem:[#allocation85_spill] sm:$0xff]  ;;  %v6342_v26 = vld [vmem:[#allocation88_spill] sm:$0xff] }
 0x367   : > { %1985 = vst [vmem:[%s4594_s30 + $0x88] sm:$0xff] %v5071_v31  ;;  %1987 = vst [vmem:[%s4594_s30 + $0x98] sm:$0xff] %v5075_v17  ;;  %v5119_v3 = vmul.f32 %v5055_v6, %v6340_v42  ;;  %2173 = vmatpush1.bf16.msra.mxu1 %v2122_v46  ;;  %v5127_v24 = vmul.f32 %v5055_v6, %v6341_v41  ;;  %v5131_v49 = vmul.f32 %v5055_v6, %v6342_v26  ;;  %v6343_v37 = vld [vmem:[#allocation94_spill] sm:$0xff]  ;;  %v6344_v46 = vld [vmem:[#allocation83_spill] sm:$0xff] }
 0x368   : > { %1981 = vst [vmem:[%s4594_s30 + $0x68] sm:$0xff] %v5083_v61  ;;  %1983 = vst [vmem:[%s4594_s30 + $0x78] sm:$0xff] %v5087_v43  ;;  %v5135_v42 = vmul.f32 %v5055_v6, %v6343_v37  ;;  %2174 = vmatprep.subr.bf16.mxu1 %v2121_v55  ;;  %v5145_v41 = vmul.f32 %v5055_v6, %v6344_v46  ;;  %v5149_v26 = vmul.f32 %v5055_v6, %v6345_v14  ;;  %v6347_v55 = vld [vmem:[#allocation78_spill] sm:$0xff] }
 0x369   : > { %1977 = vst [vmem:[%s4594_s30 + $0x48] sm:$0xff] %v5099_v11  ;;  %1979 = vst [vmem:[%s4594_s30 + $0x58] sm:$0xff] %v5103_v52  ;;  %v5153_v37 = vmul.f32 %v5055_v6, %v6346_v50  ;;  %v5163_v46 = vmul.f32 %v5055_v6, %v6347_v55  ;;  %v5167_v14 = vmul.f32 %v5055_v6, %v6348_v57  ;;  %v6349_v50 = vld [vmem:[#allocation73_spill] sm:$0xff]  ;;  %v6350_v55 = vld [vmem:[#allocation62_spill] sm:$0xff] }
 0x36a   : > { %1973 = vst [vmem:[%s4594_s30 + $0x28] sm:$0xff] %v5111_v58  ;;  %1975 = vst [vmem:[%s4594_s30 + $0x38] sm:$0xff] %v5115_v7  ;;  %v2119_v60 = vpack.c.bf16 %v1863_v56, %v1861_v32  ;;  %v5177_v10 = vmul.f32 %v5055_v6, %v6349_v50  ;;  %v5181_v34 = vmul.f32 %v5055_v6, %v6350_v55  ;;  %v6351_v57 = vld [vmem:[#allocation72_spill] sm:$0xff]  ;;  %v6353_v50 = vld [vmem:[#allocation55_spill] sm:$0xff] }
 0x36b   : > { %1969 = vst [vmem:[%s4594_s30 + $0x8] sm:$0xff] %v5119_v3  ;;  %1971 = vst [vmem:[%s4594_s30 + $0x18] sm:$0xff] %v5127_v24  ;;  %v5185_v32 = vmul.f32 %v5055_v6, %v6351_v57  ;;  %v6352_v56 = vpack.c.bf16 %v4577_v12, %v4571_v53  ;;  %v5196_v40 = vmul.f32 %v5055_v6, %v6353_v50  ;;  %v6356_v53 = vld [vmem:[#allocation52_spill] sm:$0xff] }
 0x36c   : > { %2029 = vst [vmem:[%s4594_s30 + $0x1e8] sm:$0xff] %v5131_v49  ;;  %2031 = vst [vmem:[%s4594_s30 + $0x1f8] sm:$0xff] %v5135_v42  ;;  %v5200_v55 = vmul.f32 %v5055_v6, %v6354_v21  ;;  %v5204_v57 = vmul.f32 %v5055_v6, %v6355_v36  ;;  %v5214_v12 = vmul.f32 %v5055_v6, %v6356_v53  ;;  %v6358_v36 = vld [vmem:[#allocation45_spill] sm:$0xff] }
 0x36d   : > { %2025 = vst [vmem:[%s4594_s30 + $0x1c8] sm:$0xff] %v5145_v41  ;;  %2027 = vst [vmem:[%s4594_s30 + $0x1d8] sm:$0xff] %v5149_v26  ;;  %2175 = vmatpush1.bf16.msra.mxu1 %v6352_v56  ;;  %v6357_v56 = vld [vmem:[#allocation49_spill] sm:$0xff]  ;;  %v5232_v50 = vmul.f32 %v5055_v6, %v4538_v13  ;;  %v5236_v53 = vmul.f32 %v5055_v6, %v4541_v18  ;;  %v5250_v13 = vmul.f32 %v5055_v6, %v4536_v59 }
 0x36e   : > { %2021 = vst [vmem:[%s4594_s30 + $0x1a8] sm:$0xff] %v5153_v37  ;;  %2023 = vst [vmem:[%s4594_s30 + $0x1b8] sm:$0xff] %v5163_v46  ;;  %2176 = vmatprep.subr.bf16.mxu1 %v2119_v60  ;;  %v5218_v21 = vmul.f32 %v5055_v6, %v6357_v56  ;;  %v5228_v60 = vmul.f32 %v5055_v6, %v6358_v36  ;;  %v2117_v56 = vpack.c.bf16 %v5075_v17, %v5071_v31 }
 0x36f   : > { %2017 = vst [vmem:[%s4594_s30 + $0x188] sm:$0xff] %v5167_v14  ;;  %2019 = vst [vmem:[%s4594_s30 + $0x198] sm:$0xff] %v5177_v10  ;;  %v5246_v36 = vmul.f32 %v5055_v6, %v4533_v0  ;;  %v5254_v18 = vmul.f32 %v5055_v6, %v4522_v22  ;;  %v6359_v17 = vpack.c.bf16 %v4585_v62, %v4581_v63  ;;  %v6362_v63 = vld [vmem:[#allocation110_spill] sm:$0xff] }
 0x370   : > { %2013 = vst [vmem:[%s4594_s30 + $0x168] sm:$0xff] %v5181_v34  ;;  %2015 = vst [vmem:[%s4594_s30 + $0x178] sm:$0xff] %v5185_v32  ;;  %v5267_v0 = vmul.f32 %v5055_v6, %v4529_v5  ;;  %v5271_v22 = vmul.f32 %v5055_v6, %v4508_v48  ;;  %v5281_v59 = vmul.f32 %v5055_v6, %v4515_v15  ;;  %v6363_v15 = vld [vmem:[#allocation107_spill] sm:$0xff] }
 0x371   : > { %2009 = vst [vmem:[%s4594_s30 + $0x148] sm:$0xff] %v5196_v40  ;;  %2011 = vst [vmem:[%s4594_s30 + $0x158] sm:$0xff] %v5200_v55  ;;  %2177 = vmatpush1.bf16.msra.mxu1 %v6359_v17  ;;  %v5285_v5 = vmul.f32 %v5055_v6, %v4494_v25  ;;  %v5289_v48 = vmul.f32 %v5055_v6, %v6362_v63  ;;  %v2115_v62 = vpack.c.bf16 %v5087_v43, %v5083_v61  ;;  %v6364_v25 = vld [vmem:[#allocation109_spill] sm:$0xff] }
 0x372   : > { %2005 = vst [vmem:[%s4594_s30 + $0x128] sm:$0xff] %v5204_v57  ;;  %2007 = vst [vmem:[%s4594_s30 + $0x138] sm:$0xff] %v5214_v12  ;;  %2178 = vmatprep.subr.bf16.mxu1 %v2117_v56  ;;  %v5299_v31 = vmul.f32 %v5055_v6, %v6363_v15  ;;  %v5303_v56 = vmul.f32 %v5055_v6, %v6364_v25  ;;  %v6365_v17 = vld [vmem:[#allocation105_spill] sm:$0xff]  ;;  %v2113_v43 = vpack.c.bf16 %v5103_v52, %v5099_v11  ;;  %v6366_v15 = vld [vmem:[#allocation106_spill] sm:$0xff] }
 0x373   : > { %2001 = vst [vmem:[%s4594_s30 + $0x108] sm:$0xff] %v5218_v21  ;;  %2003 = vst [vmem:[%s4594_s30 + $0x118] sm:$0xff] %v5228_v60  ;;  %v5307_v63 = vmul.f32 %v5055_v6, %v6365_v17  ;;  %v5321_v25 = vmul.f32 %v5055_v6, %v6366_v15  ;;  %v6367_v17 = vld [vmem:[#allocation100_spill] sm:$0xff]  ;;  %v6368_v11 = vld [vmem:[#allocation54_spill] sm:$0xff] }
 0x374   : > { %2061 = vst [vmem:[%s4594_s30 + $0x2e8] sm:$0xff] %v5232_v50  ;;  %2063 = vst [vmem:[%s4594_s30 + $0x2f8] sm:$0xff] %v5236_v53  ;;  %v6369_v52 = vld [vmem:[#allocation50_spill] sm:$0xff]  ;;  %v6371_v15 = vld [vmem:[#allocation103_spill] sm:$0xff] }
 0x375   : > { %6360 = vst [vmem:[#allocation46_spill] sm:$0xff] %v5267_v0  ;;  %6361 = vst [vmem:[#allocation41_spill] sm:$0xff] %v5271_v22  ;;  %v6381_v61 = vld [vmem:[#allocation61_spill] sm:$0xff] }
 0x376   : > { %2057 = vst [vmem:[%s4594_s30 + $0x2c8] sm:$0xff] %v5246_v36  ;;  %2059 = vst [vmem:[%s4594_s30 + $0x2d8] sm:$0xff] %v5250_v13 }
 0x377   : > { %2053 = vst [vmem:[%s4594_s30 + $0x2a8] sm:$0xff] %v5254_v18  ;;  %2055 = vst [vmem:[%s4594_s30 + $0x2b8] sm:$0xff] %v5267_v0  ;;  %v6370_v0 = vpack.c.bf16 %v6368_v11, %v6369_v52  ;;  %v5344_v11 = vmul.f32 %v5055_v6, %v4764_v2  ;;  %v5362_v2 = vmul.f32 %v5055_v6, %v4747_v16 }
 0x378   : > { %2049 = vst [vmem:[%s4594_s30 + $0x288] sm:$0xff] %v5271_v22  ;;  %2051 = vst [vmem:[%s4594_s30 + $0x298] sm:$0xff] %v5281_v59  ;;  %v5325_v22 = vmul.f32 %v5055_v6, %v6367_v17  ;;  %v5340_v17 = vmul.f32 %v5055_v6, %v6371_v15  ;;  %v5358_v15 = vmul.f32 %v5055_v6, %v4727_v27 }
 0x379   : > { %2045 = vst [vmem:[%s4594_s30 + $0x268] sm:$0xff] %v5285_v5  ;;  %2047 = vst [vmem:[%s4594_s30 + $0x278] sm:$0xff] %v5289_v48  ;;  %2179 = vmatpush1.bf16.msra.mxu1 %v6370_v0  ;;  %v5348_v0 = vmul.f32 %v5055_v6, %v4786_v9  ;;  %v5366_v9 = vmul.f32 %v5055_v6, %v4690_v4  ;;  %v5380_v16 = vmul.f32 %v5055_v6, %v4710_v54 }
 0x37a   : > { %2041 = vst [vmem:[%s4594_s30 + $0x248] sm:$0xff] %v5299_v31  ;;  %2043 = vst [vmem:[%s4594_s30 + $0x258] sm:$0xff] %v5303_v56  ;;  %2180 = vmatprep.subr.bf16.mxu1 %v2115_v62  ;;  %v5384_v4 = vmul.f32 %v5055_v6, %v4653_v8  ;;  %v5396_v54 = vmul.f32 %v5055_v6, %v4673_v30  ;;  %v5400_v8 = vmul.f32 %v5055_v6, %v4614_v51  ;;  %v6380_v62 = vld [vmem:[#allocation108_spill] sm:$0xff] }
 0x37b   : > { %2037 = vst [vmem:[%s4594_s30 + $0x228] sm:$0xff] %v5307_v63  ;;  %2039 = vst [vmem:[%s4594_s30 + $0x238] sm:$0xff] %v5321_v25  ;;  %v5404_v27 = vmul.f32 %v5055_v6, %v4636_v28  ;;  %v6374_v52 = vpack.c.bf16 %v4630_v29, %v4608_v19  ;;  %v5417_v51 = vmul.f32 %v5055_v6, %v4573_v1  ;;  %v6375_v19 = vld [vmem:[#allocation40_spill] sm:$0xff] }
 0x37c   : > { %2033 = vst [vmem:[%s4594_s30 + $0x208] sm:$0xff] %v5325_v22  ;;  %2035 = vst [vmem:[%s4594_s30 + $0x218] sm:$0xff] %v5340_v17  ;;  %v5421_v28 = vmul.f32 %v5055_v6, %v4591_v38  ;;  %v5425_v29 = vmul.f32 %v5055_v6, %v6375_v19  ;;  %v6377_v38 = vld [vmem:[#allocation47_spill] sm:$0xff]  ;;  %v5455_v1 = vmul.f32 %v5055_v6, %v6380_v62  ;;  %v6385_v62 = vld [vmem:[#allocation64_spill] sm:$0xff] }
 0x37d   : > { %2093 = vst [vmem:[%s4594_s30 + $0x3e8] sm:$0xff] %v5344_v11  ;;  %2095 = vst [vmem:[%s4594_s30 + $0x3f8] sm:$0xff] %v5348_v0  ;;  %2181 = vmatpush1.bf16.msra.mxu1 %v6374_v52  ;;  %v5439_v30 = vmul.f32 %v5055_v6, %v6377_v38  ;;  %v6378_v19 = vld [vmem:[#allocation111_spill] sm:$0xff]  ;;  %v2111_v38 = vpack.c.bf16 %v5115_v7, %v5111_v58  ;;  %v2109_v58 = vpack.c.bf16 %v5127_v24, %v5119_v3  ;;  %v6384_v7 = vld [vmem:[#allocation68_spill] sm:$0xff] }
 0x37e   : > { %2089 = vst [vmem:[%s4594_s30 + $0x3c8] sm:$0xff] %v5358_v15  ;;  %2091 = vst [vmem:[%s4594_s30 + $0x3d8] sm:$0xff] %v5362_v2  ;;  %2182 = vmatprep.subr.bf16.mxu1 %v2113_v43  ;;  %v5443_v43 = vmul.f32 %v5055_v6, %v6378_v19  ;;  %v6386_v52 = vpack.c.bf16 %v6384_v7, %v6385_v62  ;;  %v2139_v19 = vpack.c.bf16 %v5135_v42, %v5131_v49  ;;  %v6391_v6 = vld [vmem:[#allocation81_spill] sm:$0xff]  ;;  %v6412_v62 = vld [vmem:[#allocation98_spill] sm:$0xff] }
 0x37f   : > { %2085 = vst [vmem:[%s4594_s30 + $0x3a8] sm:$0xff] %v5366_v9  ;;  %6372 = vst [vmem:[#allocation42_spill] sm:$0xff] %v5400_v8  ;;  %v2135_v3 = vpack.c.bf16 %v5163_v46, %v5153_v37  ;;  %v6393_v24 = vld [vmem:[#allocation97_spill] sm:$0xff]  ;;  %v2133_v42 = vpack.c.bf16 %v5177_v10, %v5167_v14  ;;  %v2129_v37 = vpack.c.bf16 %v5200_v55, %v5196_v40 }
 0x380   : > { %6373 = vst [vmem:[#allocation38_spill] sm:$0xff] %v5404_v27  ;;  %2087 = vst [vmem:[%s4594_s30 + $0x3b8] sm:$0xff] %v5380_v16  ;;  %v6402_v46 = vld [vmem:[#allocation89_spill] sm:$0xff]  ;;  %v2127_v10 = vpack.c.bf16 %v5214_v12, %v5204_v57  ;;  %v6404_v14 = vpack.c.bf16 %v4776_v45, %v4762_v23  ;;  %v6405_v40 = vpack.c.bf16 %v4784_v44, %v4780_v35  ;;  %v6406_v57 = vld [vmem:[#allocation43_spill] sm:$0xff] }
 0x381   : > { %2081 = vst [vmem:[%s4594_s30 + $0x388] sm:$0xff] %v5384_v4  ;;  %6376 = vst [vmem:[#allocation36_spill] sm:$0xff] %v5425_v29  ;;  %v6403_v7 = vpack.c.bf16 %v4758_v39, %v6402_v46  ;;  %v2155_v55 = vpack.c.bf16 %v5236_v53, %v5232_v50  ;;  %v2104_v12 = vpack.c.bf16 %v6406_v57, %v6406_v57  ;;  %v6408_v44 = vld [vmem:[#allocation79_spill] sm:$0xff]  ;;  %v6411_v53 = vld [vmem:[#allocation74_spill] sm:$0xff] }
 0x382   : > { %2083 = vst [vmem:[%s4594_s30 + $0x398] sm:$0xff] %v5396_v54  ;;  %2077 = vst [vmem:[%s4594_s30 + $0x368] sm:$0xff] %v5400_v8  ;;  %v6382_v8 = vld [vmem:[#allocation57_spill] sm:$0xff]  ;;  %v6407_v45 = vpack.c.bf16 %v4801_v47, %v4797_v20  ;;  %v6409_v35 = vpack.c.bf16 %v4828_v33, %v6408_v44  ;;  %v6418_v33 = vld [vmem:[#allocation75_spill] sm:$0xff] }
 0x383   : > { %2079 = vst [vmem:[%s4594_s30 + $0x378] sm:$0xff] %v5404_v27  ;;  %6379 = vst [vmem:[#allocation39_spill] sm:$0xff] %v5443_v43  ;;  %v6383_v27 = vpack.c.bf16 %v6381_v61, %v6382_v8  ;;  %v6388_v61 = vld [vmem:[#allocation71_spill] sm:$0xff]  ;;  %v2137_v8 = vpack.c.bf16 %v5149_v26, %v5145_v41  ;;  %v2131_v26 = vpack.c.bf16 %v5185_v32, %v5181_v34  ;;  %v6414_v20 = vld [vmem:[#allocation41_spill] sm:$0xff] }
 0x384   : > { %2073 = vst [vmem:[%s4594_s30 + $0x348] sm:$0xff] %v5417_v51  ;;  %2075 = vst [vmem:[%s4594_s30 + $0x358] sm:$0xff] %v5421_v28  ;;  %v2097_v34 = vld [vmem:[%s331_s29 + $0x8] sm:$0xff]  ;;  %v2125_v32 = vpack.c.bf16 %v5228_v60, %v5218_v21  ;;  %v2153_v21 = vpack.c.bf16 %v5250_v13, %v5246_v36  ;;  %v6410_v60 = vld [vmem:[#allocation46_spill] sm:$0xff]  ;;  %v2149_v47 = vpack.c.bf16 %v5281_v59, %v6414_v20 }
 0x385   : > { %2069 = vst [vmem:[%s4594_s30 + $0x328] sm:$0xff] %v5425_v29  ;;  %2071 = vst [vmem:[%s4594_s30 + $0x338] sm:$0xff] %v5439_v30  ;;  %2183 = vmatpush1.bf16.msra.mxu1 %v6383_v27  ;;  %v6387_v29 = vld [vmem:[#allocation76_spill] sm:$0xff]  ;;  %v2101_v39 = vcombine.high %v2097_v34, %v2097_v34  ;;  %v2151_v50 = vpack.c.bf16 %v6410_v60, %v5254_v18  ;;  %v6419_v13 = vld [vmem:[#allocation87_spill] sm:$0xff]  ;;  %v6421_v18 = vpack.c.bf16 %v5289_v48, %v5285_v5 }
 0x386   : > { %2065 = vst [vmem:[%s4594_s30 + $0x308] sm:$0xff] %v5443_v43  ;;  %2067 = vst [vmem:[%s4594_s30 + $0x318] sm:$0xff] %v5455_v1  ;;  %2184 = vmatprep.subr.bf16.mxu1 %v2111_v38  ;;  %v6389_v27 = vpack.c.bf16 %v6387_v29, %v6388_v61  ;;  %v6390_v38 = vld [vmem:[#allocation86_spill] sm:$0xff]  ;;  %v6396_v29 = vld [vmem:[#allocation95_spill] sm:$0xff]  ;;  %v6413_v61 = vpack.c.bf16 %v6411_v53, %v6412_v62  ;;  %v6425_v59 = vpack.c.bf16 %v5303_v56, %v5299_v31 }
 0x387   : > { %v6392_v43 = vpack.c.bf16 %v6390_v38, %v6391_v6  ;;  %v6400_v6 = vld [vmem:[#allocation23_spill] sm:$0xff]  ;;  %v2107_v23 = vpack.c.bf16 %v2101_v39, %v2101_v39  ;;  %v6420_v38 = vpack.c.bf16 %v6418_v33, %v6419_v13  ;;  %v6433_v48 = vpack.c.bf16 %v5340_v17, %v5325_v22  ;;  %v6442_v46 = vld [vmem:[#allocation30_spill] sm:$0xff]  ;;  %v6471_v62 = vld [vmem:[#allocation53_spill] sm:$0xff] }
 0x388   : > { %v6437_v56 = vpack.c.bf16 %v5348_v0, %v5344_v11  ;;  %v6445_v17 = vpack.c.bf16 %v5380_v16, %v5366_v9  ;;  %v6446_v11 = vld [vmem:[#allocation24_spill] sm:$0xff]  ;;  %v6447_v0 = vld [vmem:[#allocation101_spill] sm:$0xff]  ;;  %v6454_v39 = vld [vmem:[#allocation42_spill] sm:$0xff] }
 0x389   : > { %2185 = vmatpush1.bf16.msra.mxu1 %v6386_v52  ;;  %v6394_v52 = vld [vmem:[#allocation91_spill] sm:$0xff]  ;;  %v6456_v9 = vld [vmem:[#allocation113_spill] sm:$0xff]  ;;  %v6457_v16 = vld [vmem:[#allocation112_spill] sm:$0xff] }
 0x38a   : > { %2186 = vmatprep.subr.bf16.mxu1 %v2109_v58  ;;  %v6395_v49 = vpack.c.bf16 %v6393_v24, %v6394_v52  ;;  %v6423_v24 = vld [vmem:[#allocation58_spill] sm:$0xff]  ;;  %v6458_v57 = vpack.c.bf16 %v6456_v9, %v6457_v16  ;;  %v6465_v44 = vld [vmem:[#allocation63_spill] sm:$0xff]  ;;  %v2256_v20 = vld [vmem:[%s3381_s16] sm:$0xff] }
 0x38b   : > { %2261 = vst [vmem:[%s5625_s28 + $0x8] sm:$0xf0] %v2256_v20 }
 0x38d   : > { %2187 = vmatpush1.bf16.msra.mxu1 %v6389_v27  ;;  %v6415_v27 = vld [vmem:[#allocation70_spill] sm:$0xff] }
 0x38e   : > { %2188 = vmatprep.subr.bf16.mxu1 %v2139_v19  ;;  %v6397_v19 = vld [vmem:[#allocation102_spill] sm:$0xff] }
 0x38f   : > { %v6398_v41 = vpack.c.bf16 %v6396_v29, %v6397_v19  ;;  %v6429_v19 = vpack.c.bf16 %v5321_v25, %v5307_v63  ;;  %v6441_v25 = vpack.c.bf16 %v5362_v2, %v5358_v15  ;;  %v6450_v15 = vld [vmem:[#allocation96_spill] sm:$0xff]  ;;  %v6451_v2 = vld [vmem:[#allocation90_spill] sm:$0xff] }
 0x391   : > { %2189 = vmatpush2.bf16.msra.mxu1 %v6392_v43  ;;  %v6399_v43 = vld [vmem:[#allocation84_spill] sm:$0xff] }
 0x392   : > { %2190 = vmatprep.subr.bf16.mxu1 %v2137_v8  ;;  %v6401_v58 = vpack.c.bf16 %v6399_v43, %v6400_v6  ;;  %v6416_v8 = vld [vmem:[#allocation92_spill] sm:$0xff]  ;;  %v6434_v43 = vld [vmem:[#allocation31_spill] sm:$0xff]  ;;  %v6435_v6 = vld [vmem:[#allocation29_spill] sm:$0xff] }
 0x393   : > { %v6417_v36 = vpack.c.bf16 %v6415_v27, %v6416_v8  ;;  %v6436_v31 = vpack.c.bf16 %v6434_v43, %v6435_v6 }
 0x395   : > { %2191 = vmatpush2.bf16.msra.mxu1 %v6395_v49  ;;  %v6426_v49 = vld [vmem:[#allocation51_spill] sm:$0xff] }
 0x396   : > { %2192 = vmatprep.subr.bf16.mxu1 %v2135_v3  ;;  %v6422_v3 = vld [vmem:[#allocation65_spill] sm:$0xff] }
 0x397   : > { %v6424_v52 = vpack.c.bf16 %v6422_v3, %v6423_v24 }
 0x399   : > { %2193 = vmatpush2.bf16.msra.mxu1 %v6398_v41  ;;  %v6430_v41 = vld [vmem:[#allocation37_spill] sm:$0xff] }
 0x39a   : > { %2194 = vmatprep.subr.bf16.mxu1 %v2133_v42  ;;  %v6427_v42 = vld [vmem:[#allocation44_spill] sm:$0xff] }
 0x39b   : > { %v6428_v29 = vpack.c.bf16 %v6426_v49, %v6427_v42 }
 0x39d   : > { %2195 = vmatpush2.bf16.msra.mxu1 %v6401_v58  ;;  %v6438_v58 = vld [vmem:[#allocation27_spill] sm:$0xff] }
 0x39e   : > { %2196 = vmatprep.subr.bf16.mxu1 %v2131_v26  ;;  %v6431_v26 = vld [vmem:[#allocation34_spill] sm:$0xff] }
 0x39f   : > { %v6432_v5 = vpack.c.bf16 %v6430_v41, %v6431_v26 }
 0x3a1   : > { %2197 = vmatpush2.bf16.msra.mxu1 %v6403_v7  ;;  %v6443_v7 = vld [vmem:[#allocation26_spill] sm:$0xff] }
 0x3a2   : > { %2198 = vmatprep.subr.bf16.mxu1 %v2129_v37  ;;  %v6439_v37 = vld [vmem:[#allocation25_spill] sm:$0xff]  ;;  %v6444_v22 = vpack.c.bf16 %v6442_v46, %v6443_v7 }
 0x3a3   : > { %v6440_v63 = vpack.c.bf16 %v6438_v58, %v6439_v37 }
 0x3a5   : > { %2199 = vmatpush2.bf16.msra.mxu1 %v6404_v14  ;;  %v6449_v14 = vpack.c.bf16 %v5396_v54, %v5384_v4  ;;  %v6460_v4 = vld [vmem:[#allocation66_spill] sm:$0xff]  ;;  %v6461_v54 = vld [vmem:[#allocation67_spill] sm:$0xff] }
 0x3a6   : > { %2200 = vmatprep.subr.bf16.mxu1 %v2127_v10  ;;  %v6448_v10 = vpack.c.bf16 %v6446_v11, %v6447_v0 }
 0x3a9   : > { %2201 = vmatpush2.bf16.msra.mxu1 %v6405_v40  ;;  %v6453_v40 = vld [vmem:[#allocation38_spill] sm:$0xff] }
 0x3aa   : > { %2202 = vmatprep.subr.bf16.mxu1 %v2125_v32  ;;  %v6452_v32 = vpack.c.bf16 %v6450_v15, %v6451_v2 }
 0x3ad   : > { %2203 = vmatpush2.bf16.msra.mxu1 %v6407_v45  ;;  %v6462_v45 = vpack.c.bf16 %v6460_v4, %v6461_v54 }
 0x3ae   : > { %2213 = vmatprep.subr.bf16.mxu1 %v2155_v55  ;;  %v6455_v55 = vpack.c.bf16 %v6453_v40, %v6454_v39 }
 0x3b0   : > { %2205 = vmatmul.mubr.bf16.vlgmr.msra.gmra.mxu1 %v2104_v12  ;;  %v6459_v12 = vpack.c.bf16 %v5421_v28, %v5417_v51  ;;  %v2106_v51 = vpack.c.bf16 %v2097_v34, %v2097_v34  ;;  %v6470_v28 = vld [vmem:[#allocation56_spill] sm:$0xff] }
 0x3b1   : > { %2214 = vmatpush1.bf16.msra.mxu1 %v6409_v35  ;;  %2245 = vmatprep.mubr.bf16.mxu1 %v2107_v23  ;;  %v6463_v23 = vld [vmem:[#allocation36_spill] sm:$0xff] }
 0x3b2   : > { %2215 = vmatprep.subr.bf16.mxu1 %v2153_v21  ;;  %v6464_v21 = vpack.c.bf16 %v5439_v30, %v6463_v23  ;;  %v6466_v35 = vld [vmem:[#allocation60_spill] sm:$0xff]  ;;  %v2258_v30 = vcombine.low %v2256_v20, %v2256_v20 }
 0x3b3   : > { %v6467_v60 = vpack.c.bf16 %v6465_v44, %v6466_v35 }
 0x3b4   : > { %2260 = vst [vmem:[%s5625_s28] sm:$0xf0] %v2258_v30 }
 0x3b5   : > { %2216 = vmatpush1.bf16.msra.mxu1 %v6413_v61  ;;  %v6472_v61 = vpack.c.bf16 %v6470_v28, %v6471_v62 }
 0x3b6   : > { %2217 = vmatprep.subr.bf16.mxu1 %v2151_v50  ;;  %v6468_v50 = vld [vmem:[#allocation39_spill] sm:$0xff] }
 0x3b7   : > { %v6469_v53 = vpack.c.bf16 %v5455_v1, %v6468_v50 }
 0x3b9   : > { %2218 = vmatpush1.bf16.msra.mxu1 %v6417_v36 }
 0x3ba   : > { %2219 = vmatprep.subr.bf16.mxu1 %v2149_v47 }
 0x3bd   : > { %2220 = vmatpush1.bf16.msra.mxu1 %v6420_v38 }
 0x3be   : > { %2221 = vmatprep.subr.bf16.mxu1 %v6421_v18 }
 0x3c1   : > { %2222 = vmatpush1.bf16.msra.mxu1 %v6424_v52 }
 0x3c2   : > { %2223 = vmatprep.subr.bf16.mxu1 %v6425_v59 }
 0x3c5   : > { %2224 = vmatpush1.bf16.msra.mxu1 %v6428_v29 }
 0x3c6   : > { %2225 = vmatprep.subr.bf16.mxu1 %v6429_v19 }
 0x3c9   : > { %2226 = vmatpush1.bf16.msra.mxu1 %v6432_v5 }
 0x3ca   : > { %2227 = vmatprep.subr.bf16.mxu1 %v6433_v48 }
 0x3cd   : > { %2228 = vmatpush1.bf16.msra.mxu1 %v6436_v31 }
 0x3ce   : > { %2229 = vmatprep.subr.bf16.mxu1 %v6437_v56 }
 0x3d1   : > { %2230 = vmatpush2.bf16.msra.mxu1 %v6440_v63 }
 0x3d2   : > { %2231 = vmatprep.subr.bf16.mxu1 %v6441_v25 }
 0x3d5   : > { %2232 = vmatpush2.bf16.msra.mxu1 %v6444_v22 }
 0x3d6   : > { %2233 = vmatprep.subr.bf16.mxu1 %v6445_v17 }
 0x3d9   : > { %2234 = vmatpush2.bf16.msra.mxu1 %v6448_v10 }
 0x3da   : > { %2235 = vmatprep.subr.bf16.mxu1 %v6449_v14 }
 0x3dd   : > { %2236 = vmatpush2.bf16.msra.mxu1 %v6452_v32 }
 0x3de   : > { %2237 = vmatprep.subr.bf16.mxu1 %v6455_v55 }
 0x3e1   : > { %2238 = vmatpush2.bf16.msra.mxu1 %v6458_v57 }
 0x3e2   : > { %2239 = vmatprep.subr.bf16.mxu1 %v6459_v12 }
 0x3e5   : > { %2240 = vmatpush2.bf16.msra.mxu1 %v6462_v45 }
 0x3e6   : > { %2241 = vmatprep.subr.bf16.mxu1 %v6464_v21 }
 0x3e9   : > { %2242 = vmatpush2.bf16.msra.mxu1 %v6467_v60 }
 0x3ea   : > { %2243 = vmatprep.subr.bf16.mxu1 %v6469_v53 }
 0x3ed   : > { %2244 = vmatpush2.bf16.msra.mxu1 %v6472_v61 }
 0x3f0   : > { %2246 = vmatmul.mubr.bf16.vlgmr.msra.gmra.mxu1 %v2106_v51 }
 0x3f1   : > { %3070 = shalt.err (!%p3067_p13)
}
 0x3f2   : > { %s3071_s10 = scalar_lea.hbm %s5621_s15, 16384  ;;  %s3075_s29 = scalar_lea.hbm %s5713_s4, 32768 }
 0x3f3   : > { %p3072_p12 = scmp.ne.s32.totalorder %s5621_s15, %s3071_s10  ;;  %p3076_p2 = scmp.lt.s32.totalorder %s5621_s15, %s5713_s4 }
 0x3f4   : > { %p3077_p6 = scmp.lt.s32.totalorder %s3075_s29, %s3071_s10 }
 0x3f5   : > { %p3073_p1 = pnand %p3072_p12, %p3271_p9 }
 0x3f6   : > { %p3078_p8 = por %p3077_p6, %p3076_p2 }
 0x3f7   : > { %p3074_p5 = pneg %p3073_p1 }
 0x3f9   : > { %p3079_p0 = pnand %p3078_p8, %p3074_p5 }
 0x3fb   : > { %3082 = shalt.err (!%p3079_p0)
}
 0x3fc   : > { %s3183_s24 = smov 256   ;;  %s3184_s30 = smov 16  }
 0x3fd   : > { %2603 = dma.vmem_to_hbm [thread:$0]  (%p3271_p9), %s5628_s20, 16384, %s5621_s15, %s2263_s7, %s3183_s24, %s3183_s24, %s3184_s30  }
 0x3fe   : > { %s2592_s25 = sshll.u32 %s3167_s21, 8  ;;  %s2302_s17 = sshll.u32 %s5625_s28, 4  ;;  %s5662_s17 = int_to_ptr.vmem [resolvable:$true] %s2302_s17 }
 0x3ff   : > { %s5660_s23 = scalar_lea.hbm %s5714_s5, %s2592_s25  ;;  %s2268_s15 = scalar_lea.sflag [#allocation12], %s3362_s9 }
 0x400   : > { %s3083_s21 = scalar_lea.vmem %s5662_s17, 256  ;;  %s3185_s20 = smov [#allocation11]  }
 0x401   : > { %p3084_p3 = scmp.ne.s32.totalorder %s5662_s17, %s3083_s21  ;;  %s3087_s7 = sshll.u32 %s3185_s20, 4  ;;  %s3088_s7 = int_to_ptr.vmem [resolvable:$false] %s3087_s7 }
 0x402   : > { %s3089_s12 = scalar_lea.vmem %s3088_s7, 512  ;;  %p3090_p10 = scmp.lt.s32.totalorder %s5662_s17, %s3088_s7 }
 0x403   : > { %p3085_p4 = pnand %p3084_p3, %p3271_p9  ;;  %p3091_p13 = scmp.lt.s32.totalorder %s3089_s12, %s3083_s21 }
 0x405   : > { %p3086_p7 = pneg %p3085_p4  ;;  %p3092_p12 = por %p3091_p13, %p3090_p10 }
 0x407   : > { %p3093_p1 = pnand %p3092_p12, %p3086_p7 }
 0x470   : > { %v2206_v1 = vpop.f32.mrf.mxu1 }
 0x472   : > { %v2208_v34 = vpop.f32.mrf.mxu1 }
 0x474   : > { %v2210_v47 = vpop.f32.mrf.mxu1 }
 0x476   : > { %v2211_v27 = vpop.f32.mrf.mxu1 }
 0x4b0   : > { %v2247_v8 = vpop.f32.mrf.mxu1 }
 0x4b1   : > { %v2248_v36 = vadd.f32 %v2247_v8, %v2206_v1 }
 0x4b2   : > { %v2249_v33 = vpop.f32.mrf.mxu1 }
 0x4b3   : > { %2254 = vst [vmem:[%s5625_s28] sm:$0xf] %v2248_v36  ;;  %v2250_v13 = vadd.f32 %v2249_v33, %v2208_v34 }
 0x4b4   : > { %v2251_v38 = vpop.f32.mrf.mxu1 }
 0x4b5   : > { %2255 = vst [vmem:[%s5625_s28 + $0x8] sm:$0xf] %v2250_v13 }
 0x4b6   : > { %v2252_v18 = vpop.f32.mrf.mxu1 }
 0x4b7   : > { %3096 = shalt.err (!%p3093_p1)
}
 0x4b8   : > { %s3097_s28 = scalar_lea.hbm %s5660_s23, 256  ;;  %s3101_s10 = scalar_lea.hbm %s5714_s5, 512 }
 0x4b9   : > { %p3098_p5 = scmp.ne.s32.totalorder %s5660_s23, %s3097_s28  ;;  %p3102_p8 = scmp.lt.s32.totalorder %s5660_s23, %s5714_s5 }
 0x4ba   : > { %p3103_p0 = scmp.lt.s32.totalorder %s3101_s10, %s3097_s28 }
 0x4bb   : > { %p3099_p2 = pnand %p3098_p5, %p3271_p9 }
 0x4bc   : > { %p3104_p3 = por %p3103_p0, %p3102_p8 }
 0x4bd   : > { %p3100_p6 = pneg %p3099_p2 }
 0x4bf   : > { %p3105_p4 = pnand %p3104_p3, %p3100_p6 }
 0x4c1   : > { %3108 = shalt.err (!%p3105_p4)
}
 0x4c2   : > { %2604 = dma.vmem_to_hbm [thread:$0]  (%p3271_p9), %s5662_s17, 256, %s5660_s23, %s2268_s15  }
 0x4c3 PF: > { %s6473_s29 = sld [smem:[#allocation19_spill]]  ;;  %s2314_s14 = sand.u32 1, %s3155_s18  }
 0x4c4   : > { %s2315_s16 = scalar_lea.sflag [#allocation4], %s2314_s14 }
 0x4c9   : > { %p6474_p7 = scmp.ge.s32.totalorder %s6473_s29, 2 }
 0x4cb   : > { %p2621_p10 = pnand %p6474_p7, %p3278_p11 }
 0x4cd   : > { %p2622_p13 = pneg %p2621_p10 }
 0x4cf   : > { %3146 = dma.done.wait (%p2622_p13), %s2315_s16, 16384  }
 0x4d0   : > { %3148 = vsyncadd (%p2622_p13), %s2315_s16, 4294950912  ;;  %s2324_s24 = scalar_lea.sflag [#allocation12], %s2314_s14 }
 0x4d1   : > { %3150 = dma.done.wait (%p2622_p13), %s2324_s24, 256  }
 0x4d2   : > { %3152 = vsyncadd (%p2622_p13), %s2324_s24, 4294967040  ;;  %s31_s23 = sadd.s32 1, %s6473_s29   ;;  %s6475_s6 = sld [smem:[#allocation18_spill]] }
 0x4d3   : > { %p28_p12 = scmp.ge.s32.totalorder %s31_s23, 4   ;;  %s6476_s20 = sld [smem:[#allocation21_spill]] }
 0x4d4   : > { %s6477_s30 = sld [smem:[#allocation20_spill]]  ;;  %s6478_s18 = smov %s3159_s19 }
 0x4d5   : > { %s6480_s21 = smov %s3171_s22 }
 0x4d6   :  { %30 = sbr.rel (!%p28_p12) target bundleno = 14 (0xe), region = 135 }
 0x4d8   : > { %s6479_s19 = smov %s6475_s6 }
 0x4da   : > { %s6481_s22 = smov %s6477_s30 }
 0x4db   :  { %2329 = vsyncpa [#allocation3], 1 }
 0x4dc   :  { %2331 = vsyncpa [#allocation3 + $0x1], 1 }
 0x4dd   :  { %2332 = vsyncpa [#allocation6], 1 }
 0x4de   :  { %2334 = vsyncpa [#allocation6 + $0x1], 1 }
 0x4df   :  { %2335 = vsyncpa [#allocation9], 1 }
 0x4e0   :  { %2337 = vsyncpa [#allocation9 + $0x1], 1 }
 0x4e1   :  { %2338 = vsyncpa [#allocation4], 1 }
 0x4e2   :  { %2340 = vsyncpa [#allocation4 + $0x1], 1 }
 0x4e3   :  { %2341 = vsyncpa [#allocation12], 1 }
 0x4e4   :  { %2343 = vsyncpa [#allocation12 + $0x1], 1 }

</bundles_post_ra>
